<compile_context>
chip_gen: v7x
topology: tpu7x:2x2x1
jax: 0.10.0
libtpu: 0.0.40
codegen_flags: <defaults>
</compile_context>

<pallas_src>
from functools import partial

import jax
import jax.numpy as jnp
from jax.experimental import pallas as pl
from jax.experimental.pallas import tpu as pltpu

_SUBLANES = 8
_TILE_N_CAP = 1024   # node rows per grid step; keeps double-buffered VMEM < 16 MiB (v5e)


def _round_up(v, m):
    return (v + m - 1) // m * m


def _proj_kernel(x_ref, w_ref, b_ref, o_ref):
    """One (batch, node-tile) grid step.

    x_ref: (seq_len, tile_n, input_dim)  f32  — native input layout
    w_ref: (seq_len, input_dim, N)       f32  — resident in VMEM
    b_ref: (1, N)                        f32  — resident in VMEM
    o_ref: (tile_n, N)                   f32  — unpadded output tile
    """
    seq_len = x_ref.shape[0]
    acc = jnp.zeros(o_ref.shape, jnp.float32)
    # Static unroll over the (small) time axis: each term is a tiny MXU matmul
    # (tile_n, input_dim) @ (input_dim, N), accumulated in f32.  This performs
    # the (time, feature) flattening of the reference model without any
    # HBM-side transpose of X.
    for t in range(seq_len):
        acc = acc + jnp.dot(x_ref[t], w_ref[t],
                            preferred_element_type=jnp.float32)
    o_ref[...] = (acc + b_ref[...]).astype(o_ref.dtype)


@partial(jax.jit,
         static_argnames=("node_num", "input_dim", "output_dim", "seq_len", "horizon"))
def base_model_forward(x, w, b, *, node_num, input_dim, output_dim, seq_len, horizon):
    """x: (B, seq_len, node_num, input_dim) -> (B, horizon, node_num, output_dim)."""
    B = x.shape[0]
    assert x.shape == (B, seq_len, node_num, input_dim)
    out_dtype = x.dtype

    K = seq_len * input_dim
    N = horizon * output_dim

    # ---- node tiling ------------------------------------------------------
    # Tile the node axis; batch x node-tiles are independent grid steps.
    n_node_tiles = pl.cdiv(node_num, _TILE_N_CAP)
    if B * n_node_tiles < 2 and node_num >= 2 * _SUBLANES:
        # v7x has 2 TensorCores: make sure there are >= 2 parallel tiles.
        n_node_tiles = 2
    if n_node_tiles == 1:
        tile_n = node_num          # block dim == full array dim: always layout-legal
    else:
        tile_n = _round_up(pl.cdiv(node_num, n_node_tiles), _SUBLANES)
        n_node_tiles = pl.cdiv(node_num, tile_n)   # tail tile handled by Pallas masking

    # ---- parameter prep (tiny tensors, stays resident in VMEM) ------------
    x_f = x.astype(jnp.float32)
    w3 = w.astype(jnp.float32).reshape(seq_len, input_dim, N)   # W[t*C+c, :] -> w3[t, c, :]
    b2 = b.astype(jnp.float32).reshape(1, N)

    grid_spec = pl.GridSpec(
        grid=(B, n_node_tiles),
        in_specs=[
            # X streamed in its native layout; batch dim squeezed out of the kernel ref.
            pl.BlockSpec((None, seq_len, tile_n, input_dim),
                         lambda bi, j: (bi, 0, j, 0)),
            pl.BlockSpec((seq_len, input_dim, N), lambda bi, j: (0, 0, 0)),  # W resident
            pl.BlockSpec((1, N), lambda bi, j: (0, 0)),                      # bias resident
        ],
        out_specs=pl.BlockSpec((None, tile_n, N), lambda bi, j: (bi, j, 0)),
    )

    cost = pl.CostEstimate(
        flops=2 * B * node_num * K * N,
        transcendentals=0,
        bytes_accessed=(B * seq_len * node_num * input_dim * 4   # X (f32, read once)
                        + K * N * 4                              # W
                        + N * 4                                  # bias
                        + B * node_num * N * 4),                 # Y (unpadded f32)
    )

    y3 = pl.pallas_call(
        _proj_kernel,
        out_shape=jax.ShapeDtypeStruct((B, node_num, N), jnp.float32),
        grid_spec=grid_spec,
        compiler_params=pltpu.CompilerParams(
            # (batch, node-tile) steps are independent -> shardable across v7x's
            # 2 TensorCores; harmless on single-TC v5e/v6e.
            dimension_semantics=("parallel", "parallel"),
        ),
        cost_estimate=cost,
    )(x_f, w3, b2)

    # Small output-side reshuffle (over the small output tensor only):
    # (B, node, horizon*out) -> (B, horizon, node, out).
    y = y3.reshape(B, node_num, horizon, output_dim).astype(out_dtype)
    return jnp.transpose(y, (0, 2, 1, 3))


if __name__ == "__main__":
    # Hyperparameters consistent with BaseModel.__init__ (small, traffic-style shapes).
    # grid = (batch=2, node_tiles=1) -> 2 parallel row tiles of 200 nodes each.
    node_num, input_dim, output_dim = 200, 4, 2
    seq_len, horizon = 12, 12
    batch = 2

    key = jax.random.PRNGKey(0)
    kx, kw, kb = jax.random.split(key, 3)

    x = jax.random.normal(kx, (batch, seq_len, node_num, input_dim), dtype=jnp.float32)
    # Deterministic synthetic parameters (no checkpoint loading).
    w = jax.random.normal(kw, (seq_len * input_dim, horizon * output_dim),
                          dtype=jnp.float32) * 0.02
    b = jax.random.normal(kb, (horizon * output_dim,), dtype=jnp.float32) * 0.01

    y = base_model_forward(
        x, w, b,
        node_num=node_num, input_dim=input_dim, output_dim=output_dim,
        seq_len=seq_len, horizon=horizon,
    )
    y = jax.block_until_ready(y)

    # Sanity vs plain-JAX f32 reference (kernel path is f32 end-to-end; tolerance
    # only covers MXU f32-emulation rounding).
    x2d = jnp.transpose(x, (0, 2, 1, 3)).reshape(batch * node_num, -1)
    ref = (x2d @ w + b).reshape(batch, node_num, horizon, output_dim)
    ref = jnp.transpose(ref, (0, 2, 1, 3))
    assert y.shape == (batch, horizon, node_num, output_dim)
    assert jnp.allclose(y, ref, atol=1e-2, rtol=1e-2), float(jnp.max(jnp.abs(y - ref)))

    print("KERNEL_OK")
</pallas_src>

<mosaic_0001>
module attributes {stable_mosaic.version = 11 : i64} {
  func.func @_proj_kernel(%arg0: i32, %arg1: i32, %arg2: memref<1x12x200x4xf32, #tpu.memory_space<vmem>>, %arg3: memref<12x4x24xf32, #tpu.memory_space<vmem>>, %arg4: memref<1x24xf32, #tpu.memory_space<vmem>>, %arg5: memref<1x200x24xf32, #tpu.memory_space<vmem>>) attributes {dimension_semantics = [#tpu.dimension_semantics<parallel>, #tpu.dimension_semantics<parallel>], iteration_bounds = array<i64: 2, 1>, scalar_prefetch = 0 : i64, scratch_operands = 0 : i64, tpu.core_type = #tpu.core_type<tc>, window_params = [{transform_indices = @transform_0, window_bounds = array<i64: 1, 12, 200, 4>}, {pipeline_mode = #tpu.pipeline_mode<synchronous>, transform_indices = @transform_1, window_bounds = array<i64: 12, 4, 24>}, {pipeline_mode = #tpu.pipeline_mode<synchronous>, transform_indices = @transform_2, window_bounds = array<i64: 1, 24>}, {transform_indices = @transform_3, window_bounds = array<i64: 1, 200, 24>}]} {
    %cst = arith.constant 0.000000e+00 : f32
    %0 = vector.broadcast %cst : f32 to vector<200x24xf32>
    %c0 = arith.constant 0 : index
    %c0_0 = arith.constant 0 : index
    %c0_1 = arith.constant 0 : index
    %c0_2 = arith.constant 0 : index
    %1 = vector.load %arg2[%c0, %c0_0, %c0_1, %c0_2] : memref<1x12x200x4xf32, #tpu.memory_space<vmem>>, vector<1x1x200x4xf32>
    %2 = vector.shape_cast %1 : vector<1x1x200x4xf32> to vector<200x4xf32>
    %c0_3 = arith.constant 0 : index
    %c0_4 = arith.constant 0 : index
    %c0_5 = arith.constant 0 : index
    %3 = vector.load %arg3[%c0_3, %c0_4, %c0_5] : memref<12x4x24xf32, #tpu.memory_space<vmem>>, vector<1x4x24xf32>
    %4 = vector.shape_cast %3 : vector<1x4x24xf32> to vector<4x24xf32>
    %cst_6 = arith.constant dense<0.000000e+00> : vector<200x24xf32>
    %5 = tpu.matmul %2, %4, %cst_6 {dimension_numbers = #tpu.dot_dimension_numbers<[1], [0], [0], [1], [0, 0, 1, 1], [], []>} : vector<200x4xf32>, vector<4x24xf32>, vector<200x24xf32> -> vector<200x24xf32>
    %6 = arith.addf %0, %5 : vector<200x24xf32>
    %c0_7 = arith.constant 0 : index
    %c1 = arith.constant 1 : index
    %c0_8 = arith.constant 0 : index
    %c0_9 = arith.constant 0 : index
    %7 = vector.load %arg2[%c0_7, %c1, %c0_8, %c0_9] : memref<1x12x200x4xf32, #tpu.memory_space<vmem>>, vector<1x1x200x4xf32>
    %8 = vector.shape_cast %7 : vector<1x1x200x4xf32> to vector<200x4xf32>
    %c1_10 = arith.constant 1 : index
    %c0_11 = arith.constant 0 : index
    %c0_12 = arith.constant 0 : index
    %9 = vector.load %arg3[%c1_10, %c0_11, %c0_12] : memref<12x4x24xf32, #tpu.memory_space<vmem>>, vector<1x4x24xf32>
    %10 = vector.shape_cast %9 : vector<1x4x24xf32> to vector<4x24xf32>
    %cst_13 = arith.constant dense<0.000000e+00> : vector<200x24xf32>
    %11 = tpu.matmul %8, %10, %cst_13 {dimension_numbers = #tpu.dot_dimension_numbers<[1], [0], [0], [1], [0, 0, 1, 1], [], []>} : vector<200x4xf32>, vector<4x24xf32>, vector<200x24xf32> -> vector<200x24xf32>
    %12 = arith.addf %6, %11 : vector<200x24xf32>
    %c0_14 = arith.constant 0 : index
    %c2 = arith.constant 2 : index
    %c0_15 = arith.constant 0 : index
    %c0_16 = arith.constant 0 : index
    %13 = vector.load %arg2[%c0_14, %c2, %c0_15, %c0_16] : memref<1x12x200x4xf32, #tpu.memory_space<vmem>>, vector<1x1x200x4xf32>
    %14 = vector.shape_cast %13 : vector<1x1x200x4xf32> to vector<200x4xf32>
    %c2_17 = arith.constant 2 : index
    %c0_18 = arith.constant 0 : index
    %c0_19 = arith.constant 0 : index
    %15 = vector.load %arg3[%c2_17, %c0_18, %c0_19] : memref<12x4x24xf32, #tpu.memory_space<vmem>>, vector<1x4x24xf32>
    %16 = vector.shape_cast %15 : vector<1x4x24xf32> to vector<4x24xf32>
    %cst_20 = arith.constant dense<0.000000e+00> : vector<200x24xf32>
    %17 = tpu.matmul %14, %16, %cst_20 {dimension_numbers = #tpu.dot_dimension_numbers<[1], [0], [0], [1], [0, 0, 1, 1], [], []>} : vector<200x4xf32>, vector<4x24xf32>, vector<200x24xf32> -> vector<200x24xf32>
    %18 = arith.addf %12, %17 : vector<200x24xf32>
    %c0_21 = arith.constant 0 : index
    %c3 = arith.constant 3 : index
    %c0_22 = arith.constant 0 : index
    %c0_23 = arith.constant 0 : index
    %19 = vector.load %arg2[%c0_21, %c3, %c0_22, %c0_23] : memref<1x12x200x4xf32, #tpu.memory_space<vmem>>, vector<1x1x200x4xf32>
    %20 = vector.shape_cast %19 : vector<1x1x200x4xf32> to vector<200x4xf32>
    %c3_24 = arith.constant 3 : index
    %c0_25 = arith.constant 0 : index
    %c0_26 = arith.constant 0 : index
    %21 = vector.load %arg3[%c3_24, %c0_25, %c0_26] : memref<12x4x24xf32, #tpu.memory_space<vmem>>, vector<1x4x24xf32>
    %22 = vector.shape_cast %21 : vector<1x4x24xf32> to vector<4x24xf32>
    %cst_27 = arith.constant dense<0.000000e+00> : vector<200x24xf32>
    %23 = tpu.matmul %20, %22, %cst_27 {dimension_numbers = #tpu.dot_dimension_numbers<[1], [0], [0], [1], [0, 0, 1, 1], [], []>} : vector<200x4xf32>, vector<4x24xf32>, vector<200x24xf32> -> vector<200x24xf32>
    %24 = arith.addf %18, %23 : vector<200x24xf32>
    %c0_28 = arith.constant 0 : index
    %c4 = arith.constant 4 : index
    %c0_29 = arith.constant 0 : index
    %c0_30 = arith.constant 0 : index
    %25 = vector.load %arg2[%c0_28, %c4, %c0_29, %c0_30] : memref<1x12x200x4xf32, #tpu.memory_space<vmem>>, vector<1x1x200x4xf32>
    %26 = vector.shape_cast %25 : vector<1x1x200x4xf32> to vector<200x4xf32>
    %c4_31 = arith.constant 4 : index
    %c0_32 = arith.constant 0 : index
    %c0_33 = arith.constant 0 : index
    %27 = vector.load %arg3[%c4_31, %c0_32, %c0_33] : memref<12x4x24xf32, #tpu.memory_space<vmem>>, vector<1x4x24xf32>
    %28 = vector.shape_cast %27 : vector<1x4x24xf32> to vector<4x24xf32>
    %cst_34 = arith.constant dense<0.000000e+00> : vector<200x24xf32>
    %29 = tpu.matmul %26, %28, %cst_34 {dimension_numbers = #tpu.dot_dimension_numbers<[1], [0], [0], [1], [0, 0, 1, 1], [], []>} : vector<200x4xf32>, vector<4x24xf32>, vector<200x24xf32> -> vector<200x24xf32>
    %30 = arith.addf %24, %29 : vector<200x24xf32>
    %c0_35 = arith.constant 0 : index
    %c5 = arith.constant 5 : index
    %c0_36 = arith.constant 0 : index
    %c0_37 = arith.constant 0 : index
    %31 = vector.load %arg2[%c0_35, %c5, %c0_36, %c0_37] : memref<1x12x200x4xf32, #tpu.memory_space<vmem>>, vector<1x1x200x4xf32>
    %32 = vector.shape_cast %31 : vector<1x1x200x4xf32> to vector<200x4xf32>
    %c5_38 = arith.constant 5 : index
    %c0_39 = arith.constant 0 : index
    %c0_40 = arith.constant 0 : index
    %33 = vector.load %arg3[%c5_38, %c0_39, %c0_40] : memref<12x4x24xf32, #tpu.memory_space<vmem>>, vector<1x4x24xf32>
    %34 = vector.shape_cast %33 : vector<1x4x24xf32> to vector<4x24xf32>
    %cst_41 = arith.constant dense<0.000000e+00> : vector<200x24xf32>
    %35 = tpu.matmul %32, %34, %cst_41 {dimension_numbers = #tpu.dot_dimension_numbers<[1], [0], [0], [1], [0, 0, 1, 1], [], []>} : vector<200x4xf32>, vector<4x24xf32>, vector<200x24xf32> -> vector<200x24xf32>
    %36 = arith.addf %30, %35 : vector<200x24xf32>
    %c0_42 = arith.constant 0 : index
    %c6 = arith.constant 6 : index
    %c0_43 = arith.constant 0 : index
    %c0_44 = arith.constant 0 : index
    %37 = vector.load %arg2[%c0_42, %c6, %c0_43, %c0_44] : memref<1x12x200x4xf32, #tpu.memory_space<vmem>>, vector<1x1x200x4xf32>
    %38 = vector.shape_cast %37 : vector<1x1x200x4xf32> to vector<200x4xf32>
    %c6_45 = arith.constant 6 : index
    %c0_46 = arith.constant 0 : index
    %c0_47 = arith.constant 0 : index
    %39 = vector.load %arg3[%c6_45, %c0_46, %c0_47] : memref<12x4x24xf32, #tpu.memory_space<vmem>>, vector<1x4x24xf32>
    %40 = vector.shape_cast %39 : vector<1x4x24xf32> to vector<4x24xf32>
    %cst_48 = arith.constant dense<0.000000e+00> : vector<200x24xf32>
    %41 = tpu.matmul %38, %40, %cst_48 {dimension_numbers = #tpu.dot_dimension_numbers<[1], [0], [0], [1], [0, 0, 1, 1], [], []>} : vector<200x4xf32>, vector<4x24xf32>, vector<200x24xf32> -> vector<200x24xf32>
    %42 = arith.addf %36, %41 : vector<200x24xf32>
    %c0_49 = arith.constant 0 : index
    %c7 = arith.constant 7 : index
    %c0_50 = arith.constant 0 : index
    %c0_51 = arith.constant 0 : index
    %43 = vector.load %arg2[%c0_49, %c7, %c0_50, %c0_51] : memref<1x12x200x4xf32, #tpu.memory_space<vmem>>, vector<1x1x200x4xf32>
    %44 = vector.shape_cast %43 : vector<1x1x200x4xf32> to vector<200x4xf32>
    %c7_52 = arith.constant 7 : index
    %c0_53 = arith.constant 0 : index
    %c0_54 = arith.constant 0 : index
    %45 = vector.load %arg3[%c7_52, %c0_53, %c0_54] : memref<12x4x24xf32, #tpu.memory_space<vmem>>, vector<1x4x24xf32>
    %46 = vector.shape_cast %45 : vector<1x4x24xf32> to vector<4x24xf32>
    %cst_55 = arith.constant dense<0.000000e+00> : vector<200x24xf32>
    %47 = tpu.matmul %44, %46, %cst_55 {dimension_numbers = #tpu.dot_dimension_numbers<[1], [0], [0], [1], [0, 0, 1, 1], [], []>} : vector<200x4xf32>, vector<4x24xf32>, vector<200x24xf32> -> vector<200x24xf32>
    %48 = arith.addf %42, %47 : vector<200x24xf32>
    %c0_56 = arith.constant 0 : index
    %c8 = arith.constant 8 : index
    %c0_57 = arith.constant 0 : index
    %c0_58 = arith.constant 0 : index
    %49 = vector.load %arg2[%c0_56, %c8, %c0_57, %c0_58] : memref<1x12x200x4xf32, #tpu.memory_space<vmem>>, vector<1x1x200x4xf32>
    %50 = vector.shape_cast %49 : vector<1x1x200x4xf32> to vector<200x4xf32>
    %c8_59 = arith.constant 8 : index
    %c0_60 = arith.constant 0 : index
    %c0_61 = arith.constant 0 : index
    %51 = vector.load %arg3[%c8_59, %c0_60, %c0_61] : memref<12x4x24xf32, #tpu.memory_space<vmem>>, vector<1x4x24xf32>
    %52 = vector.shape_cast %51 : vector<1x4x24xf32> to vector<4x24xf32>
    %cst_62 = arith.constant dense<0.000000e+00> : vector<200x24xf32>
    %53 = tpu.matmul %50, %52, %cst_62 {dimension_numbers = #tpu.dot_dimension_numbers<[1], [0], [0], [1], [0, 0, 1, 1], [], []>} : vector<200x4xf32>, vector<4x24xf32>, vector<200x24xf32> -> vector<200x24xf32>
    %54 = arith.addf %48, %53 : vector<200x24xf32>
    %c0_63 = arith.constant 0 : index
    %c9 = arith.constant 9 : index
    %c0_64 = arith.constant 0 : index
    %c0_65 = arith.constant 0 : index
    %55 = vector.load %arg2[%c0_63, %c9, %c0_64, %c0_65] : memref<1x12x200x4xf32, #tpu.memory_space<vmem>>, vector<1x1x200x4xf32>
    %56 = vector.shape_cast %55 : vector<1x1x200x4xf32> to vector<200x4xf32>
    %c9_66 = arith.constant 9 : index
    %c0_67 = arith.constant 0 : index
    %c0_68 = arith.constant 0 : index
    %57 = vector.load %arg3[%c9_66, %c0_67, %c0_68] : memref<12x4x24xf32, #tpu.memory_space<vmem>>, vector<1x4x24xf32>
    %58 = vector.shape_cast %57 : vector<1x4x24xf32> to vector<4x24xf32>
    %cst_69 = arith.constant dense<0.000000e+00> : vector<200x24xf32>
    %59 = tpu.matmul %56, %58, %cst_69 {dimension_numbers = #tpu.dot_dimension_numbers<[1], [0], [0], [1], [0, 0, 1, 1], [], []>} : vector<200x4xf32>, vector<4x24xf32>, vector<200x24xf32> -> vector<200x24xf32>
    %60 = arith.addf %54, %59 : vector<200x24xf32>
    %c0_70 = arith.constant 0 : index
    %c10 = arith.constant 10 : index
    %c0_71 = arith.constant 0 : index
    %c0_72 = arith.constant 0 : index
    %61 = vector.load %arg2[%c0_70, %c10, %c0_71, %c0_72] : memref<1x12x200x4xf32, #tpu.memory_space<vmem>>, vector<1x1x200x4xf32>
    %62 = vector.shape_cast %61 : vector<1x1x200x4xf32> to vector<200x4xf32>
    %c10_73 = arith.constant 10 : index
    %c0_74 = arith.constant 0 : index
    %c0_75 = arith.constant 0 : index
    %63 = vector.load %arg3[%c10_73, %c0_74, %c0_75] : memref<12x4x24xf32, #tpu.memory_space<vmem>>, vector<1x4x24xf32>
    %64 = vector.shape_cast %63 : vector<1x4x24xf32> to vector<4x24xf32>
    %cst_76 = arith.constant dense<0.000000e+00> : vector<200x24xf32>
    %65 = tpu.matmul %62, %64, %cst_76 {dimension_numbers = #tpu.dot_dimension_numbers<[1], [0], [0], [1], [0, 0, 1, 1], [], []>} : vector<200x4xf32>, vector<4x24xf32>, vector<200x24xf32> -> vector<200x24xf32>
    %66 = arith.addf %60, %65 : vector<200x24xf32>
    %c0_77 = arith.constant 0 : index
    %c11 = arith.constant 11 : index
    %c0_78 = arith.constant 0 : index
    %c0_79 = arith.constant 0 : index
    %67 = vector.load %arg2[%c0_77, %c11, %c0_78, %c0_79] : memref<1x12x200x4xf32, #tpu.memory_space<vmem>>, vector<1x1x200x4xf32>
    %68 = vector.shape_cast %67 : vector<1x1x200x4xf32> to vector<200x4xf32>
    %c11_80 = arith.constant 11 : index
    %c0_81 = arith.constant 0 : index
    %c0_82 = arith.constant 0 : index
    %69 = vector.load %arg3[%c11_80, %c0_81, %c0_82] : memref<12x4x24xf32, #tpu.memory_space<vmem>>, vector<1x4x24xf32>
    %70 = vector.shape_cast %69 : vector<1x4x24xf32> to vector<4x24xf32>
    %cst_83 = arith.constant dense<0.000000e+00> : vector<200x24xf32>
    %71 = tpu.matmul %68, %70, %cst_83 {dimension_numbers = #tpu.dot_dimension_numbers<[1], [0], [0], [1], [0, 0, 1, 1], [], []>} : vector<200x4xf32>, vector<4x24xf32>, vector<200x24xf32> -> vector<200x24xf32>
    %72 = arith.addf %66, %71 : vector<200x24xf32>
    %c0_84 = arith.constant 0 : index
    %c0_85 = arith.constant 0 : index
    %73 = vector.load %arg4[%c0_84, %c0_85] : memref<1x24xf32, #tpu.memory_space<vmem>>, vector<1x24xf32>
    %74 = vector.broadcast %73 : vector<1x24xf32> to vector<200x24xf32>
    %75 = arith.addf %72, %74 : vector<200x24xf32>
    %c0_86 = arith.constant 0 : index
    %c0_87 = arith.constant 0 : index
    %c0_88 = arith.constant 0 : index
    %76 = vector.load %arg5[%c0_86, %c0_87, %c0_88] : memref<1x200x24xf32, #tpu.memory_space<vmem>>, vector<1x200x24xf32>
    %77 = vector.shape_cast %76 : vector<1x200x24xf32> to vector<200x24xf32>
    %78 = vector.shape_cast %75 : vector<200x24xf32> to vector<1x200x24xf32>
    tpu.vector_store %arg5[%c0_86, %c0_87, %c0_88], %78 {strides = array<i32>} : memref<1x200x24xf32, #tpu.memory_space<vmem>>, vector<1x200x24xf32>,
    return
  }
  func.func @transform_0(%arg0: i32, %arg1: i32) -> (i32, i32, i32, i32) {
    %c0_i32 = arith.constant 0 : i32
    %c0_i32_0 = arith.constant 0 : i32
    %c0_i32_1 = arith.constant 0 : i32
    return %arg0, %c0_i32, %arg1, %c0_i32_0 : i32, i32, i32, i32
  }
  func.func @transform_1(%arg0: i32, %arg1: i32) -> (i32, i32, i32) {
    %c0_i32 = arith.constant 0 : i32
    %c0_i32_0 = arith.constant 0 : i32
    %c0_i32_1 = arith.constant 0 : i32
    %c0_i32_2 = arith.constant 0 : i32
    return %c0_i32, %c0_i32_0, %c0_i32_1 : i32, i32, i32
  }
  func.func @transform_2(%arg0: i32, %arg1: i32) -> (i32, i32) {
    %c0_i32 = arith.constant 0 : i32
    %c0_i32_0 = arith.constant 0 : i32
    %c0_i32_1 = arith.constant 0 : i32
    return %c0_i32, %c0_i32_0 : i32, i32
  }
  func.func @transform_3(%arg0: i32, %arg1: i32) -> (i32, i32, i32) {
    %c0_i32 = arith.constant 0 : i32
    %c0_i32_0 = arith.constant 0 : i32
    return %arg0, %arg1, %c0_i32 : i32, i32, i32
  }
}

</mosaic_0001>

<bundles_post_ra>
// kernel: base_model_forward.1
= control target key start
LH: loop header
LB: loop body
LE: loop exit
PB: predicated region body
PF: predicated region fallthrough
CT: control target
= control target key end

     0   :  { %s6075_s12 = smov 0   ;;  %s6077_s13 = smov 0   ;;  %s7831_s0 = inlined_call_operand.vmem [shape: f32[2,12,200,4], index: 0, kind: input, shape index: {}]   ;;  %s7832_s1 = inlined_call_operand.vmem [shape: f32[12,4,24], index: 1, kind: input, shape index: {}]   ;;  %s7833_s2 = inlined_call_operand.vmem [shape: f32[1,24], index: 2, kind: input, shape index: {}]   ;;  %s7834_s3 = inlined_call_operand.vmem [shape: f32[2,200,24], index: 3, kind: output, shape index: {}]  }
   0x1   :  { %s6079_s14 = smov 0  }
   0x2 LB: > { %s25_s15 = sadd.s32 1, %s6047_s13  ;;  %p4161_p0 = scmp.ge.s32.totalorder %s6051_s14, 1  ;;  %s6051_s14 = sphi %s6079_s14, %s13_s14   ;;  %s6047_s13 = sphi %s6077_s13, %s7836_s13   ;;  %s6043_s12 = sphi %s6075_s12, %s7835_s12  }
   0x3   : > { %p27_p1 = scmp.ge.s32.totalorder %s25_s15, 2  ;;  %p158_p2 = scmp.lt.s32.totalorder %s6051_s14, 3 }
   0x5   : > { %s7838_s15 = smov (%p27_p1, %s25_s15), 0  ;;  %p159_p3 = pnand %p4161_p0, %p158_p2 }
   0x6   : > { %v4189_v0 = vld [vmem:[%s7832_s1 + $0x4] sm:$0xf] (!%p159_p3)  ;;  %vm340_vm0 = vcmask (!%p159_p3), 1043456   ;;  %p191_p4 = scmp.lt.s32.totalorder (!%p159_p3), %s6043_s12, 1  ;;  %v6053_v1 = vmov (!%p159_p3), 0.0   ;;  %vm6054_vm1 = vmmov (!%p159_p3), 0  }
   0x7   : > { %162 = sbr.rel (%p159_p3) target bundleno = 834 (0x342), region = 32  ;;  %5077 = vmatprep.subr.mxu0 (!%p159_p3), %v6053_v1  ;;  %5154 = vmatprep.subr.mxu1 (!%p159_p3), %v6053_v1  ;;  %v235_v2 = vld [vmem:[%s7832_s1] sm:$0xf] (!%p159_p3)  ;;  %vm264_vm2 = vcmask (!%p159_p3), 31744   ;;  %v4267_v3 = vld [vmem:[%s7832_s1 + $0x8] sm:$0xf] (!%p159_p3) }
   0x8   : > { %5078 = vmatpush3.msk.msra.mxu0 (!%p159_p3), %vm340_vm0, %v4189_v0  ;;  %5079 = vmatprep.mubr.msk.f32.mxu0 (!%p159_p3), %vm6054_vm1, %v6053_v1  ;;  %v4319_v4 = vld [vmem:[%s7832_s1 + $0xc] sm:$0xf] (!%p159_p3)  ;;  %v4371_v57 = vld [vmem:[%s7832_s1 + $0x10] sm:$0xf] (!%p159_p3)  ;;  %v4423_v58 = vld [vmem:[%s7832_s1 + $0x14] sm:$0xf] (!%p159_p3) }
   0x9   : > { %5155 = vmatpush3.msk.msra.mxu1 (!%p159_p3), %vm340_vm0, %v235_v2  ;;  %5156 = vmatprep.mubr.msk.f32.mxu1 (!%p159_p3), %vm6054_vm1, %v6053_v1  ;;  %vm4044_vm3 = vcmask (!%p159_p3), 195584  }
   0xa   : > { %5231 = vmatprep.subr.mxu0 (!%p159_p3), %v6053_v1  ;;  %5308 = vmatprep.subr.mxu1 (!%p159_p3), %v6053_v1 }
   0xe   : > { %s7840_s12 = smov (!%p191_p4, %s6043_s12), 1 }
   0xf   : > { %s6001_s20 = smul.u32 2400, %s7840_s12 }
  0x10   : > { %s6002_s21 = smul.u32 200, %s7840_s12 }
  0x11   : > { %s6115_s23 = scalar_lea.vmem %s7831_s0, %s6001_s20 }
  0x12   : > { %v4164_v5 = vld [vmem:[%s6115_s23 + $0xc8] sm:$0xff]  ;;  %v210_v6 = vld [vmem:[%s6115_s23] sm:$0xff]  ;;  %v4165_v7 = vld [vmem:[%s6115_s23 + $0xd0] sm:$0xff]  ;;  %s7721_s26 = scalar_lea.vmem %s7834_s3, %s6002_s21 }
  0x13   : > { %5080 = vmatmul.mubr.msk.f32.vlgmr.msra.gmra.mrb[0].mxu0 %vm264_vm2, %v4164_v5  ;;  %5157 = vmatmul.mubr.msk.f32.vlgmr.msra.gmra.mrb[0].mxu1 %vm264_vm2, %v210_v6  ;;  %v211_v8 = vld [vmem:[%s6115_s23 + $0x8] sm:$0xff]  ;;  %v4166_v9 = vld [vmem:[%s6115_s23 + $0xd8] sm:$0xff]  ;;  %v212_v10 = vld [vmem:[%s6115_s23 + $0x10] sm:$0xff] }
  0x14   : > { %5232 = vmatpush3.msk.msra.mxu0 %vm340_vm0, %v4267_v3  ;;  %5309 = vmatpush3.msk.msra.mxu1 %vm340_vm0, %v4319_v4  ;;  %v4167_v11 = vld [vmem:[%s6115_s23 + $0xe0] sm:$0xff]  ;;  %v213_v12 = vld [vmem:[%s6115_s23 + $0x18] sm:$0xff]  ;;  %v4168_v13 = vld [vmem:[%s6115_s23 + $0xe8] sm:$0xff] }
  0x15   : > { %5082 = vmatprep.mubr.msk.f32.mxu0 %vm6054_vm1, %v6053_v1  ;;  %5159 = vmatprep.mubr.msk.f32.mxu1 %vm6054_vm1, %v6053_v1  ;;  %v214_v14 = vld [vmem:[%s6115_s23 + $0x20] sm:$0xff]  ;;  %v4169_v15 = vld [vmem:[%s6115_s23 + $0xf0] sm:$0xff]  ;;  %v215_v16 = vld [vmem:[%s6115_s23 + $0x28] sm:$0xff] }
  0x16   : > { %5385 = vmatprep.subr.mxu0 %v6053_v1  ;;  %5462 = vmatprep.subr.mxu1 %v6053_v1  ;;  %v4170_v17 = vld [vmem:[%s6115_s23 + $0xf8] sm:$0xff]  ;;  %v216_v18 = vld [vmem:[%s6115_s23 + $0x30] sm:$0xff]  ;;  %v4171_v19 = vld [vmem:[%s6115_s23 + $0x100] sm:$0xff] }
  0x17   : > { %5083 = vmatmul.mubr.msk.f32.gmra.mrb[2].mxu0 %vm264_vm2, %v4165_v7  ;;  %5160 = vmatmul.mubr.msk.f32.gmra.mrb[2].mxu1 %vm264_vm2, %v211_v8  ;;  %v217_v20 = vld [vmem:[%s6115_s23 + $0x38] sm:$0xff]  ;;  %v4172_v21 = vld [vmem:[%s6115_s23 + $0x108] sm:$0xff]  ;;  %v218_v22 = vld [vmem:[%s6115_s23 + $0x40] sm:$0xff] }
  0x18   : > { %5085 = vmatprep.mubr.msk.f32.mxu0 %vm6054_vm1, %v6053_v1  ;;  %5162 = vmatprep.mubr.msk.f32.mxu1 %vm6054_vm1, %v6053_v1  ;;  %v4173_v23 = vld [vmem:[%s6115_s23 + $0x110] sm:$0xff]  ;;  %v219_v24 = vld [vmem:[%s6115_s23 + $0x48] sm:$0xff]  ;;  %v4174_v25 = vld [vmem:[%s6115_s23 + $0x118] sm:$0xff] }
  0x19   : > { %v220_v26 = vld [vmem:[%s6115_s23 + $0x50] sm:$0xff]  ;;  %v4175_v27 = vld [vmem:[%s6115_s23 + $0x120] sm:$0xff]  ;;  %v221_v28 = vld [vmem:[%s6115_s23 + $0x58] sm:$0xff] }
  0x1a   : > { %v4176_v29 = vld [vmem:[%s6115_s23 + $0x128] sm:$0xff]  ;;  %v222_v30 = vld [vmem:[%s6115_s23 + $0x60] sm:$0xff]  ;;  %v4177_v31 = vld [vmem:[%s6115_s23 + $0x130] sm:$0xff] }
  0x1b   : > { %5086 = vmatmul.mubr.msk.f32.gmra.mrb[4].mxu0 %vm264_vm2, %v4166_v9  ;;  %5163 = vmatmul.mubr.msk.f32.gmra.mrb[4].mxu1 %vm264_vm2, %v212_v10  ;;  %v223_v32 = vld [vmem:[%s6115_s23 + $0x68] sm:$0xff]  ;;  %v4178_v33 = vld [vmem:[%s6115_s23 + $0x138] sm:$0xff]  ;;  %v224_v34 = vld [vmem:[%s6115_s23 + $0x70] sm:$0xff] }
  0x1c   : > { %5088 = vmatprep.mubr.msk.f32.mxu0 %vm6054_vm1, %v6053_v1  ;;  %5165 = vmatprep.mubr.msk.f32.mxu1 %vm6054_vm1, %v6053_v1  ;;  %v4179_v35 = vld [vmem:[%s6115_s23 + $0x140] sm:$0xff]  ;;  %v225_v36 = vld [vmem:[%s6115_s23 + $0x78] sm:$0xff]  ;;  %v4180_v37 = vld [vmem:[%s6115_s23 + $0x148] sm:$0xff] }
  0x1d   : > { %v226_v38 = vld [vmem:[%s6115_s23 + $0x80] sm:$0xff]  ;;  %v4181_v39 = vld [vmem:[%s6115_s23 + $0x150] sm:$0xff]  ;;  %v227_v40 = vld [vmem:[%s6115_s23 + $0x88] sm:$0xff] }
  0x1e   : > { %v4182_v41 = vld [vmem:[%s6115_s23 + $0x158] sm:$0xff]  ;;  %v228_v42 = vld [vmem:[%s6115_s23 + $0x90] sm:$0xff]  ;;  %v4183_v43 = vld [vmem:[%s6115_s23 + $0x160] sm:$0xff] }
  0x1f   : > { %5089 = vmatmul.mubr.msk.f32.gmra.mrb[6].mxu0 %vm264_vm2, %v4167_v11  ;;  %5166 = vmatmul.mubr.msk.f32.gmra.mrb[6].mxu1 %vm264_vm2, %v213_v12  ;;  %v229_v44 = vld [vmem:[%s6115_s23 + $0x98] sm:$0xff]  ;;  %v4184_v45 = vld [vmem:[%s6115_s23 + $0x168] sm:$0xff]  ;;  %v230_v46 = vld [vmem:[%s6115_s23 + $0xa0] sm:$0xff] }
  0x20   : > { %5091 = vmatprep.mubr.msk.f32.mxu0 %vm6054_vm1, %v6053_v1  ;;  %5168 = vmatprep.mubr.msk.f32.mxu1 %vm6054_vm1, %v6053_v1  ;;  %v4185_v47 = vld [vmem:[%s6115_s23 + $0x170] sm:$0xff]  ;;  %v231_v48 = vld [vmem:[%s6115_s23 + $0xa8] sm:$0xff]  ;;  %v4186_v49 = vld [vmem:[%s6115_s23 + $0x178] sm:$0xff] }
  0x21   : > { %v232_v50 = vld [vmem:[%s6115_s23 + $0xb0] sm:$0xff]  ;;  %v4187_v51 = vld [vmem:[%s6115_s23 + $0x180] sm:$0xff]  ;;  %v233_v52 = vld [vmem:[%s6115_s23 + $0xb8] sm:$0xff] }
  0x22   : > { %v4188_v53 = vld [vmem:[%s6115_s23 + $0x188] sm:$0xff]  ;;  %v234_v54 = vld [vmem:[%s6115_s23 + $0xc0] sm:$0xff]  ;;  %v4242_v55 = vld [vmem:[%s6115_s23 + $0x190] sm:$0xff] }
  0x23   : > { %5092 = vmatmul.mubr.msk.f32.gmra.mrb[8].mxu0 %vm264_vm2, %v4168_v13  ;;  %5169 = vmatmul.mubr.msk.f32.gmra.mrb[8].mxu1 %vm264_vm2, %v214_v14  ;;  %v4294_v56 = vld [vmem:[%s6115_s23 + $0x258] sm:$0xff]  ;;  %v4295_v60 = vld [vmem:[%s6115_s23 + $0x260] sm:$0xff]  ;;  %v4296_v62 = vld [vmem:[%s6115_s23 + $0x268] sm:$0xff] }
  0x24   : > { %5094 = vmatprep.mubr.msk.f32.mxu0 %vm6054_vm1, %v6053_v1  ;;  %5171 = vmatprep.mubr.msk.f32.mxu1 %vm6054_vm1, %v6053_v1  ;;  %v4243_v59 = vld [vmem:[%s6115_s23 + $0x198] sm:$0xff]  ;;  %v4244_v61 = vld [vmem:[%s6115_s23 + $0x1a0] sm:$0xff]  ;;  %v4245_v63 = vld [vmem:[%s6115_s23 + $0x1a8] sm:$0xff] }
  0x25   : > { %v4297_v0 = vld [vmem:[%s6115_s23 + $0x270] sm:$0xff]  ;;  %v4298_v3 = vld [vmem:[%s6115_s23 + $0x278] sm:$0xff]  ;;  %v4299_v5 = vld [vmem:[%s6115_s23 + $0x280] sm:$0xff] }
  0x26   : > { %v4246_v2 = vld [vmem:[%s6115_s23 + $0x1b0] sm:$0xff]  ;;  %v4247_v4 = vld [vmem:[%s6115_s23 + $0x1b8] sm:$0xff]  ;;  %v4248_v6 = vld [vmem:[%s6115_s23 + $0x1c0] sm:$0xff] }
  0x27   : > { %5095 = vmatmul.mubr.msk.f32.gmra.mrb[10].mxu0 %vm264_vm2, %v4169_v15  ;;  %5172 = vmatmul.mubr.msk.f32.gmra.mrb[10].mxu1 %vm264_vm2, %v215_v16  ;;  %v4300_v7 = vld [vmem:[%s6115_s23 + $0x288] sm:$0xff]  ;;  %v4301_v9 = vld [vmem:[%s6115_s23 + $0x290] sm:$0xff]  ;;  %v4302_v11 = vld [vmem:[%s6115_s23 + $0x298] sm:$0xff] }
  0x28   : > { %5097 = vmatprep.mubr.msk.f32.mxu0 %vm6054_vm1, %v6053_v1  ;;  %5174 = vmatprep.mubr.msk.f32.mxu1 %vm6054_vm1, %v6053_v1  ;;  %v4249_v8 = vld [vmem:[%s6115_s23 + $0x1c8] sm:$0xff]  ;;  %v4250_v10 = vld [vmem:[%s6115_s23 + $0x1d0] sm:$0xff]  ;;  %v4251_v12 = vld [vmem:[%s6115_s23 + $0x1d8] sm:$0xff] }
  0x29   : > { %v4303_v13 = vld [vmem:[%s6115_s23 + $0x2a0] sm:$0xff]  ;;  %v4304_v15 = vld [vmem:[%s6115_s23 + $0x2a8] sm:$0xff] }
  0x2a   : > { %v4252_v14 = vld [vmem:[%s6115_s23 + $0x1e0] sm:$0xff]  ;;  %v4253_v16 = vld [vmem:[%s6115_s23 + $0x1e8] sm:$0xff] }
  0x2b   : > { %5098 = vmatmul.mubr.msk.f32.gmra.mrb[12].mxu0 %vm264_vm2, %v4170_v17  ;;  %5175 = vmatmul.mubr.msk.f32.gmra.mrb[12].mxu1 %vm264_vm2, %v216_v18  ;;  %v4305_v17 = vld [vmem:[%s6115_s23 + $0x2b0] sm:$0xff] }
  0x2c   : > { %5100 = vmatprep.mubr.msk.f32.mxu0 %vm6054_vm1, %v6053_v1  ;;  %5177 = vmatprep.mubr.msk.f32.mxu1 %vm6054_vm1, %v6053_v1  ;;  %v4254_v18 = vld [vmem:[%s6115_s23 + $0x1f0] sm:$0xff] }
  0x2f   : > { %5101 = vmatmul.mubr.msk.f32.gmra.mrb[14].mxu0 %vm264_vm2, %v4171_v19  ;;  %5178 = vmatmul.mubr.msk.f32.gmra.mrb[14].mxu1 %vm264_vm2, %v217_v20  ;;  %v4306_v19 = vld [vmem:[%s6115_s23 + $0x2b8] sm:$0xff] }
  0x30   : > { %5103 = vmatprep.mubr.msk.f32.mxu0 %vm6054_vm1, %v6053_v1  ;;  %5180 = vmatprep.mubr.msk.f32.mxu1 %vm6054_vm1, %v6053_v1  ;;  %v4255_v20 = vld [vmem:[%s6115_s23 + $0x1f8] sm:$0xff] }
  0x33   : > { %5104 = vmatmul.mubr.msk.f32.gmra.mrb[16].mxu0 %vm264_vm2, %v4172_v21  ;;  %5181 = vmatmul.mubr.msk.f32.gmra.mrb[16].mxu1 %vm264_vm2, %v218_v22  ;;  %v4307_v21 = vld [vmem:[%s6115_s23 + $0x2c0] sm:$0xff] }
  0x34   : > { %5106 = vmatprep.mubr.msk.f32.mxu0 %vm6054_vm1, %v6053_v1  ;;  %5183 = vmatprep.mubr.msk.f32.mxu1 %vm6054_vm1, %v6053_v1  ;;  %v4256_v22 = vld [vmem:[%s6115_s23 + $0x200] sm:$0xff] }
  0x37   : > { %5107 = vmatmul.mubr.msk.f32.gmra.mrb[18].mxu0 %vm264_vm2, %v4173_v23  ;;  %5184 = vmatmul.mubr.msk.f32.gmra.mrb[18].mxu1 %vm264_vm2, %v219_v24  ;;  %v4308_v23 = vld [vmem:[%s6115_s23 + $0x2c8] sm:$0xff] }
  0x38   : > { %5109 = vmatprep.mubr.msk.f32.mxu0 %vm6054_vm1, %v6053_v1  ;;  %5186 = vmatprep.mubr.msk.f32.mxu1 %vm6054_vm1, %v6053_v1  ;;  %v4257_v24 = vld [vmem:[%s6115_s23 + $0x208] sm:$0xff] }
  0x3b   : > { %5110 = vmatmul.mubr.msk.f32.gmra.mrb[20].mxu0 %vm264_vm2, %v4174_v25  ;;  %5187 = vmatmul.mubr.msk.f32.gmra.mrb[20].mxu1 %vm264_vm2, %v220_v26  ;;  %v4309_v25 = vld [vmem:[%s6115_s23 + $0x2d0] sm:$0xff] }
  0x3c   : > { %5112 = vmatprep.mubr.msk.f32.mxu0 %vm6054_vm1, %v6053_v1  ;;  %5189 = vmatprep.mubr.msk.f32.mxu1 %vm6054_vm1, %v6053_v1  ;;  %v4258_v26 = vld [vmem:[%s6115_s23 + $0x210] sm:$0xff] }
  0x3f   : > { %5113 = vmatmul.mubr.msk.f32.gmra.mrb[22].mxu0 %vm264_vm2, %v4175_v27  ;;  %5190 = vmatmul.mubr.msk.f32.gmra.mrb[22].mxu1 %vm264_vm2, %v221_v28  ;;  %v4310_v27 = vld [vmem:[%s6115_s23 + $0x2d8] sm:$0xff] }
  0x40   : > { %5115 = vmatprep.mubr.msk.f32.mxu0 %vm6054_vm1, %v6053_v1  ;;  %5192 = vmatprep.mubr.msk.f32.mxu1 %vm6054_vm1, %v6053_v1  ;;  %v4259_v28 = vld [vmem:[%s6115_s23 + $0x218] sm:$0xff] }
  0x43   : > { %5116 = vmatmul.mubr.msk.f32.gmra.mrb[24].mxu0 %vm264_vm2, %v4176_v29  ;;  %5193 = vmatmul.mubr.msk.f32.gmra.mrb[24].mxu1 %vm264_vm2, %v222_v30  ;;  %v4311_v29 = vld [vmem:[%s6115_s23 + $0x2e0] sm:$0xff] }
  0x44   : > { %5118 = vmatprep.mubr.msk.f32.mxu0 %vm6054_vm1, %v6053_v1  ;;  %5195 = vmatprep.mubr.msk.f32.mxu1 %vm6054_vm1, %v6053_v1  ;;  %v4260_v30 = vld [vmem:[%s6115_s23 + $0x220] sm:$0xff] }
  0x47   : > { %5119 = vmatmul.mubr.msk.f32.gmra.mrb[26].mxu0 %vm264_vm2, %v4177_v31  ;;  %5196 = vmatmul.mubr.msk.f32.gmra.mrb[26].mxu1 %vm264_vm2, %v223_v32  ;;  %v4312_v31 = vld [vmem:[%s6115_s23 + $0x2e8] sm:$0xff] }
  0x48   : > { %5121 = vmatprep.mubr.msk.f32.mxu0 %vm6054_vm1, %v6053_v1  ;;  %5198 = vmatprep.mubr.msk.f32.mxu1 %vm6054_vm1, %v6053_v1  ;;  %v4261_v32 = vld [vmem:[%s6115_s23 + $0x228] sm:$0xff] }
  0x4b   : > { %5122 = vmatmul.mubr.msk.f32.gmra.mrb[28].mxu0 %vm264_vm2, %v4178_v33  ;;  %5199 = vmatmul.mubr.msk.f32.gmra.mrb[28].mxu1 %vm264_vm2, %v224_v34  ;;  %v4313_v33 = vld [vmem:[%s6115_s23 + $0x2f0] sm:$0xff] }
  0x4c   : > { %5124 = vmatprep.mubr.msk.f32.mxu0 %vm6054_vm1, %v6053_v1  ;;  %5201 = vmatprep.mubr.msk.f32.mxu1 %vm6054_vm1, %v6053_v1  ;;  %v4262_v34 = vld [vmem:[%s6115_s23 + $0x230] sm:$0xff] }
  0x4f   : > { %5125 = vmatmul.mubr.msk.f32.gmra.mrb[30].mxu0 %vm264_vm2, %v4179_v35  ;;  %5202 = vmatmul.mubr.msk.f32.gmra.mrb[30].mxu1 %vm264_vm2, %v225_v36  ;;  %v4314_v35 = vld [vmem:[%s6115_s23 + $0x2f8] sm:$0xff] }
  0x50   : > { %5127 = vmatprep.mubr.msk.f32.mxu0 %vm6054_vm1, %v6053_v1  ;;  %5204 = vmatprep.mubr.msk.f32.mxu1 %vm6054_vm1, %v6053_v1  ;;  %v4263_v36 = vld [vmem:[%s6115_s23 + $0x238] sm:$0xff] }
  0x53   : > { %5128 = vmatmul.mubr.msk.f32.gmra.mrb[32].mxu0 %vm264_vm2, %v4180_v37  ;;  %5205 = vmatmul.mubr.msk.f32.gmra.mrb[32].mxu1 %vm264_vm2, %v226_v38  ;;  %v4315_v37 = vld [vmem:[%s6115_s23 + $0x300] sm:$0xff] }
  0x54   : > { %5130 = vmatprep.mubr.msk.f32.mxu0 %vm6054_vm1, %v6053_v1  ;;  %5207 = vmatprep.mubr.msk.f32.mxu1 %vm6054_vm1, %v6053_v1  ;;  %v4264_v38 = vld [vmem:[%s6115_s23 + $0x240] sm:$0xff] }
  0x57   : > { %5131 = vmatmul.mubr.msk.f32.gmra.mrb[34].mxu0 %vm264_vm2, %v4181_v39  ;;  %5208 = vmatmul.mubr.msk.f32.gmra.mrb[34].mxu1 %vm264_vm2, %v227_v40  ;;  %v4316_v39 = vld [vmem:[%s6115_s23 + $0x308] sm:$0xff] }
  0x58   : > { %5133 = vmatprep.mubr.msk.f32.mxu0 %vm6054_vm1, %v6053_v1  ;;  %5210 = vmatprep.mubr.msk.f32.mxu1 %vm6054_vm1, %v6053_v1  ;;  %v4265_v40 = vld [vmem:[%s6115_s23 + $0x248] sm:$0xff] }
  0x5b   : > { %5134 = vmatmul.mubr.msk.f32.gmra.mrb[36].mxu0 %vm264_vm2, %v4182_v41  ;;  %5211 = vmatmul.mubr.msk.f32.gmra.mrb[36].mxu1 %vm264_vm2, %v228_v42  ;;  %v4317_v41 = vld [vmem:[%s6115_s23 + $0x310] sm:$0xff] }
  0x5c   : > { %5136 = vmatprep.mubr.msk.f32.mxu0 %vm6054_vm1, %v6053_v1  ;;  %5213 = vmatprep.mubr.msk.f32.mxu1 %vm6054_vm1, %v6053_v1  ;;  %v4266_v42 = vld [vmem:[%s6115_s23 + $0x250] sm:$0xff] }
  0x5f   : > { %5137 = vmatmul.mubr.msk.f32.gmra.mrb[38].mxu0 %vm264_vm2, %v4183_v43  ;;  %5214 = vmatmul.mubr.msk.f32.gmra.mrb[38].mxu1 %vm264_vm2, %v229_v44  ;;  %v4318_v43 = vld [vmem:[%s6115_s23 + $0x318] sm:$0xff]  ;;  %v4346_v44 = vld [vmem:[%s6115_s23 + $0x320] sm:$0xff] }
  0x60   : > { %5139 = vmatprep.mubr.msk.f32.mxu0 %vm6054_vm1, %v6053_v1  ;;  %5216 = vmatprep.mubr.msk.f32.mxu1 %vm6054_vm1, %v6053_v1 }
  0x63   : > { %5140 = vmatmul.mubr.msk.f32.gmra.mrb[40].mxu0 %vm264_vm2, %v4184_v45  ;;  %5217 = vmatmul.mubr.msk.f32.gmra.mrb[40].mxu1 %vm264_vm2, %v230_v46  ;;  %v4398_v45 = vld [vmem:[%s6115_s23 + $0x3e8] sm:$0xff]  ;;  %v4475_v46 = vld [vmem:[%s7832_s1 + $0x18] sm:$0xf] }
  0x64   : > { %5142 = vmatprep.mubr.msk.f32.mxu0 %vm6054_vm1, %v6053_v1  ;;  %5219 = vmatprep.mubr.msk.f32.mxu1 %vm6054_vm1, %v6053_v1 }
  0x67   : > { %5143 = vmatmul.mubr.msk.f32.gmra.mrb[42].mxu0 %vm264_vm2, %v4185_v47  ;;  %5220 = vmatmul.mubr.msk.f32.gmra.mrb[42].mxu1 %vm264_vm2, %v231_v48  ;;  %v4527_v47 = vld [vmem:[%s7832_s1 + $0x1c] sm:$0xf]  ;;  %v4347_v48 = vld [vmem:[%s6115_s23 + $0x328] sm:$0xff] }
  0x68   : > { %5145 = vmatprep.mubr.msk.f32.mxu0 %vm6054_vm1, %v6053_v1  ;;  %5222 = vmatprep.mubr.msk.f32.mxu1 %vm6054_vm1, %v6053_v1 }
  0x6b   : > { %5146 = vmatmul.mubr.msk.f32.gmra.mrb[44].mxu0 %vm264_vm2, %v4186_v49  ;;  %5223 = vmatmul.mubr.msk.f32.gmra.mrb[44].mxu1 %vm264_vm2, %v232_v50  ;;  %v4399_v49 = vld [vmem:[%s6115_s23 + $0x3f0] sm:$0xff] }
  0x6c   : > { %5148 = vmatprep.mubr.msk.f32.mxu0 %vm6054_vm1, %v6053_v1  ;;  %5225 = vmatprep.mubr.msk.f32.mxu1 %vm6054_vm1, %v6053_v1  ;;  %v4348_v50 = vld [vmem:[%s6115_s23 + $0x330] sm:$0xff] }
  0x6f   : > { %5149 = vmatmul.mubr.msk.f32.gmra.mrb[46].mxu0 %vm264_vm2, %v4187_v51  ;;  %5226 = vmatmul.mubr.msk.f32.gmra.mrb[46].mxu1 %vm264_vm2, %v233_v52  ;;  %v4400_v51 = vld [vmem:[%s6115_s23 + $0x3f8] sm:$0xff] }
  0x70   : > { %5151 = vmatprep.mubr.msk.f32.mxu0 %vm6054_vm1, %v6053_v1  ;;  %5228 = vmatprep.mubr.msk.f32.mxu1 %vm6054_vm1, %v6053_v1  ;;  %v4349_v52 = vld [vmem:[%s6115_s23 + $0x338] sm:$0xff] }
  0x73   : > { %5152 = vmatmul.mubr.msk.f32.gmra.mrb[48].mxu0 %vm264_vm2, %v4188_v53  ;;  %5229 = vmatmul.mubr.msk.f32.gmra.mrb[48].mxu1 %vm264_vm2, %v234_v54  ;;  %v4401_v53 = vld [vmem:[%s6115_s23 + $0x400] sm:$0xff] }
  0x74   : > { %5233 = vmatprep.mubr.msk.f32.mxu0 %vm6054_vm1, %v6053_v1  ;;  %5310 = vmatprep.mubr.msk.f32.mxu1 %vm6054_vm1, %v6053_v1 }
  0x77   : > { %5234 = vmatmul.mubr.msk.f32.vlgmr.msra.gmra.mrb[50].mxu0 %vm264_vm2, %v4242_v55  ;;  %5311 = vmatmul.mubr.msk.f32.vlgmr.msra.gmra.mrb[50].mxu1 %vm264_vm2, %v4294_v56 }
  0x78   : > { %5386 = vmatpush3.msk.msra.mxu0 %vm340_vm0, %v4371_v57  ;;  %5463 = vmatpush3.msk.msra.mxu1 %vm340_vm0, %v4423_v58 }
  0x79   : > { %5236 = vmatprep.mubr.msk.f32.mxu0 %vm6054_vm1, %v6053_v1  ;;  %5313 = vmatprep.mubr.msk.f32.mxu1 %vm6054_vm1, %v6053_v1 }
  0x7a   : > { %5539 = vmatprep.subr.mxu0 %v6053_v1  ;;  %5616 = vmatprep.subr.mxu1 %v6053_v1 }
  0x7b   : > { %5237 = vmatmul.mubr.msk.f32.gmra.mrb[52].mxu0 %vm264_vm2, %v4243_v59  ;;  %5314 = vmatmul.mubr.msk.f32.gmra.mrb[52].mxu1 %vm264_vm2, %v4295_v60  ;;  %v4350_v59 = vld [vmem:[%s6115_s23 + $0x340] sm:$0xff]  ;;  %v4402_v60 = vld [vmem:[%s6115_s23 + $0x408] sm:$0xff] }
  0x7c   : > { %5239 = vmatprep.mubr.msk.f32.mxu0 %vm6054_vm1, %v6053_v1  ;;  %5316 = vmatprep.mubr.msk.f32.mxu1 %vm6054_vm1, %v6053_v1 }
  0x7f   : > { %5240 = vmatmul.mubr.msk.f32.gmra.mrb[54].mxu0 %vm264_vm2, %v4244_v61  ;;  %5317 = vmatmul.mubr.msk.f32.gmra.mrb[54].mxu1 %vm264_vm2, %v4296_v62 }
  0x80   : > { %5242 = vmatprep.mubr.msk.f32.mxu0 %vm6054_vm1, %v6053_v1  ;;  %5319 = vmatprep.mubr.msk.f32.mxu1 %vm6054_vm1, %v6053_v1 }
  0x83   : > { %5243 = vmatmul.mubr.msk.f32.gmra.mrb[56].mxu0 %vm264_vm2, %v4245_v63  ;;  %5320 = vmatmul.mubr.msk.f32.gmra.mrb[56].mxu1 %vm264_vm2, %v4297_v0 }
  0x84   : > { %5245 = vmatprep.mubr.msk.f32.mxu0 %vm6054_vm1, %v6053_v1  ;;  %5322 = vmatprep.mubr.msk.f32.mxu1 %vm6054_vm1, %v6053_v1 }
  0x87   : > { %5246 = vmatmul.mubr.msk.f32.gmra.mrb[58].mxu0 %vm264_vm2, %v4246_v2  ;;  %5323 = vmatmul.mubr.msk.f32.gmra.mrb[58].mxu1 %vm264_vm2, %v4298_v3  ;;  %v4351_v3 = vld [vmem:[%s6115_s23 + $0x348] sm:$0xff] }
  0x88   : > { %5248 = vmatprep.mubr.msk.f32.mxu0 %vm6054_vm1, %v6053_v1  ;;  %5325 = vmatprep.mubr.msk.f32.mxu1 %vm6054_vm1, %v6053_v1 }
  0x8b   : > { %5249 = vmatmul.mubr.msk.f32.gmra.mrb[60].mxu0 %vm264_vm2, %v4247_v4  ;;  %5326 = vmatmul.mubr.msk.f32.gmra.mrb[60].mxu1 %vm264_vm2, %v4299_v5  ;;  %v4403_v4 = vld [vmem:[%s6115_s23 + $0x410] sm:$0xff] }
  0x8c   : > { %5251 = vmatprep.mubr.msk.f32.mxu0 %vm6054_vm1, %v6053_v1  ;;  %5328 = vmatprep.mubr.msk.f32.mxu1 %vm6054_vm1, %v6053_v1 }
  0x8f   : > { %5252 = vmatmul.mubr.msk.f32.gmra.mrb[62].mxu0 %vm264_vm2, %v4248_v6  ;;  %5329 = vmatmul.mubr.msk.f32.gmra.mrb[62].mxu1 %vm264_vm2, %v4300_v7 }
  0x90   : > { %5254 = vmatprep.mubr.msk.f32.mxu0 %vm6054_vm1, %v6053_v1  ;;  %5331 = vmatprep.mubr.msk.f32.mxu1 %vm6054_vm1, %v6053_v1 }
  0x93   : > { %5255 = vmatmul.mubr.msk.f32.gmra.mrb[64].mxu0 %vm264_vm2, %v4249_v8  ;;  %5332 = vmatmul.mubr.msk.f32.gmra.mrb[64].mxu1 %vm264_vm2, %v4301_v9 }
  0x94   : > { %5257 = vmatprep.mubr.msk.f32.mxu0 %vm6054_vm1, %v6053_v1  ;;  %5334 = vmatprep.mubr.msk.f32.mxu1 %vm6054_vm1, %v6053_v1 }
  0x97   : > { %5258 = vmatmul.mubr.msk.f32.gmra.mrb[66].mxu0 %vm264_vm2, %v4250_v10  ;;  %5335 = vmatmul.mubr.msk.f32.gmra.mrb[66].mxu1 %vm264_vm2, %v4302_v11  ;;  %v4352_v10 = vld [vmem:[%s6115_s23 + $0x350] sm:$0xff]  ;;  %v4404_v11 = vld [vmem:[%s6115_s23 + $0x418] sm:$0xff] }
  0x98   : > { %5260 = vmatprep.mubr.msk.f32.mxu0 %vm6054_vm1, %v6053_v1  ;;  %5337 = vmatprep.mubr.msk.f32.mxu1 %vm6054_vm1, %v6053_v1 }
  0x9b   : > { %5261 = vmatmul.mubr.msk.f32.gmra.mrb[68].mxu0 %vm264_vm2, %v4251_v12  ;;  %5338 = vmatmul.mubr.msk.f32.gmra.mrb[68].mxu1 %vm264_vm2, %v4303_v13 }
  0x9c   : > { %5263 = vmatprep.mubr.msk.f32.mxu0 %vm6054_vm1, %v6053_v1  ;;  %5340 = vmatprep.mubr.msk.f32.mxu1 %vm6054_vm1, %v6053_v1 }
  0x9f   : > { %5264 = vmatmul.mubr.msk.f32.gmra.mrb[70].mxu0 %vm264_vm2, %v4252_v14  ;;  %5341 = vmatmul.mubr.msk.f32.gmra.mrb[70].mxu1 %vm264_vm2, %v4304_v15 }
  0xa0   : > { %5266 = vmatprep.mubr.msk.f32.mxu0 %vm6054_vm1, %v6053_v1  ;;  %5343 = vmatprep.mubr.msk.f32.mxu1 %vm6054_vm1, %v6053_v1 }
  0xa3   : > { %5267 = vmatmul.mubr.msk.f32.gmra.mrb[72].mxu0 %vm264_vm2, %v4253_v16  ;;  %5344 = vmatmul.mubr.msk.f32.gmra.mrb[72].mxu1 %vm264_vm2, %v4305_v17  ;;  %v4353_v17 = vld [vmem:[%s6115_s23 + $0x358] sm:$0xff] }
  0xa4   : > { %5269 = vmatprep.mubr.msk.f32.mxu0 %vm6054_vm1, %v6053_v1  ;;  %5346 = vmatprep.mubr.msk.f32.mxu1 %vm6054_vm1, %v6053_v1 }
  0xa7   : > { %5270 = vmatmul.mubr.msk.f32.gmra.mrb[74].mxu0 %vm264_vm2, %v4254_v18  ;;  %5347 = vmatmul.mubr.msk.f32.gmra.mrb[74].mxu1 %vm264_vm2, %v4306_v19  ;;  %v4405_v18 = vld [vmem:[%s6115_s23 + $0x420] sm:$0xff] }
  0xa8   : > { %5272 = vmatprep.mubr.msk.f32.mxu0 %vm6054_vm1, %v6053_v1  ;;  %5349 = vmatprep.mubr.msk.f32.mxu1 %vm6054_vm1, %v6053_v1 }
  0xab   : > { %5273 = vmatmul.mubr.msk.f32.gmra.mrb[76].mxu0 %vm264_vm2, %v4255_v20  ;;  %5350 = vmatmul.mubr.msk.f32.gmra.mrb[76].mxu1 %vm264_vm2, %v4307_v21 }
  0xac   : > { %5275 = vmatprep.mubr.msk.f32.mxu0 %vm6054_vm1, %v6053_v1  ;;  %5352 = vmatprep.mubr.msk.f32.mxu1 %vm6054_vm1, %v6053_v1 }
  0xaf   : > { %5276 = vmatmul.mubr.msk.f32.gmra.mrb[78].mxu0 %vm264_vm2, %v4256_v22  ;;  %5353 = vmatmul.mubr.msk.f32.gmra.mrb[78].mxu1 %vm264_vm2, %v4308_v23 }
  0xb0   : > { %5278 = vmatprep.mubr.msk.f32.mxu0 %vm6054_vm1, %v6053_v1  ;;  %5355 = vmatprep.mubr.msk.f32.mxu1 %vm6054_vm1, %v6053_v1 }
  0xb3   : > { %5279 = vmatmul.mubr.msk.f32.gmra.mrb[80].mxu0 %vm264_vm2, %v4257_v24  ;;  %5356 = vmatmul.mubr.msk.f32.gmra.mrb[80].mxu1 %vm264_vm2, %v4309_v25  ;;  %v4354_v24 = vld [vmem:[%s6115_s23 + $0x360] sm:$0xff]  ;;  %v4406_v25 = vld [vmem:[%s6115_s23 + $0x428] sm:$0xff] }
  0xb4   : > { %5281 = vmatprep.mubr.msk.f32.mxu0 %vm6054_vm1, %v6053_v1  ;;  %5358 = vmatprep.mubr.msk.f32.mxu1 %vm6054_vm1, %v6053_v1 }
  0xb7   : > { %5282 = vmatmul.mubr.msk.f32.gmra.mrb[82].mxu0 %vm264_vm2, %v4258_v26  ;;  %5359 = vmatmul.mubr.msk.f32.gmra.mrb[82].mxu1 %vm264_vm2, %v4310_v27 }
  0xb8   : > { %5284 = vmatprep.mubr.msk.f32.mxu0 %vm6054_vm1, %v6053_v1  ;;  %5361 = vmatprep.mubr.msk.f32.mxu1 %vm6054_vm1, %v6053_v1 }
  0xbb   : > { %5285 = vmatmul.mubr.msk.f32.gmra.mrb[84].mxu0 %vm264_vm2, %v4259_v28  ;;  %5362 = vmatmul.mubr.msk.f32.gmra.mrb[84].mxu1 %vm264_vm2, %v4311_v29 }
  0xbc   : > { %5287 = vmatprep.mubr.msk.f32.mxu0 %vm6054_vm1, %v6053_v1  ;;  %5364 = vmatprep.mubr.msk.f32.mxu1 %vm6054_vm1, %v6053_v1 }
  0xbf   : > { %5288 = vmatmul.mubr.msk.f32.gmra.mrb[86].mxu0 %vm264_vm2, %v4260_v30  ;;  %5365 = vmatmul.mubr.msk.f32.gmra.mrb[86].mxu1 %vm264_vm2, %v4312_v31  ;;  %v4355_v31 = vld [vmem:[%s6115_s23 + $0x368] sm:$0xff] }
  0xc0   : > { %5290 = vmatprep.mubr.msk.f32.mxu0 %vm6054_vm1, %v6053_v1  ;;  %5367 = vmatprep.mubr.msk.f32.mxu1 %vm6054_vm1, %v6053_v1 }
  0xc3   : > { %5291 = vmatmul.mubr.msk.f32.gmra.mrb[88].mxu0 %vm264_vm2, %v4261_v32  ;;  %5368 = vmatmul.mubr.msk.f32.gmra.mrb[88].mxu1 %vm264_vm2, %v4313_v33  ;;  %v4407_v32 = vld [vmem:[%s6115_s23 + $0x430] sm:$0xff] }
  0xc4   : > { %5293 = vmatprep.mubr.msk.f32.mxu0 %vm6054_vm1, %v6053_v1  ;;  %5370 = vmatprep.mubr.msk.f32.mxu1 %vm6054_vm1, %v6053_v1 }
  0xc7   : > { %5294 = vmatmul.mubr.msk.f32.gmra.mrb[90].mxu0 %vm264_vm2, %v4262_v34  ;;  %5371 = vmatmul.mubr.msk.f32.gmra.mrb[90].mxu1 %vm264_vm2, %v4314_v35 }
  0xc8   : > { %5296 = vmatprep.mubr.msk.f32.mxu0 %vm6054_vm1, %v6053_v1  ;;  %5373 = vmatprep.mubr.msk.f32.mxu1 %vm6054_vm1, %v6053_v1 }
  0xcb   : > { %5297 = vmatmul.mubr.msk.f32.gmra.mrb[92].mxu0 %vm264_vm2, %v4263_v36  ;;  %5374 = vmatmul.mubr.msk.f32.gmra.mrb[92].mxu1 %vm264_vm2, %v4315_v37 }
  0xcc   : > { %5299 = vmatprep.mubr.msk.f32.mxu0 %vm6054_vm1, %v6053_v1  ;;  %5376 = vmatprep.mubr.msk.f32.mxu1 %vm6054_vm1, %v6053_v1 }
  0xcf   : > { %5300 = vmatmul.mubr.msk.f32.gmra.mrb[94].mxu0 %vm264_vm2, %v4264_v38  ;;  %5377 = vmatmul.mubr.msk.f32.gmra.mrb[94].mxu1 %vm264_vm2, %v4316_v39  ;;  %v4356_v38 = vld [vmem:[%s6115_s23 + $0x370] sm:$0xff]  ;;  %v4408_v39 = vld [vmem:[%s6115_s23 + $0x438] sm:$0xff] }
  0xd0   : > { %5302 = vmatprep.mubr.msk.f32.mxu0 %vm6054_vm1, %v6053_v1  ;;  %5379 = vmatprep.mubr.msk.f32.mxu1 %vm6054_vm1, %v6053_v1 }
  0xd3   : > { %5303 = vmatmul.mubr.msk.f32.gmra.mrb[96].mxu0 %vm264_vm2, %v4265_v40  ;;  %5380 = vmatmul.mubr.msk.f32.gmra.mrb[96].mxu1 %vm264_vm2, %v4317_v41 }
  0xd4   : > { %5305 = vmatprep.mubr.msk.f32.mxu0 %vm6054_vm1, %v6053_v1  ;;  %5382 = vmatprep.mubr.msk.f32.mxu1 %vm6054_vm1, %v6053_v1 }
  0xd7   : > { %5306 = vmatmul.mubr.msk.f32.gmra.mrb[98].mxu0 %vm264_vm2, %v4266_v42  ;;  %5383 = vmatmul.mubr.msk.f32.gmra.mrb[98].mxu1 %vm264_vm2, %v4318_v43 }
  0xd8   : > { %5387 = vmatprep.mubr.msk.f32.mxu0 %vm6054_vm1, %v6053_v1  ;;  %5464 = vmatprep.mubr.msk.f32.mxu1 %vm6054_vm1, %v6053_v1 }
  0xdb   : > { %5388 = vmatmul.mubr.msk.f32.vlgmr.msra.gmra.mrb[100].mxu0 %vm264_vm2, %v4346_v44  ;;  %5465 = vmatmul.mubr.msk.f32.vlgmr.msra.gmra.mrb[100].mxu1 %vm264_vm2, %v4398_v45  ;;  %v4357_v45 = vld [vmem:[%s6115_s23 + $0x378] sm:$0xff] }
  0xdc   : > { %5540 = vmatpush3.msk.msra.mxu0 %vm340_vm0, %v4475_v46  ;;  %5617 = vmatpush3.msk.msra.mxu1 %vm340_vm0, %v4527_v47  ;;  %v4409_v46 = vld [vmem:[%s6115_s23 + $0x440] sm:$0xff] }
  0xdd   : > { %5390 = vmatprep.mubr.msk.f32.mxu0 %vm6054_vm1, %v6053_v1  ;;  %5467 = vmatprep.mubr.msk.f32.mxu1 %vm6054_vm1, %v6053_v1 }
  0xde   : > { %5693 = vmatprep.subr.mxu0 %v6053_v1  ;;  %5770 = vmatprep.subr.mxu1 %v6053_v1 }
  0xdf   : > { %5391 = vmatmul.mubr.msk.f32.gmra.mrb[102].mxu0 %vm264_vm2, %v4347_v48  ;;  %5468 = vmatmul.mubr.msk.f32.gmra.mrb[102].mxu1 %vm264_vm2, %v4399_v49 }
  0xe0   : > { %5393 = vmatprep.mubr.msk.f32.mxu0 %vm6054_vm1, %v6053_v1  ;;  %5470 = vmatprep.mubr.msk.f32.mxu1 %vm6054_vm1, %v6053_v1 }
  0xe3   : > { %5394 = vmatmul.mubr.msk.f32.gmra.mrb[104].mxu0 %vm264_vm2, %v4348_v50  ;;  %5471 = vmatmul.mubr.msk.f32.gmra.mrb[104].mxu1 %vm264_vm2, %v4400_v51 }
  0xe4   : > { %5396 = vmatprep.mubr.msk.f32.mxu0 %vm6054_vm1, %v6053_v1  ;;  %5473 = vmatprep.mubr.msk.f32.mxu1 %vm6054_vm1, %v6053_v1 }
  0xe6   : > { %v410_v54 = vpop.f32.mrb[0].mxu0  ;;  %v678_v55 = vpop.f32.mrb[0].mxu1 }
  0xe7   : > { %v5081_v56 = vpop.f32.mrb[1].mxu0  ;;  %5397 = vmatmul.mubr.msk.f32.gmra.mrb[106].mxu0 %vm264_vm2, %v4349_v52  ;;  %v5158_v57 = vpop.f32.mrb[1].mxu1  ;;  %5474 = vmatmul.mubr.msk.f32.gmra.mrb[106].mxu1 %vm264_vm2, %v4401_v53  ;;  %v6575_v58 = vadd.f32 %v678_v55, %v410_v54  ;;  %v4358_v52 = vld [vmem:[%s6115_s23 + $0x380] sm:$0xff]  ;;  %v4410_v53 = vld [vmem:[%s6115_s23 + $0x448] sm:$0xff] }
  0xe8   : > { %5399 = vmatprep.mubr.msk.f32.mxu0 %vm6054_vm1, %v6053_v1  ;;  %5476 = vmatprep.mubr.msk.f32.mxu1 %vm6054_vm1, %v6053_v1 }
  0xea   : > { %v415_v61 = vpop.f32.mrb[2].mxu0  ;;  %v683_v62 = vpop.f32.mrb[2].mxu1 }
  0xeb   : > { %v5084_v63 = vpop.f32.mrb[3].mxu0  ;;  %5400 = vmatmul.mubr.msk.f32.gmra.mrb[108].mxu0 %vm264_vm2, %v4350_v59  ;;  %v5161_v0 = vpop.f32.mrb[3].mxu1  ;;  %5477 = vmatmul.mubr.msk.f32.gmra.mrb[108].mxu1 %vm264_vm2, %v4402_v60  ;;  %v6585_v2 = vadd.f32 %v683_v62, %v415_v61  ;;  %v4359_v60 = vld [vmem:[%s6115_s23 + $0x388] sm:$0xff]  ;;  %v4411_v61 = vld [vmem:[%s6115_s23 + $0x450] sm:$0xff] }
  0xec   : > { %5402 = vmatprep.mubr.msk.f32.mxu0 %vm6054_vm1, %v6053_v1  ;;  %5479 = vmatprep.mubr.msk.f32.mxu1 %vm6054_vm1, %v6053_v1 }
  0xee   : > { %v420_v5 = vpop.f32.mrb[4].mxu0  ;;  %v688_v6 = vpop.f32.mrb[4].mxu1 }
  0xef   : > { %v5087_v7 = vpop.f32.mrb[5].mxu0  ;;  %5403 = vmatmul.mubr.msk.f32.gmra.mrb[110].mxu0 %vm264_vm2, %v4351_v3  ;;  %v5164_v8 = vpop.f32.mrb[5].mxu1  ;;  %5480 = vmatmul.mubr.msk.f32.gmra.mrb[110].mxu1 %vm264_vm2, %v4403_v4  ;;  %v6595_v9 = vadd.f32 %v688_v6, %v420_v5  ;;  %v4360_v5 = vld [vmem:[%s6115_s23 + $0x390] sm:$0xff]  ;;  %v4412_v6 = vld [vmem:[%s6115_s23 + $0x458] sm:$0xff] }
  0xf0   : > { %5405 = vmatprep.mubr.msk.f32.mxu0 %vm6054_vm1, %v6053_v1  ;;  %5482 = vmatprep.mubr.msk.f32.mxu1 %vm6054_vm1, %v6053_v1 }
  0xf2   : > { %v425_v12 = vpop.f32.mrb[6].mxu0  ;;  %v693_v13 = vpop.f32.mrb[6].mxu1 }
  0xf3   : > { %v5090_v14 = vpop.f32.mrb[7].mxu0  ;;  %5406 = vmatmul.mubr.msk.f32.gmra.mrb[112].mxu0 %vm264_vm2, %v4352_v10  ;;  %v5167_v15 = vpop.f32.mrb[7].mxu1  ;;  %5483 = vmatmul.mubr.msk.f32.gmra.mrb[112].mxu1 %vm264_vm2, %v4404_v11  ;;  %v6605_v16 = vadd.f32 %v693_v13, %v425_v12  ;;  %v4361_v13 = vld [vmem:[%s6115_s23 + $0x398] sm:$0xff] }
  0xf4   : > { %5408 = vmatprep.mubr.msk.f32.mxu0 %vm6054_vm1, %v6053_v1  ;;  %5485 = vmatprep.mubr.msk.f32.mxu1 %vm6054_vm1, %v6053_v1  ;;  %v4413_v14 = vld [vmem:[%s6115_s23 + $0x460] sm:$0xff] }
  0xf6   : > { %v430_v19 = vpop.f32.mrb[8].mxu0  ;;  %v698_v20 = vpop.f32.mrb[8].mxu1 }
  0xf7   : > { %v5093_v21 = vpop.f32.mrb[9].mxu0  ;;  %5409 = vmatmul.mubr.msk.f32.gmra.mrb[114].mxu0 %vm264_vm2, %v4353_v17  ;;  %v5170_v22 = vpop.f32.mrb[9].mxu1  ;;  %5486 = vmatmul.mubr.msk.f32.gmra.mrb[114].mxu1 %vm264_vm2, %v4405_v18  ;;  %v6615_v23 = vadd.f32 %v698_v20, %v430_v19 }
  0xf8   : > { %5411 = vmatprep.mubr.msk.f32.mxu0 %vm6054_vm1, %v6053_v1  ;;  %5488 = vmatprep.mubr.msk.f32.mxu1 %vm6054_vm1, %v6053_v1  ;;  %v4362_v21 = vld [vmem:[%s6115_s23 + $0x3a0] sm:$0xff]  ;;  %v4414_v22 = vld [vmem:[%s6115_s23 + $0x468] sm:$0xff] }
  0xfa   : > { %v435_v26 = vpop.f32.mrb[10].mxu0  ;;  %v703_v27 = vpop.f32.mrb[10].mxu1 }
  0xfb   : > { %v5096_v28 = vpop.f32.mrb[11].mxu0  ;;  %5412 = vmatmul.mubr.msk.f32.gmra.mrb[116].mxu0 %vm264_vm2, %v4354_v24  ;;  %v5173_v29 = vpop.f32.mrb[11].mxu1  ;;  %5489 = vmatmul.mubr.msk.f32.gmra.mrb[116].mxu1 %vm264_vm2, %v4406_v25  ;;  %v6625_v30 = vadd.f32 %v703_v27, %v435_v26 }
  0xfc   : > { %5414 = vmatprep.mubr.msk.f32.mxu0 %vm6054_vm1, %v6053_v1  ;;  %5491 = vmatprep.mubr.msk.f32.mxu1 %vm6054_vm1, %v6053_v1  ;;  %v4363_v29 = vld [vmem:[%s6115_s23 + $0x3a8] sm:$0xff] }
  0xfe   : > { %v440_v33 = vpop.f32.mrb[12].mxu0  ;;  %v708_v34 = vpop.f32.mrb[12].mxu1 }
  0xff   : > { %v5099_v35 = vpop.f32.mrb[13].mxu0  ;;  %5415 = vmatmul.mubr.msk.f32.gmra.mrb[118].mxu0 %vm264_vm2, %v4355_v31  ;;  %v5176_v36 = vpop.f32.mrb[13].mxu1  ;;  %5492 = vmatmul.mubr.msk.f32.gmra.mrb[118].mxu1 %vm264_vm2, %v4407_v32  ;;  %v6635_v37 = vadd.f32 %v708_v34, %v440_v33  ;;  %v4415_v31 = vld [vmem:[%s6115_s23 + $0x470] sm:$0xff] }
 0x100   : > { %5417 = vmatprep.mubr.msk.f32.mxu0 %vm6054_vm1, %v6053_v1  ;;  %5494 = vmatprep.mubr.msk.f32.mxu1 %vm6054_vm1, %v6053_v1 }
 0x102   : > { %v445_v40 = vpop.f32.mrb[14].mxu0  ;;  %v713_v41 = vpop.f32.mrb[14].mxu1 }
 0x103   : > { %v5102_v42 = vpop.f32.mrb[15].mxu0  ;;  %5418 = vmatmul.mubr.msk.f32.gmra.mrb[120].mxu0 %vm264_vm2, %v4356_v38  ;;  %v5179_v43 = vpop.f32.mrb[15].mxu1  ;;  %5495 = vmatmul.mubr.msk.f32.gmra.mrb[120].mxu1 %vm264_vm2, %v4408_v39  ;;  %v6645_v44 = vadd.f32 %v713_v41, %v445_v40  ;;  %v4364_v38 = vld [vmem:[%s6115_s23 + $0x3b0] sm:$0xff]  ;;  %v4416_v39 = vld [vmem:[%s6115_s23 + $0x478] sm:$0xff] }
 0x104   : > { %5420 = vmatprep.mubr.msk.f32.mxu0 %vm6054_vm1, %v6053_v1  ;;  %5497 = vmatprep.mubr.msk.f32.mxu1 %vm6054_vm1, %v6053_v1 }
 0x106   : > { %v450_v47 = vpop.f32.mrb[16].mxu0  ;;  %v718_v48 = vpop.f32.mrb[16].mxu1 }
 0x107   : > { %v5105_v49 = vpop.f32.mrb[17].mxu0  ;;  %5421 = vmatmul.mubr.msk.f32.gmra.mrb[122].mxu0 %vm264_vm2, %v4357_v45  ;;  %v5182_v50 = vpop.f32.mrb[17].mxu1  ;;  %5498 = vmatmul.mubr.msk.f32.gmra.mrb[122].mxu1 %vm264_vm2, %v4409_v46  ;;  %v6655_v51 = vadd.f32 %v718_v48, %v450_v47  ;;  %v4365_v46 = vld [vmem:[%s6115_s23 + $0x3b8] sm:$0xff]  ;;  %v4417_v47 = vld [vmem:[%s6115_s23 + $0x480] sm:$0xff] }
 0x108   : > { %5423 = vmatprep.mubr.msk.f32.mxu0 %vm6054_vm1, %v6053_v1  ;;  %5500 = vmatprep.mubr.msk.f32.mxu1 %vm6054_vm1, %v6053_v1 }
 0x10a   : > { %v455_v54 = vpop.f32.mrb[18].mxu0  ;;  %v723_v55 = vpop.f32.mrb[18].mxu1 }
 0x10b   : > { %v5108_v56 = vpop.f32.mrb[19].mxu0  ;;  %5424 = vmatmul.mubr.msk.f32.gmra.mrb[124].mxu0 %vm264_vm2, %v4358_v52  ;;  %v5185_v57 = vpop.f32.mrb[19].mxu1  ;;  %5501 = vmatmul.mubr.msk.f32.gmra.mrb[124].mxu1 %vm264_vm2, %v4410_v53  ;;  %v6665_v59 = vadd.f32 %v723_v55, %v455_v54  ;;  %v4366_v54 = vld [vmem:[%s6115_s23 + $0x3c0] sm:$0xff]  ;;  %v4418_v55 = vld [vmem:[%s6115_s23 + $0x488] sm:$0xff] }
 0x10c   : > { %5426 = vmatprep.mubr.msk.f32.mxu0 %vm6054_vm1, %v6053_v1  ;;  %5503 = vmatprep.mubr.msk.f32.mxu1 %vm6054_vm1, %v6053_v1 }
 0x10e   : > { %v460_v62 = vpop.f32.mrb[20].mxu0  ;;  %v728_v63 = vpop.f32.mrb[20].mxu1 }
 0x10f   : > { %v5111_v0 = vpop.f32.mrb[21].mxu0  ;;  %5427 = vmatmul.mubr.msk.f32.gmra.mrb[126].mxu0 %vm264_vm2, %v4359_v60  ;;  %v5188_v3 = vpop.f32.mrb[21].mxu1  ;;  %5504 = vmatmul.mubr.msk.f32.gmra.mrb[126].mxu1 %vm264_vm2, %v4411_v61  ;;  %v6675_v4 = vadd.f32 %v728_v63, %v460_v62  ;;  %v4367_v63 = vld [vmem:[%s6115_s23 + $0x3c8] sm:$0xff] }
 0x110   : > { %5429 = vmatprep.mubr.msk.f32.mxu0 %vm6054_vm1, %v6053_v1  ;;  %5506 = vmatprep.mubr.msk.f32.mxu1 %vm6054_vm1, %v6053_v1  ;;  %v4419_v0 = vld [vmem:[%s6115_s23 + $0x490] sm:$0xff] }
 0x112   : > { %v465_v7 = vpop.f32.mrb[22].mxu0  ;;  %v733_v8 = vpop.f32.mrb[22].mxu1 }
 0x113   : > { %v5114_v10 = vpop.f32.mrb[23].mxu0  ;;  %5430 = vmatmul.mubr.msk.f32.gmra.mrb[128].mxu0 %vm264_vm2, %v4360_v5  ;;  %v5191_v11 = vpop.f32.mrb[23].mxu1  ;;  %5507 = vmatmul.mubr.msk.f32.gmra.mrb[128].mxu1 %vm264_vm2, %v4412_v6  ;;  %v6685_v12 = vadd.f32 %v733_v8, %v465_v7 }
 0x114   : > { %5432 = vmatprep.mubr.msk.f32.mxu0 %vm6054_vm1, %v6053_v1  ;;  %5509 = vmatprep.mubr.msk.f32.mxu1 %vm6054_vm1, %v6053_v1  ;;  %v4368_v10 = vld [vmem:[%s6115_s23 + $0x3d0] sm:$0xff]  ;;  %v4420_v11 = vld [vmem:[%s6115_s23 + $0x498] sm:$0xff] }
 0x116   : > { %v470_v15 = vpop.f32.mrb[24].mxu0  ;;  %v738_v17 = vpop.f32.mrb[24].mxu1 }
 0x117   : > { %v5117_v18 = vpop.f32.mrb[25].mxu0  ;;  %5433 = vmatmul.mubr.msk.f32.gmra.mrb[130].mxu0 %vm264_vm2, %v4361_v13  ;;  %v5194_v19 = vpop.f32.mrb[25].mxu1  ;;  %5510 = vmatmul.mubr.msk.f32.gmra.mrb[130].mxu1 %vm264_vm2, %v4413_v14  ;;  %v6695_v20 = vadd.f32 %v738_v17, %v470_v15 }
 0x118   : > { %5435 = vmatprep.mubr.msk.f32.mxu0 %vm6054_vm1, %v6053_v1  ;;  %5512 = vmatprep.mubr.msk.f32.mxu1 %vm6054_vm1, %v6053_v1  ;;  %v4369_v19 = vld [vmem:[%s6115_s23 + $0x3d8] sm:$0xff] }
 0x11a   : > { %v475_v24 = vpop.f32.mrb[26].mxu0  ;;  %v743_v25 = vpop.f32.mrb[26].mxu1 }
 0x11b   : > { %v5120_v26 = vpop.f32.mrb[27].mxu0  ;;  %5436 = vmatmul.mubr.msk.f32.gmra.mrb[132].mxu0 %vm264_vm2, %v4362_v21  ;;  %v5197_v27 = vpop.f32.mrb[27].mxu1  ;;  %5513 = vmatmul.mubr.msk.f32.gmra.mrb[132].mxu1 %vm264_vm2, %v4414_v22  ;;  %v6705_v28 = vadd.f32 %v743_v25, %v475_v24  ;;  %v4421_v21 = vld [vmem:[%s6115_s23 + $0x4a0] sm:$0xff] }
 0x11c   : > { %5438 = vmatprep.mubr.msk.f32.mxu0 %vm6054_vm1, %v6053_v1  ;;  %5515 = vmatprep.mubr.msk.f32.mxu1 %vm6054_vm1, %v6053_v1 }
 0x11e   : > { %v480_v32 = vpop.f32.mrb[28].mxu0  ;;  %v748_v33 = vpop.f32.mrb[28].mxu1 }
 0x11f   : > { %v5123_v34 = vpop.f32.mrb[29].mxu0  ;;  %5439 = vmatmul.mubr.msk.f32.gmra.mrb[134].mxu0 %vm264_vm2, %v4363_v29  ;;  %v5200_v35 = vpop.f32.mrb[29].mxu1  ;;  %5516 = vmatmul.mubr.msk.f32.gmra.mrb[134].mxu1 %vm264_vm2, %v4415_v31  ;;  %v6715_v36 = vadd.f32 %v748_v33, %v480_v32  ;;  %v4370_v29 = vld [vmem:[%s6115_s23 + $0x3e0] sm:$0xff]  ;;  %v4422_v31 = vld [vmem:[%s6115_s23 + $0x4a8] sm:$0xff] }
 0x120   : > { %5441 = vmatprep.mubr.msk.f32.mxu0 %vm6054_vm1, %v6053_v1  ;;  %5518 = vmatprep.mubr.msk.f32.mxu1 %vm6054_vm1, %v6053_v1 }
 0x122   : > { %v485_v40 = vpop.f32.mrb[30].mxu0  ;;  %v753_v41 = vpop.f32.mrb[30].mxu1 }
 0x123   : > { %v5126_v42 = vpop.f32.mrb[31].mxu0  ;;  %5442 = vmatmul.mubr.msk.f32.gmra.mrb[136].mxu0 %vm264_vm2, %v4364_v38  ;;  %v5203_v43 = vpop.f32.mrb[31].mxu1  ;;  %5519 = vmatmul.mubr.msk.f32.gmra.mrb[136].mxu1 %vm264_vm2, %v4416_v39  ;;  %v6725_v45 = vadd.f32 %v753_v41, %v485_v40  ;;  %v4450_v39 = vld [vmem:[%s6115_s23 + $0x4b0] sm:$0xff]  ;;  %v4502_v40 = vld [vmem:[%s6115_s23 + $0x578] sm:$0xff]  ;;  %v4579_v41 = vld [vmem:[%s7832_s1 + $0x20] sm:$0xf] }
 0x124   : > { %5444 = vmatprep.mubr.msk.f32.mxu0 %vm6054_vm1, %v6053_v1  ;;  %5521 = vmatprep.mubr.msk.f32.mxu1 %vm6054_vm1, %v6053_v1  ;;  %v4631_v42 = vld [vmem:[%s7832_s1 + $0x24] sm:$0xf] }
 0x126   : > { %v490_v48 = vpop.f32.mrb[32].mxu0  ;;  %v758_v49 = vpop.f32.mrb[32].mxu1 }
 0x127   : > { %v5129_v50 = vpop.f32.mrb[33].mxu0  ;;  %5445 = vmatmul.mubr.msk.f32.gmra.mrb[138].mxu0 %vm264_vm2, %v4365_v46  ;;  %v5206_v52 = vpop.f32.mrb[33].mxu1  ;;  %5522 = vmatmul.mubr.msk.f32.gmra.mrb[138].mxu1 %vm264_vm2, %v4417_v47  ;;  %v6735_v53 = vadd.f32 %v758_v49, %v490_v48 }
 0x128   : > { %5447 = vmatprep.mubr.msk.f32.mxu0 %vm6054_vm1, %v6053_v1  ;;  %5524 = vmatprep.mubr.msk.f32.mxu1 %vm6054_vm1, %v6053_v1  ;;  %v4451_v50 = vld [vmem:[%s6115_s23 + $0x4b8] sm:$0xff]  ;;  %v4503_v52 = vld [vmem:[%s6115_s23 + $0x580] sm:$0xff] }
 0x12a   : > { %v495_v56 = vpop.f32.mrb[34].mxu0  ;;  %v763_v57 = vpop.f32.mrb[34].mxu1 }
 0x12b   : > { %v5132_v60 = vpop.f32.mrb[35].mxu0  ;;  %5448 = vmatmul.mubr.msk.f32.gmra.mrb[140].mxu0 %vm264_vm2, %v4366_v54  ;;  %v5209_v61 = vpop.f32.mrb[35].mxu1  ;;  %5525 = vmatmul.mubr.msk.f32.gmra.mrb[140].mxu1 %vm264_vm2, %v4418_v55  ;;  %v6745_v62 = vadd.f32 %v763_v57, %v495_v56 }
 0x12c   : > { %5450 = vmatprep.mubr.msk.f32.mxu0 %vm6054_vm1, %v6053_v1  ;;  %5527 = vmatprep.mubr.msk.f32.mxu1 %vm6054_vm1, %v6053_v1  ;;  %v4452_v61 = vld [vmem:[%s6115_s23 + $0x4c0] sm:$0xff] }
 0x12e   : > { %v500_v3 = vpop.f32.mrb[36].mxu0  ;;  %v768_v5 = vpop.f32.mrb[36].mxu1 }
 0x12f   : > { %v5135_v6 = vpop.f32.mrb[37].mxu0  ;;  %5451 = vmatmul.mubr.msk.f32.gmra.mrb[142].mxu0 %vm264_vm2, %v4367_v63  ;;  %v5212_v7 = vpop.f32.mrb[37].mxu1  ;;  %5528 = vmatmul.mubr.msk.f32.gmra.mrb[142].mxu1 %vm264_vm2, %v4419_v0  ;;  %v6755_v8 = vadd.f32 %v768_v5, %v500_v3  ;;  %v4504_v63 = vld [vmem:[%s6115_s23 + $0x588] sm:$0xff] }
 0x130   : > { %5453 = vmatprep.mubr.msk.f32.mxu0 %vm6054_vm1, %v6053_v1  ;;  %5530 = vmatprep.mubr.msk.f32.mxu1 %vm6054_vm1, %v6053_v1 }
 0x132   : > { %v505_v13 = vpop.f32.mrb[38].mxu0  ;;  %v773_v14 = vpop.f32.mrb[38].mxu1 }
 0x133   : > { %v5138_v15 = vpop.f32.mrb[39].mxu0  ;;  %5454 = vmatmul.mubr.msk.f32.gmra.mrb[144].mxu0 %vm264_vm2, %v4368_v10  ;;  %v5215_v17 = vpop.f32.mrb[39].mxu1  ;;  %5531 = vmatmul.mubr.msk.f32.gmra.mrb[144].mxu1 %vm264_vm2, %v4420_v11  ;;  %v6765_v18 = vadd.f32 %v773_v14, %v505_v13  ;;  %v4453_v10 = vld [vmem:[%s6115_s23 + $0x4c8] sm:$0xff]  ;;  %v4505_v11 = vld [vmem:[%s6115_s23 + $0x590] sm:$0xff] }
 0x134   : > { %5456 = vmatprep.mubr.msk.f32.mxu0 %vm6054_vm1, %v6053_v1  ;;  %5533 = vmatprep.mubr.msk.f32.mxu1 %vm6054_vm1, %v6053_v1 }
 0x136   : > { %v510_v22 = vpop.f32.mrb[40].mxu0  ;;  %v778_v24 = vpop.f32.mrb[40].mxu1 }
 0x137   : > { %v5141_v25 = vpop.f32.mrb[41].mxu0  ;;  %5457 = vmatmul.mubr.msk.f32.gmra.mrb[146].mxu0 %vm264_vm2, %v4369_v19  ;;  %v5218_v26 = vpop.f32.mrb[41].mxu1  ;;  %5534 = vmatmul.mubr.msk.f32.gmra.mrb[146].mxu1 %vm264_vm2, %v4421_v21  ;;  %v6775_v27 = vadd.f32 %v778_v24, %v510_v22  ;;  %v4454_v21 = vld [vmem:[%s6115_s23 + $0x4d0] sm:$0xff]  ;;  %v4506_v22 = vld [vmem:[%s6115_s23 + $0x598] sm:$0xff] }
 0x138   : > { %5459 = vmatprep.mubr.msk.f32.mxu0 %vm6054_vm1, %v6053_v1  ;;  %5536 = vmatprep.mubr.msk.f32.mxu1 %vm6054_vm1, %v6053_v1 }
 0x13a   : > { %v515_v32 = vpop.f32.mrb[42].mxu0  ;;  %v783_v33 = vpop.f32.mrb[42].mxu1 }
 0x13b   : > { %v5144_v34 = vpop.f32.mrb[43].mxu0  ;;  %5460 = vmatmul.mubr.msk.f32.gmra.mrb[148].mxu0 %vm264_vm2, %v4370_v29  ;;  %v5221_v35 = vpop.f32.mrb[43].mxu1  ;;  %5537 = vmatmul.mubr.msk.f32.gmra.mrb[148].mxu1 %vm264_vm2, %v4422_v31  ;;  %v6785_v38 = vadd.f32 %v783_v33, %v515_v32  ;;  %v4455_v32 = vld [vmem:[%s6115_s23 + $0x4d8] sm:$0xff]  ;;  %v4507_v33 = vld [vmem:[%s6115_s23 + $0x5a0] sm:$0xff] }
 0x13c   : > { %5541 = vmatprep.mubr.msk.f32.mxu0 %vm6054_vm1, %v6053_v1  ;;  %5618 = vmatprep.mubr.msk.f32.mxu1 %vm6054_vm1, %v6053_v1 }
 0x13e   : > { %v520_v43 = vpop.f32.mrb[44].mxu0  ;;  %v788_v46 = vpop.f32.mrb[44].mxu1 }
 0x13f   : > { %v6799_v47 = vadd.f32 %v788_v46, %v520_v43  ;;  %v5147_v48 = vpop.f32.mrb[45].mxu0  ;;  %5542 = vmatmul.mubr.msk.f32.vlgmr.msra.gmra.mrb[150].mxu0 %vm264_vm2, %v4450_v39  ;;  %v5224_v49 = vpop.f32.mrb[45].mxu1  ;;  %5619 = vmatmul.mubr.msk.f32.vlgmr.msra.gmra.mrb[150].mxu1 %vm264_vm2, %v4502_v40  ;;  %v4508_v43 = vld [vmem:[%s6115_s23 + $0x5a8] sm:$0xff] }
 0x140   : > { %5694 = vmatpush3.msk.msra.mxu0 %vm340_vm0, %v4579_v41  ;;  %5771 = vmatpush3.msk.msra.mxu1 %vm340_vm0, %v4631_v42  ;;  %v4456_v42 = vld [vmem:[%s6115_s23 + $0x4e0] sm:$0xff] }
 0x141   : > { %5544 = vmatprep.mubr.msk.f32.mxu0 %vm6054_vm1, %v6053_v1  ;;  %5621 = vmatprep.mubr.msk.f32.mxu1 %vm6054_vm1, %v6053_v1 }
 0x142   : > { %v525_v54 = vpop.f32.mrb[46].mxu0  ;;  %v793_v55 = vpop.f32.mrb[46].mxu1  ;;  %5847 = vmatprep.subr.mxu0 %v6053_v1  ;;  %5924 = vmatprep.subr.mxu1 %v6053_v1 }
 0x143   : > { %v6813_v56 = vadd.f32 %v793_v55, %v525_v54  ;;  %v5150_v57 = vpop.f32.mrb[47].mxu0  ;;  %5545 = vmatmul.mubr.msk.f32.gmra.mrb[152].mxu0 %vm264_vm2, %v4451_v50  ;;  %v5227_v60 = vpop.f32.mrb[47].mxu1  ;;  %5622 = vmatmul.mubr.msk.f32.gmra.mrb[152].mxu1 %vm264_vm2, %v4503_v52  ;;  %v4457_v54 = vld [vmem:[%s6115_s23 + $0x4e8] sm:$0xff]  ;;  %v4509_v55 = vld [vmem:[%s6115_s23 + $0x5b0] sm:$0xff] }
 0x144   : > { %5547 = vmatprep.mubr.msk.f32.mxu0 %vm6054_vm1, %v6053_v1  ;;  %5624 = vmatprep.mubr.msk.f32.mxu1 %vm6054_vm1, %v6053_v1 }
 0x146   : > { %v530_v0 = vpop.f32.mrb[48].mxu0  ;;  %v798_v3 = vpop.f32.mrb[48].mxu1 }
 0x147   : > { %v6823_v5 = vadd.f32 %v798_v3, %v530_v0  ;;  %v5153_v6 = vpop.f32.mrb[49].mxu0  ;;  %5548 = vmatmul.mubr.msk.f32.gmra.mrb[154].mxu0 %vm264_vm2, %v4452_v61  ;;  %v5230_v7 = vpop.f32.mrb[49].mxu1  ;;  %5625 = vmatmul.mubr.msk.f32.gmra.mrb[154].mxu1 %vm264_vm2, %v4504_v63  ;;  %v4458_v3 = vld [vmem:[%s6115_s23 + $0x4f0] sm:$0xff] }
 0x148   : > { %5550 = vmatprep.mubr.msk.f32.mxu0 %vm6054_vm1, %v6053_v1  ;;  %5627 = vmatprep.mubr.msk.f32.mxu1 %vm6054_vm1, %v6053_v1  ;;  %v4510_v6 = vld [vmem:[%s6115_s23 + $0x5b8] sm:$0xff] }
 0x14a   : > { %v974_v13 = vpop.f32.mrb[50].mxu0  ;;  %v1295_v14 = vpop.f32.mrb[50].mxu1 }
 0x14b   : > { %v1098_v15 = vadd.f32 %v974_v13, %v6575_v58  ;;  %v5235_v17 = vpop.f32.mrb[51].mxu0  ;;  %5551 = vmatmul.mubr.msk.f32.gmra.mrb[156].mxu0 %vm264_vm2, %v4453_v10  ;;  %v5312_v19 = vpop.f32.mrb[51].mxu1  ;;  %5628 = vmatmul.mubr.msk.f32.gmra.mrb[156].mxu1 %vm264_vm2, %v4505_v11 }
 0x14c   : > { %5553 = vmatprep.mubr.msk.f32.mxu0 %vm6054_vm1, %v6053_v1  ;;  %5630 = vmatprep.mubr.msk.f32.mxu1 %vm6054_vm1, %v6053_v1  ;;  %v4511_v17 = vld [vmem:[%s6115_s23 + $0x5c0] sm:$0xff] }
 0x14d   : > { %v6842_v24 = vadd.f32 %v1295_v14, %v1098_v15  ;;  %v4459_v15 = vld [vmem:[%s6115_s23 + $0x4f8] sm:$0xff] }
 0x14e   : > { %v979_v25 = vpop.f32.mrb[52].mxu0  ;;  %v1300_v58 = vpop.f32.mrb[52].mxu1 }
 0x14f   : > { %v1099_v26 = vadd.f32 %v979_v25, %v6585_v2  ;;  %v5238_v29 = vpop.f32.mrb[53].mxu0  ;;  %5554 = vmatmul.mubr.msk.f32.gmra.mrb[158].mxu0 %vm264_vm2, %v4454_v21  ;;  %v5315_v31 = vpop.f32.mrb[53].mxu1  ;;  %5631 = vmatmul.mubr.msk.f32.gmra.mrb[158].mxu1 %vm264_vm2, %v4506_v22 }
 0x150   : > { %5556 = vmatprep.mubr.msk.f32.mxu0 %vm6054_vm1, %v6053_v1  ;;  %5633 = vmatprep.mubr.msk.f32.mxu1 %vm6054_vm1, %v6053_v1  ;;  %v4512_v29 = vld [vmem:[%s6115_s23 + $0x5c8] sm:$0xff] }
 0x151   : > { %v6853_v34 = vadd.f32 %v1300_v58, %v1099_v26  ;;  %v4460_v26 = vld [vmem:[%s6115_s23 + $0x500] sm:$0xff] }
 0x152   : > { %v984_v35 = vpop.f32.mrb[54].mxu0  ;;  %v1305_v2 = vpop.f32.mrb[54].mxu1 }
 0x153   : > { %v1100_v39 = vadd.f32 %v984_v35, %v6595_v9  ;;  %v5241_v40 = vpop.f32.mrb[55].mxu0  ;;  %5557 = vmatmul.mubr.msk.f32.gmra.mrb[160].mxu0 %vm264_vm2, %v4455_v32  ;;  %v5318_v41 = vpop.f32.mrb[55].mxu1  ;;  %5634 = vmatmul.mubr.msk.f32.gmra.mrb[160].mxu1 %vm264_vm2, %v4507_v33 }
 0x154   : > { %5559 = vmatprep.mubr.msk.f32.mxu0 %vm6054_vm1, %v6053_v1  ;;  %5636 = vmatprep.mubr.msk.f32.mxu1 %vm6054_vm1, %v6053_v1  ;;  %v4513_v40 = vld [vmem:[%s6115_s23 + $0x5d0] sm:$0xff] }
 0x155   : > { %v6864_v46 = vadd.f32 %v1305_v2, %v1100_v39  ;;  %v4461_v39 = vld [vmem:[%s6115_s23 + $0x508] sm:$0xff] }
 0x156   : > { %v989_v48 = vpop.f32.mrb[56].mxu0  ;;  %v1310_v9 = vpop.f32.mrb[56].mxu1 }
 0x157   : > { %v1101_v49 = vadd.f32 %v989_v48, %v6605_v16  ;;  %v5244_v50 = vpop.f32.mrb[57].mxu0  ;;  %5560 = vmatmul.mubr.msk.f32.gmra.mrb[162].mxu0 %vm264_vm2, %v4456_v42  ;;  %v5321_v52 = vpop.f32.mrb[57].mxu1  ;;  %5637 = vmatmul.mubr.msk.f32.gmra.mrb[162].mxu1 %vm264_vm2, %v4508_v43 }
 0x158   : > { %5562 = vmatprep.mubr.msk.f32.mxu0 %vm6054_vm1, %v6053_v1  ;;  %5639 = vmatprep.mubr.msk.f32.mxu1 %vm6054_vm1, %v6053_v1  ;;  %v4514_v50 = vld [vmem:[%s6115_s23 + $0x5d8] sm:$0xff] }
 0x159   : > { %v6875_v57 = vadd.f32 %v1310_v9, %v1101_v49  ;;  %v4462_v49 = vld [vmem:[%s6115_s23 + $0x510] sm:$0xff] }
 0x15a   : > { %v994_v60 = vpop.f32.mrb[58].mxu0  ;;  %v1315_v16 = vpop.f32.mrb[58].mxu1 }
 0x15b   : > { %v1102_v61 = vadd.f32 %v994_v60, %v6615_v23  ;;  %v5247_v63 = vpop.f32.mrb[59].mxu0  ;;  %5563 = vmatmul.mubr.msk.f32.gmra.mrb[164].mxu0 %vm264_vm2, %v4457_v54  ;;  %v5324_v0 = vpop.f32.mrb[59].mxu1  ;;  %5640 = vmatmul.mubr.msk.f32.gmra.mrb[164].mxu1 %vm264_vm2, %v4509_v55 }
 0x15c   : > { %5565 = vmatprep.mubr.msk.f32.mxu0 %vm6054_vm1, %v6053_v1  ;;  %5642 = vmatprep.mubr.msk.f32.mxu1 %vm6054_vm1, %v6053_v1  ;;  %v4515_v63 = vld [vmem:[%s6115_s23 + $0x5e0] sm:$0xff] }
 0x15d   : > { %v6886_v7 = vadd.f32 %v1315_v16, %v1102_v61  ;;  %v4463_v61 = vld [vmem:[%s6115_s23 + $0x518] sm:$0xff] }
 0x15e   : > { %v999_v10 = vpop.f32.mrb[60].mxu0  ;;  %v1320_v23 = vpop.f32.mrb[60].mxu1 }
 0x15f   : > { %v1103_v11 = vadd.f32 %v999_v10, %v6625_v30  ;;  %v5250_v13 = vpop.f32.mrb[61].mxu0  ;;  %5566 = vmatmul.mubr.msk.f32.gmra.mrb[166].mxu0 %vm264_vm2, %v4458_v3  ;;  %v5327_v14 = vpop.f32.mrb[61].mxu1  ;;  %5643 = vmatmul.mubr.msk.f32.gmra.mrb[166].mxu1 %vm264_vm2, %v4510_v6 }
 0x160   : > { %5568 = vmatprep.mubr.msk.f32.mxu0 %vm6054_vm1, %v6053_v1  ;;  %5645 = vmatprep.mubr.msk.f32.mxu1 %vm6054_vm1, %v6053_v1  ;;  %v4516_v13 = vld [vmem:[%s6115_s23 + $0x5e8] sm:$0xff] }
 0x161   : > { %v6897_v19 = vadd.f32 %v1320_v23, %v1103_v11  ;;  %v4464_v11 = vld [vmem:[%s6115_s23 + $0x520] sm:$0xff] }
 0x162   : > { %v1004_v21 = vpop.f32.mrb[62].mxu0  ;;  %v1325_v30 = vpop.f32.mrb[62].mxu1 }
 0x163   : > { %v1104_v22 = vadd.f32 %v1004_v21, %v6635_v37  ;;  %v5253_v25 = vpop.f32.mrb[63].mxu0  ;;  %5569 = vmatmul.mubr.msk.f32.gmra.mrb[168].mxu0 %vm264_vm2, %v4459_v15  ;;  %v5330_v58 = vpop.f32.mrb[63].mxu1  ;;  %5646 = vmatmul.mubr.msk.f32.gmra.mrb[168].mxu1 %vm264_vm2, %v4511_v17 }
 0x164   : > { %5571 = vmatprep.mubr.msk.f32.mxu0 %vm6054_vm1, %v6053_v1  ;;  %5648 = vmatprep.mubr.msk.f32.mxu1 %vm6054_vm1, %v6053_v1  ;;  %v4517_v25 = vld [vmem:[%s6115_s23 + $0x5f0] sm:$0xff] }
 0x165   : > { %v6908_v31 = vadd.f32 %v1325_v30, %v1104_v22  ;;  %v4465_v22 = vld [vmem:[%s6115_s23 + $0x528] sm:$0xff] }
 0x166   : > { %v1009_v32 = vpop.f32.mrb[64].mxu0  ;;  %v1330_v37 = vpop.f32.mrb[64].mxu1 }
 0x167   : > { %v1105_v33 = vadd.f32 %v1009_v32, %v6645_v44  ;;  %v5256_v35 = vpop.f32.mrb[65].mxu0  ;;  %5572 = vmatmul.mubr.msk.f32.gmra.mrb[170].mxu0 %vm264_vm2, %v4460_v26  ;;  %v5333_v2 = vpop.f32.mrb[65].mxu1  ;;  %5649 = vmatmul.mubr.msk.f32.gmra.mrb[170].mxu1 %vm264_vm2, %v4512_v29 }
 0x168   : > { %5574 = vmatprep.mubr.msk.f32.mxu0 %vm6054_vm1, %v6053_v1  ;;  %5651 = vmatprep.mubr.msk.f32.mxu1 %vm6054_vm1, %v6053_v1  ;;  %v4518_v35 = vld [vmem:[%s6115_s23 + $0x5f8] sm:$0xff] }
 0x169   : > { %v6919_v41 = vadd.f32 %v1330_v37, %v1105_v33  ;;  %v4466_v33 = vld [vmem:[%s6115_s23 + $0x530] sm:$0xff] }
 0x16a   : > { %v1014_v42 = vpop.f32.mrb[66].mxu0  ;;  %v1335_v44 = vpop.f32.mrb[66].mxu1 }
 0x16b   : > { %v1106_v43 = vadd.f32 %v1014_v42, %v6655_v51  ;;  %v5259_v48 = vpop.f32.mrb[67].mxu0  ;;  %5575 = vmatmul.mubr.msk.f32.gmra.mrb[172].mxu0 %vm264_vm2, %v4461_v39  ;;  %v5336_v9 = vpop.f32.mrb[67].mxu1  ;;  %5652 = vmatmul.mubr.msk.f32.gmra.mrb[172].mxu1 %vm264_vm2, %v4513_v40 }
 0x16c   : > { %5577 = vmatprep.mubr.msk.f32.mxu0 %vm6054_vm1, %v6053_v1  ;;  %5654 = vmatprep.mubr.msk.f32.mxu1 %vm6054_vm1, %v6053_v1  ;;  %v4519_v48 = vld [vmem:[%s6115_s23 + $0x600] sm:$0xff] }
 0x16d   : > { %v6930_v52 = vadd.f32 %v1335_v44, %v1106_v43  ;;  %v4467_v43 = vld [vmem:[%s6115_s23 + $0x538] sm:$0xff] }
 0x16e   : > { %v1019_v54 = vpop.f32.mrb[68].mxu0  ;;  %v1340_v51 = vpop.f32.mrb[68].mxu1 }
 0x16f   : > { %v1107_v55 = vadd.f32 %v1019_v54, %v6665_v59  ;;  %v5262_v60 = vpop.f32.mrb[69].mxu0  ;;  %5578 = vmatmul.mubr.msk.f32.gmra.mrb[174].mxu0 %vm264_vm2, %v4462_v49  ;;  %v5339_v16 = vpop.f32.mrb[69].mxu1  ;;  %5655 = vmatmul.mubr.msk.f32.gmra.mrb[174].mxu1 %vm264_vm2, %v4514_v50 }
 0x170   : > { %5580 = vmatprep.mubr.msk.f32.mxu0 %vm6054_vm1, %v6053_v1  ;;  %5657 = vmatprep.mubr.msk.f32.mxu1 %vm6054_vm1, %v6053_v1  ;;  %v4520_v60 = vld [vmem:[%s6115_s23 + $0x608] sm:$0xff] }
 0x171   : > { %v6941_v0 = vadd.f32 %v1340_v51, %v1107_v55  ;;  %v4468_v55 = vld [vmem:[%s6115_s23 + $0x540] sm:$0xff] }
 0x172   : > { %v1024_v3 = vpop.f32.mrb[70].mxu0  ;;  %v1345_v59 = vpop.f32.mrb[70].mxu1 }
 0x173   : > { %v1108_v6 = vadd.f32 %v1024_v3, %v6675_v4  ;;  %v5265_v10 = vpop.f32.mrb[71].mxu0  ;;  %5581 = vmatmul.mubr.msk.f32.gmra.mrb[176].mxu0 %vm264_vm2, %v4463_v61  ;;  %v5342_v23 = vpop.f32.mrb[71].mxu1  ;;  %5658 = vmatmul.mubr.msk.f32.gmra.mrb[176].mxu1 %vm264_vm2, %v4515_v63 }
 0x174   : > { %5583 = vmatprep.mubr.msk.f32.mxu0 %vm6054_vm1, %v6053_v1  ;;  %5660 = vmatprep.mubr.msk.f32.mxu1 %vm6054_vm1, %v6053_v1  ;;  %v4521_v10 = vld [vmem:[%s6115_s23 + $0x610] sm:$0xff] }
 0x175   : > { %v6952_v14 = vadd.f32 %v1345_v59, %v1108_v6  ;;  %v4469_v6 = vld [vmem:[%s6115_s23 + $0x548] sm:$0xff] }
 0x176   : > { %v1029_v15 = vpop.f32.mrb[72].mxu0  ;;  %v1350_v4 = vpop.f32.mrb[72].mxu1 }
 0x177   : > { %v1109_v17 = vadd.f32 %v1029_v15, %v6685_v12  ;;  %v5268_v21 = vpop.f32.mrb[73].mxu0  ;;  %5584 = vmatmul.mubr.msk.f32.gmra.mrb[178].mxu0 %vm264_vm2, %v4464_v11  ;;  %v5345_v30 = vpop.f32.mrb[73].mxu1  ;;  %5661 = vmatmul.mubr.msk.f32.gmra.mrb[178].mxu1 %vm264_vm2, %v4516_v13 }
 0x178   : > { %5586 = vmatprep.mubr.msk.f32.mxu0 %vm6054_vm1, %v6053_v1  ;;  %5663 = vmatprep.mubr.msk.f32.mxu1 %vm6054_vm1, %v6053_v1  ;;  %v4522_v21 = vld [vmem:[%s6115_s23 + $0x618] sm:$0xff] }
 0x179   : > { %v6963_v58 = vadd.f32 %v1350_v4, %v1109_v17  ;;  %v4470_v17 = vld [vmem:[%s6115_s23 + $0x550] sm:$0xff] }
 0x17a   : > { %v1034_v26 = vpop.f32.mrb[74].mxu0  ;;  %v1355_v12 = vpop.f32.mrb[74].mxu1 }
 0x17b   : > { %v1110_v29 = vadd.f32 %v1034_v26, %v6695_v20  ;;  %v5271_v32 = vpop.f32.mrb[75].mxu0  ;;  %5587 = vmatmul.mubr.msk.f32.gmra.mrb[180].mxu0 %vm264_vm2, %v4465_v22  ;;  %v5348_v37 = vpop.f32.mrb[75].mxu1  ;;  %5664 = vmatmul.mubr.msk.f32.gmra.mrb[180].mxu1 %vm264_vm2, %v4517_v25 }
 0x17c   : > { %5589 = vmatprep.mubr.msk.f32.mxu0 %vm6054_vm1, %v6053_v1  ;;  %5666 = vmatprep.mubr.msk.f32.mxu1 %vm6054_vm1, %v6053_v1  ;;  %v4523_v32 = vld [vmem:[%s6115_s23 + $0x620] sm:$0xff] }
 0x17d   : > { %v6974_v2 = vadd.f32 %v1355_v12, %v1110_v29  ;;  %v4471_v29 = vld [vmem:[%s6115_s23 + $0x558] sm:$0xff] }
 0x17e   : > { %v1039_v39 = vpop.f32.mrb[76].mxu0  ;;  %v1360_v20 = vpop.f32.mrb[76].mxu1 }
 0x17f   : > { %v1111_v40 = vadd.f32 %v1039_v39, %v6705_v28  ;;  %v5274_v42 = vpop.f32.mrb[77].mxu0  ;;  %5590 = vmatmul.mubr.msk.f32.gmra.mrb[182].mxu0 %vm264_vm2, %v4466_v33  ;;  %v5351_v44 = vpop.f32.mrb[77].mxu1  ;;  %5667 = vmatmul.mubr.msk.f32.gmra.mrb[182].mxu1 %vm264_vm2, %v4518_v35 }
 0x180   : > { %5592 = vmatprep.mubr.msk.f32.mxu0 %vm6054_vm1, %v6053_v1  ;;  %5669 = vmatprep.mubr.msk.f32.mxu1 %vm6054_vm1, %v6053_v1  ;;  %v4524_v42 = vld [vmem:[%s6115_s23 + $0x628] sm:$0xff] }
 0x181   : > { %v6985_v9 = vadd.f32 %v1360_v20, %v1111_v40  ;;  %v4472_v40 = vld [vmem:[%s6115_s23 + $0x560] sm:$0xff] }
 0x182   : > { %v1044_v49 = vpop.f32.mrb[78].mxu0  ;;  %v1365_v28 = vpop.f32.mrb[78].mxu1 }
 0x183   : > { %v1112_v50 = vadd.f32 %v1044_v49, %v6715_v36  ;;  %v5277_v54 = vpop.f32.mrb[79].mxu0  ;;  %5593 = vmatmul.mubr.msk.f32.gmra.mrb[184].mxu0 %vm264_vm2, %v4467_v43  ;;  %v5354_v51 = vpop.f32.mrb[79].mxu1  ;;  %5670 = vmatmul.mubr.msk.f32.gmra.mrb[184].mxu1 %vm264_vm2, %v4519_v48 }
 0x184   : > { %5595 = vmatprep.mubr.msk.f32.mxu0 %vm6054_vm1, %v6053_v1  ;;  %5672 = vmatprep.mubr.msk.f32.mxu1 %vm6054_vm1, %v6053_v1  ;;  %v4525_v54 = vld [vmem:[%s6115_s23 + $0x630] sm:$0xff] }
 0x185   : > { %v6996_v16 = vadd.f32 %v1365_v28, %v1112_v50  ;;  %v4473_v50 = vld [vmem:[%s6115_s23 + $0x568] sm:$0xff] }
 0x186   : > { %v1049_v61 = vpop.f32.mrb[80].mxu0  ;;  %v1370_v36 = vpop.f32.mrb[80].mxu1 }
 0x187   : > { %v1113_v63 = vadd.f32 %v1049_v61, %v6725_v45  ;;  %v5280_v3 = vpop.f32.mrb[81].mxu0  ;;  %5596 = vmatmul.mubr.msk.f32.gmra.mrb[186].mxu0 %vm264_vm2, %v4468_v55  ;;  %v5357_v59 = vpop.f32.mrb[81].mxu1  ;;  %5673 = vmatmul.mubr.msk.f32.gmra.mrb[186].mxu1 %vm264_vm2, %v4520_v60 }
 0x188   : > { %5598 = vmatprep.mubr.msk.f32.mxu0 %vm6054_vm1, %v6053_v1  ;;  %5675 = vmatprep.mubr.msk.f32.mxu1 %vm6054_vm1, %v6053_v1  ;;  %v4526_v3 = vld [vmem:[%s6115_s23 + $0x638] sm:$0xff] }
 0x189   : > { %v7007_v23 = vadd.f32 %v1370_v36, %v1113_v63  ;;  %v4474_v63 = vld [vmem:[%s6115_s23 + $0x570] sm:$0xff] }
 0x18a   : > { %v1054_v11 = vpop.f32.mrb[82].mxu0  ;;  %v1375_v45 = vpop.f32.mrb[82].mxu1 }
 0x18b   : > { %v1114_v13 = vadd.f32 %v1054_v11, %v6735_v53  ;;  %v5283_v15 = vpop.f32.mrb[83].mxu0  ;;  %5599 = vmatmul.mubr.msk.f32.gmra.mrb[188].mxu0 %vm264_vm2, %v4469_v6  ;;  %v5360_v4 = vpop.f32.mrb[83].mxu1  ;;  %5676 = vmatmul.mubr.msk.f32.gmra.mrb[188].mxu1 %vm264_vm2, %v4521_v10 }
 0x18c   : > { %5601 = vmatprep.mubr.msk.f32.mxu0 %vm6054_vm1, %v6053_v1  ;;  %5678 = vmatprep.mubr.msk.f32.mxu1 %vm6054_vm1, %v6053_v1  ;;  %v4606_v15 = vld [vmem:[%s6115_s23 + $0x708] sm:$0xff] }
 0x18d   : > { %v7018_v30 = vadd.f32 %v1375_v45, %v1114_v13  ;;  %v4554_v13 = vld [vmem:[%s6115_s23 + $0x640] sm:$0xff] }
 0x18e   : > { %v1059_v22 = vpop.f32.mrb[84].mxu0  ;;  %v1380_v53 = vpop.f32.mrb[84].mxu1 }
 0x18f   : > { %v1115_v25 = vadd.f32 %v1059_v22, %v6745_v62  ;;  %v5286_v26 = vpop.f32.mrb[85].mxu0  ;;  %5602 = vmatmul.mubr.msk.f32.gmra.mrb[190].mxu0 %vm264_vm2, %v4470_v17  ;;  %v5363_v12 = vpop.f32.mrb[85].mxu1  ;;  %5679 = vmatmul.mubr.msk.f32.gmra.mrb[190].mxu1 %vm264_vm2, %v4522_v21  ;;  %v4735_v17 = vld [vmem:[%s7832_s1 + $0x2c] sm:$0xf] }
 0x190   : > { %5604 = vmatprep.mubr.msk.f32.mxu0 %vm6054_vm1, %v6053_v1  ;;  %5681 = vmatprep.mubr.msk.f32.mxu1 %vm6054_vm1, %v6053_v1  ;;  %v4555_v12 = vld [vmem:[%s6115_s23 + $0x648] sm:$0xff] }
 0x191   : > { %v7029_v37 = vadd.f32 %v1380_v53, %v1115_v25 }
 0x192   : > { %v1064_v33 = vpop.f32.mrb[86].mxu0  ;;  %v1385_v62 = vpop.f32.mrb[86].mxu1 }
 0x193   : > { %v1116_v35 = vadd.f32 %v1064_v33, %v6755_v8  ;;  %v5289_v39 = vpop.f32.mrb[87].mxu0  ;;  %5605 = vmatmul.mubr.msk.f32.gmra.mrb[192].mxu0 %vm264_vm2, %v4471_v29  ;;  %v5366_v20 = vpop.f32.mrb[87].mxu1  ;;  %5682 = vmatmul.mubr.msk.f32.gmra.mrb[192].mxu1 %vm264_vm2, %v4523_v32  ;;  %v4607_v29 = vld [vmem:[%s6115_s23 + $0x710] sm:$0xff] }
 0x194   : > { %5607 = vmatprep.mubr.msk.f32.mxu0 %vm6054_vm1, %v6053_v1  ;;  %5684 = vmatprep.mubr.msk.f32.mxu1 %vm6054_vm1, %v6053_v1  ;;  %v4556_v20 = vld [vmem:[%s6115_s23 + $0x650] sm:$0xff] }
 0x195   : > { %v7040_v44 = vadd.f32 %v1385_v62, %v1116_v35 }
 0x196   : > { %v1069_v43 = vpop.f32.mrb[88].mxu0  ;;  %v1390_v8 = vpop.f32.mrb[88].mxu1 }
 0x197   : > { %v1117_v48 = vadd.f32 %v1069_v43, %v6765_v18  ;;  %v5292_v49 = vpop.f32.mrb[89].mxu0  ;;  %5608 = vmatmul.mubr.msk.f32.gmra.mrb[194].mxu0 %vm264_vm2, %v4472_v40  ;;  %v5369_v28 = vpop.f32.mrb[89].mxu1  ;;  %5685 = vmatmul.mubr.msk.f32.gmra.mrb[194].mxu1 %vm264_vm2, %v4524_v42  ;;  %v4608_v40 = vld [vmem:[%s6115_s23 + $0x718] sm:$0xff] }
 0x198   : > { %5610 = vmatprep.mubr.msk.f32.mxu0 %vm6054_vm1, %v6053_v1  ;;  %5687 = vmatprep.mubr.msk.f32.mxu1 %vm6054_vm1, %v6053_v1  ;;  %v4557_v28 = vld [vmem:[%s6115_s23 + $0x658] sm:$0xff] }
 0x199   : > { %v7051_v51 = vadd.f32 %v1390_v8, %v1117_v48 }
 0x19a   : > { %v1074_v55 = vpop.f32.mrb[90].mxu0  ;;  %v1395_v18 = vpop.f32.mrb[90].mxu1 }
 0x19b   : > { %v1118_v60 = vadd.f32 %v1074_v55, %v6775_v27  ;;  %v5295_v61 = vpop.f32.mrb[91].mxu0  ;;  %5611 = vmatmul.mubr.msk.f32.gmra.mrb[196].mxu0 %vm264_vm2, %v4473_v50  ;;  %v5372_v36 = vpop.f32.mrb[91].mxu1  ;;  %5688 = vmatmul.mubr.msk.f32.gmra.mrb[196].mxu1 %vm264_vm2, %v4525_v54  ;;  %v4609_v50 = vld [vmem:[%s6115_s23 + $0x720] sm:$0xff] }
 0x19c   : > { %5613 = vmatprep.mubr.msk.f32.mxu0 %vm6054_vm1, %v6053_v1  ;;  %5690 = vmatprep.mubr.msk.f32.mxu1 %vm6054_vm1, %v6053_v1  ;;  %v4558_v36 = vld [vmem:[%s6115_s23 + $0x660] sm:$0xff] }
 0x19d   : > { %v7062_v59 = vadd.f32 %v1395_v18, %v1118_v60 }
 0x19e   : > { %v1079_v6 = vpop.f32.mrb[92].mxu0  ;;  %v1400_v27 = vpop.f32.mrb[92].mxu1 }
 0x19f   : > { %v1119_v10 = vadd.f32 %v1079_v6, %v6785_v38  ;;  %v5298_v11 = vpop.f32.mrb[93].mxu0  ;;  %5614 = vmatmul.mubr.msk.f32.gmra.mrb[198].mxu0 %vm264_vm2, %v4474_v63  ;;  %v5375_v45 = vpop.f32.mrb[93].mxu1  ;;  %5691 = vmatmul.mubr.msk.f32.gmra.mrb[198].mxu1 %vm264_vm2, %v4526_v3  ;;  %v4683_v38 = vld [vmem:[%s7832_s1 + $0x28] sm:$0xf] }
 0x1a0   : > { %5695 = vmatprep.mubr.msk.f32.mxu0 %vm6054_vm1, %v6053_v1  ;;  %5772 = vmatprep.mubr.msk.f32.mxu1 %vm6054_vm1, %v6053_v1  ;;  %v4610_v63 = vld [vmem:[%s6115_s23 + $0x728] sm:$0xff] }
 0x1a1   : > { %v7073_v4 = vadd.f32 %v1400_v27, %v1119_v10  ;;  %v4559_v45 = vld [vmem:[%s6115_s23 + $0x668] sm:$0xff] }
 0x1a2   : > { %v1084_v21 = vpop.f32.mrb[94].mxu0  ;;  %v1405_v22 = vpop.f32.mrb[94].mxu1 }
 0x1a3   : > { %v1120_v53 = vadd.f32 %v1084_v21, %v6799_v47  ;;  %v5301_v25 = vpop.f32.mrb[95].mxu0  ;;  %5696 = vmatmul.mubr.msk.f32.vlgmr.msra.gmra.mrb[200].mxu0 %vm264_vm2, %v4554_v13  ;;  %v5378_v26 = vpop.f32.mrb[95].mxu1  ;;  %5773 = vmatmul.mubr.msk.f32.vlgmr.msra.gmra.mrb[200].mxu1 %vm264_vm2, %v4606_v15  ;;  %v4611_v13 = vld [vmem:[%s6115_s23 + $0x730] sm:$0xff] }
 0x1a4   : > { %5848 = vmatpush3.msk.msra.mxu0 %vm340_vm0, %v4683_v38  ;;  %5925 = vmatpush3.msk.msra.mxu1 %vm340_vm0, %v4735_v17  ;;  %v4612_v25 = vld [vmem:[%s6115_s23 + $0x738] sm:$0xff] }
 0x1a5   : > { %v7088_v32 = vadd.f32 %v1405_v22, %v1120_v53  ;;  %5698 = vmatprep.mubr.msk.f32.mxu0 %vm6054_vm1, %v6053_v1  ;;  %5775 = vmatprep.mubr.msk.f32.mxu1 %vm6054_vm1, %v6053_v1  ;;  %v4560_v53 = vld [vmem:[%s6115_s23 + $0x670] sm:$0xff] }
 0x1a6   : > { %v1089_v47 = vpop.f32.mrb[96].mxu0  ;;  %v1410_v33 = vpop.f32.mrb[96].mxu1 }
 0x1a7   : > { %v1121_v62 = vadd.f32 %v1089_v47, %v6813_v56  ;;  %v5304_v35 = vpop.f32.mrb[97].mxu0  ;;  %5699 = vmatmul.mubr.msk.f32.gmra.mrb[202].mxu0 %vm264_vm2, %v4555_v12  ;;  %v5381_v39 = vpop.f32.mrb[97].mxu1  ;;  %5776 = vmatmul.mubr.msk.f32.gmra.mrb[202].mxu1 %vm264_vm2, %v4607_v29 }
 0x1a8   : > { %5701 = vmatprep.mubr.msk.f32.mxu0 %vm6054_vm1, %v6053_v1  ;;  %5778 = vmatprep.mubr.msk.f32.mxu1 %vm6054_vm1, %v6053_v1  ;;  %v4613_v35 = vld [vmem:[%s6115_s23 + $0x740] sm:$0xff] }
 0x1a9   : > { %v7103_v42 = vadd.f32 %v1410_v33, %v1121_v62  ;;  %v4561_v62 = vld [vmem:[%s6115_s23 + $0x678] sm:$0xff] }
 0x1aa   : > { %v1094_v43 = vpop.f32.mrb[98].mxu0  ;;  %v1415_v56 = vpop.f32.mrb[98].mxu1 }
 0x1ab   : > { %v1122_v8 = vadd.f32 %v1094_v43, %v6823_v5  ;;  %v5307_v48 = vpop.f32.mrb[99].mxu0  ;;  %5702 = vmatmul.mubr.msk.f32.gmra.mrb[204].mxu0 %vm264_vm2, %v4556_v20  ;;  %v5384_v49 = vpop.f32.mrb[99].mxu1  ;;  %5779 = vmatmul.mubr.msk.f32.gmra.mrb[204].mxu1 %vm264_vm2, %v4608_v40 }
 0x1ac   : > { %5704 = vmatprep.mubr.msk.f32.mxu0 %vm6054_vm1, %v6053_v1  ;;  %5781 = vmatprep.mubr.msk.f32.mxu1 %vm6054_vm1, %v6053_v1  ;;  %v4614_v48 = vld [vmem:[%s6115_s23 + $0x748] sm:$0xff] }
 0x1ad   : > { %v7114_v54 = vadd.f32 %v1415_v56, %v1122_v8  ;;  %v4562_v8 = vld [vmem:[%s6115_s23 + $0x680] sm:$0xff] }
 0x1ae   : > { %v1616_v55 = vpop.f32.mrb[100].mxu0  ;;  %v1937_v5 = vpop.f32.mrb[100].mxu1 }
 0x1af   : > { %v1740_v18 = vadd.f32 %v1616_v55, %v6842_v24  ;;  %v5389_v60 = vpop.f32.mrb[101].mxu0  ;;  %5705 = vmatmul.mubr.msk.f32.gmra.mrb[206].mxu0 %vm264_vm2, %v4557_v28  ;;  %v5466_v61 = vpop.f32.mrb[101].mxu1  ;;  %5782 = vmatmul.mubr.msk.f32.gmra.mrb[206].mxu1 %vm264_vm2, %v4609_v50 }
 0x1b0   : > { %5707 = vmatprep.mubr.msk.f32.mxu0 %vm6054_vm1, %v6053_v1  ;;  %5784 = vmatprep.mubr.msk.f32.mxu1 %vm6054_vm1, %v6053_v1  ;;  %v4615_v60 = vld [vmem:[%s6115_s23 + $0x750] sm:$0xff] }
 0x1b1   : > { %v7125_v3 = vadd.f32 %v1937_v5, %v1740_v18  ;;  %v4563_v18 = vld [vmem:[%s6115_s23 + $0x688] sm:$0xff] }
 0x1b2   : > { %v1621_v6 = vpop.f32.mrb[102].mxu0  ;;  %v1942_v24 = vpop.f32.mrb[102].mxu1 }
 0x1b3   : > { %v1741_v27 = vadd.f32 %v1621_v6, %v6853_v34  ;;  %v5392_v10 = vpop.f32.mrb[103].mxu0  ;;  %5708 = vmatmul.mubr.msk.f32.gmra.mrb[208].mxu0 %vm264_vm2, %v4558_v36  ;;  %v5469_v11 = vpop.f32.mrb[103].mxu1  ;;  %5785 = vmatmul.mubr.msk.f32.gmra.mrb[208].mxu1 %vm264_vm2, %v4610_v63 }
 0x1b4   : > { %5710 = vmatprep.mubr.msk.f32.mxu0 %vm6054_vm1, %v6053_v1  ;;  %5787 = vmatprep.mubr.msk.f32.mxu1 %vm6054_vm1, %v6053_v1  ;;  %v4616_v10 = vld [vmem:[%s6115_s23 + $0x758] sm:$0xff] }
 0x1b5   : > { %v7136_v15 = vadd.f32 %v1942_v24, %v1741_v27  ;;  %v4564_v27 = vld [vmem:[%s6115_s23 + $0x690] sm:$0xff] }
 0x1b6   : > { %v1626_v38 = vpop.f32.mrb[104].mxu0  ;;  %v1947_v34 = vpop.f32.mrb[104].mxu1 }
 0x1b7   : > { %v1742_v17 = vadd.f32 %v1626_v38, %v6864_v46  ;;  %v5395_v21 = vpop.f32.mrb[105].mxu0  ;;  %5711 = vmatmul.mubr.msk.f32.gmra.mrb[210].mxu0 %vm264_vm2, %v4559_v45  ;;  %v5472_v22 = vpop.f32.mrb[105].mxu1  ;;  %5788 = vmatmul.mubr.msk.f32.gmra.mrb[210].mxu1 %vm264_vm2, %v4611_v13 }
 0x1b8   : > { %5713 = vmatprep.mubr.msk.f32.mxu0 %vm6054_vm1, %v6053_v1  ;;  %5790 = vmatprep.mubr.msk.f32.mxu1 %vm6054_vm1, %v6053_v1  ;;  %v4617_v21 = vld [vmem:[%s6115_s23 + $0x760] sm:$0xff] }
 0x1b9   : > { %v7147_v26 = vadd.f32 %v1947_v34, %v1742_v17  ;;  %v4565_v17 = vld [vmem:[%s6115_s23 + $0x698] sm:$0xff] }
 0x1ba   : > { %v1631_v12 = vpop.f32.mrb[106].mxu0  ;;  %v1952_v46 = vpop.f32.mrb[106].mxu1 }
 0x1bb   : > { %v1743_v29 = vadd.f32 %v1631_v12, %v6875_v57  ;;  %v5398_v47 = vpop.f32.mrb[107].mxu0  ;;  %5714 = vmatmul.mubr.msk.f32.gmra.mrb[212].mxu0 %vm264_vm2, %v4560_v53  ;;  %v5475_v33 = vpop.f32.mrb[107].mxu1  ;;  %5791 = vmatmul.mubr.msk.f32.gmra.mrb[212].mxu1 %vm264_vm2, %v4612_v25 }
 0x1bc   : > { %5716 = vmatprep.mubr.msk.f32.mxu0 %vm6054_vm1, %v6053_v1  ;;  %5793 = vmatprep.mubr.msk.f32.mxu1 %vm6054_vm1, %v6053_v1  ;;  %v4618_v47 = vld [vmem:[%s6115_s23 + $0x768] sm:$0xff] }
 0x1bd   : > { %v7158_v39 = vadd.f32 %v1952_v46, %v1743_v29  ;;  %v4566_v29 = vld [vmem:[%s6115_s23 + $0x6a0] sm:$0xff] }
 0x1be   : > { %v1636_v20 = vpop.f32.mrb[108].mxu0  ;;  %v1957_v57 = vpop.f32.mrb[108].mxu1 }
 0x1bf   : > { %v1744_v40 = vadd.f32 %v1636_v20, %v6886_v7  ;;  %v5401_v43 = vpop.f32.mrb[109].mxu0  ;;  %5717 = vmatmul.mubr.msk.f32.gmra.mrb[214].mxu0 %vm264_vm2, %v4561_v62  ;;  %v5478_v56 = vpop.f32.mrb[109].mxu1  ;;  %5794 = vmatmul.mubr.msk.f32.gmra.mrb[214].mxu1 %vm264_vm2, %v4613_v35 }
 0x1c0   : > { %5719 = vmatprep.mubr.msk.f32.mxu0 %vm6054_vm1, %v6053_v1  ;;  %5796 = vmatprep.mubr.msk.f32.mxu1 %vm6054_vm1, %v6053_v1  ;;  %v4619_v43 = vld [vmem:[%s6115_s23 + $0x770] sm:$0xff] }
 0x1c1   : > { %v7169_v49 = vadd.f32 %v1957_v57, %v1744_v40  ;;  %v4567_v40 = vld [vmem:[%s6115_s23 + $0x6a8] sm:$0xff] }
 0x1c2   : > { %v1641_v28 = vpop.f32.mrb[110].mxu0  ;;  %v1962_v7 = vpop.f32.mrb[110].mxu1 }
 0x1c3   : > { %v1745_v50 = vadd.f32 %v1641_v28, %v6897_v19  ;;  %v5404_v55 = vpop.f32.mrb[111].mxu0  ;;  %5720 = vmatmul.mubr.msk.f32.gmra.mrb[216].mxu0 %vm264_vm2, %v4562_v8  ;;  %v5481_v5 = vpop.f32.mrb[111].mxu1  ;;  %5797 = vmatmul.mubr.msk.f32.gmra.mrb[216].mxu1 %vm264_vm2, %v4614_v48 }
 0x1c4   : > { %5722 = vmatprep.mubr.msk.f32.mxu0 %vm6054_vm1, %v6053_v1  ;;  %5799 = vmatprep.mubr.msk.f32.mxu1 %vm6054_vm1, %v6053_v1  ;;  %v4620_v55 = vld [vmem:[%s6115_s23 + $0x778] sm:$0xff] }
 0x1c5   : > { %v7180_v61 = vadd.f32 %v1962_v7, %v1745_v50  ;;  %v4568_v50 = vld [vmem:[%s6115_s23 + $0x6b0] sm:$0xff] }
 0x1c6   : > { %v1646_v36 = vpop.f32.mrb[112].mxu0  ;;  %v1967_v19 = vpop.f32.mrb[112].mxu1 }
 0x1c7   : > { %v1746_v63 = vadd.f32 %v1646_v36, %v6908_v31  ;;  %v5407_v6 = vpop.f32.mrb[113].mxu0  ;;  %5723 = vmatmul.mubr.msk.f32.gmra.mrb[218].mxu0 %vm264_vm2, %v4563_v18  ;;  %v5484_v24 = vpop.f32.mrb[113].mxu1  ;;  %5800 = vmatmul.mubr.msk.f32.gmra.mrb[218].mxu1 %vm264_vm2, %v4615_v60 }
 0x1c8   : > { %5725 = vmatprep.mubr.msk.f32.mxu0 %vm6054_vm1, %v6053_v1  ;;  %5802 = vmatprep.mubr.msk.f32.mxu1 %vm6054_vm1, %v6053_v1  ;;  %v4621_v6 = vld [vmem:[%s6115_s23 + $0x780] sm:$0xff] }
 0x1c9   : > { %v7191_v11 = vadd.f32 %v1967_v19, %v1746_v63  ;;  %v4569_v63 = vld [vmem:[%s6115_s23 + $0x6b8] sm:$0xff] }
 0x1ca   : > { %v1651_v45 = vpop.f32.mrb[114].mxu0  ;;  %v1972_v31 = vpop.f32.mrb[114].mxu1 }
 0x1cb   : > { %v1747_v13 = vadd.f32 %v1651_v45, %v6919_v41  ;;  %v5410_v38 = vpop.f32.mrb[115].mxu0  ;;  %5726 = vmatmul.mubr.msk.f32.gmra.mrb[220].mxu0 %vm264_vm2, %v4564_v27  ;;  %v5487_v34 = vpop.f32.mrb[115].mxu1  ;;  %5803 = vmatmul.mubr.msk.f32.gmra.mrb[220].mxu1 %vm264_vm2, %v4616_v10 }
 0x1cc   : > { %5728 = vmatprep.mubr.msk.f32.mxu0 %vm6054_vm1, %v6053_v1  ;;  %5805 = vmatprep.mubr.msk.f32.mxu1 %vm6054_vm1, %v6053_v1  ;;  %v4622_v38 = vld [vmem:[%s6115_s23 + $0x788] sm:$0xff] }
 0x1cd   : > { %v7202_v22 = vadd.f32 %v1972_v31, %v1747_v13  ;;  %v4570_v13 = vld [vmem:[%s6115_s23 + $0x6c0] sm:$0xff] }
 0x1ce   : > { %v1656_v53 = vpop.f32.mrb[116].mxu0  ;;  %v1977_v41 = vpop.f32.mrb[116].mxu1 }
 0x1cf   : > { %v1748_v25 = vadd.f32 %v1656_v53, %v6930_v52  ;;  %v5413_v12 = vpop.f32.mrb[117].mxu0  ;;  %5729 = vmatmul.mubr.msk.f32.gmra.mrb[222].mxu0 %vm264_vm2, %v4565_v17  ;;  %v5490_v46 = vpop.f32.mrb[117].mxu1  ;;  %5806 = vmatmul.mubr.msk.f32.gmra.mrb[222].mxu1 %vm264_vm2, %v4617_v21 }
 0x1d0   : > { %5731 = vmatprep.mubr.msk.f32.mxu0 %vm6054_vm1, %v6053_v1  ;;  %5808 = vmatprep.mubr.msk.f32.mxu1 %vm6054_vm1, %v6053_v1  ;;  %v4623_v12 = vld [vmem:[%s6115_s23 + $0x790] sm:$0xff] }
 0x1d1   : > { %v7213_v33 = vadd.f32 %v1977_v41, %v1748_v25  ;;  %v4571_v25 = vld [vmem:[%s6115_s23 + $0x6c8] sm:$0xff] }
 0x1d2   : > { %v1661_v62 = vpop.f32.mrb[118].mxu0  ;;  %v1982_v52 = vpop.f32.mrb[118].mxu1 }
 0x1d3   : > { %v1749_v35 = vadd.f32 %v1661_v62, %v6941_v0  ;;  %v5416_v20 = vpop.f32.mrb[119].mxu0  ;;  %5732 = vmatmul.mubr.msk.f32.gmra.mrb[224].mxu0 %vm264_vm2, %v4566_v29  ;;  %v5493_v57 = vpop.f32.mrb[119].mxu1  ;;  %5809 = vmatmul.mubr.msk.f32.gmra.mrb[224].mxu1 %vm264_vm2, %v4618_v47 }
 0x1d4   : > { %5734 = vmatprep.mubr.msk.f32.mxu0 %vm6054_vm1, %v6053_v1  ;;  %5811 = vmatprep.mubr.msk.f32.mxu1 %vm6054_vm1, %v6053_v1  ;;  %v4624_v20 = vld [vmem:[%s6115_s23 + $0x798] sm:$0xff] }
 0x1d5   : > { %v7224_v56 = vadd.f32 %v1982_v52, %v1749_v35  ;;  %v4572_v35 = vld [vmem:[%s6115_s23 + $0x6d0] sm:$0xff] }
 0x1d6   : > { %v1666_v8 = vpop.f32.mrb[120].mxu0  ;;  %v1987_v0 = vpop.f32.mrb[120].mxu1 }
 0x1d7   : > { %v1750_v48 = vadd.f32 %v1666_v8, %v6952_v14  ;;  %v5419_v28 = vpop.f32.mrb[121].mxu0  ;;  %5735 = vmatmul.mubr.msk.f32.gmra.mrb[226].mxu0 %vm264_vm2, %v4567_v40  ;;  %v5496_v7 = vpop.f32.mrb[121].mxu1  ;;  %5812 = vmatmul.mubr.msk.f32.gmra.mrb[226].mxu1 %vm264_vm2, %v4619_v43 }
 0x1d8   : > { %5737 = vmatprep.mubr.msk.f32.mxu0 %vm6054_vm1, %v6053_v1  ;;  %5814 = vmatprep.mubr.msk.f32.mxu1 %vm6054_vm1, %v6053_v1  ;;  %v4625_v28 = vld [vmem:[%s6115_s23 + $0x7a0] sm:$0xff] }
 0x1d9   : > { %v7235_v5 = vadd.f32 %v1987_v0, %v1750_v48  ;;  %v4573_v48 = vld [vmem:[%s6115_s23 + $0x6d8] sm:$0xff] }
 0x1da   : > { %v1671_v18 = vpop.f32.mrb[122].mxu0  ;;  %v1992_v14 = vpop.f32.mrb[122].mxu1 }
 0x1db   : > { %v1751_v60 = vadd.f32 %v1671_v18, %v6963_v58  ;;  %v5422_v36 = vpop.f32.mrb[123].mxu0  ;;  %5738 = vmatmul.mubr.msk.f32.gmra.mrb[228].mxu0 %vm264_vm2, %v4568_v50  ;;  %v5499_v19 = vpop.f32.mrb[123].mxu1  ;;  %5815 = vmatmul.mubr.msk.f32.gmra.mrb[228].mxu1 %vm264_vm2, %v4620_v55 }
 0x1dc   : > { %5740 = vmatprep.mubr.msk.f32.mxu0 %vm6054_vm1, %v6053_v1  ;;  %5817 = vmatprep.mubr.msk.f32.mxu1 %vm6054_vm1, %v6053_v1  ;;  %v4626_v36 = vld [vmem:[%s6115_s23 + $0x7a8] sm:$0xff] }
 0x1dd   : > { %v7246_v24 = vadd.f32 %v1992_v14, %v1751_v60  ;;  %v4574_v60 = vld [vmem:[%s6115_s23 + $0x6e0] sm:$0xff] }
 0x1de   : > { %v1676_v27 = vpop.f32.mrb[124].mxu0  ;;  %v1997_v58 = vpop.f32.mrb[124].mxu1 }
 0x1df   : > { %v1752_v10 = vadd.f32 %v1676_v27, %v6974_v2  ;;  %v5425_v45 = vpop.f32.mrb[125].mxu0  ;;  %5741 = vmatmul.mubr.msk.f32.gmra.mrb[230].mxu0 %vm264_vm2, %v4569_v63  ;;  %v5502_v31 = vpop.f32.mrb[125].mxu1  ;;  %5818 = vmatmul.mubr.msk.f32.gmra.mrb[230].mxu1 %vm264_vm2, %v4621_v6 }
 0x1e0   : > { %5743 = vmatprep.mubr.msk.f32.mxu0 %vm6054_vm1, %v6053_v1  ;;  %5820 = vmatprep.mubr.msk.f32.mxu1 %vm6054_vm1, %v6053_v1  ;;  %v4627_v45 = vld [vmem:[%s6115_s23 + $0x7b0] sm:$0xff] }
 0x1e1   : > { %v7257_v34 = vadd.f32 %v1997_v58, %v1752_v10  ;;  %v4575_v10 = vld [vmem:[%s6115_s23 + $0x6e8] sm:$0xff] }
 0x1e2   : > { %v1681_v17 = vpop.f32.mrb[126].mxu0  ;;  %v2002_v2 = vpop.f32.mrb[126].mxu1 }
 0x1e3   : > { %v1753_v21 = vadd.f32 %v1681_v17, %v6985_v9  ;;  %v5428_v53 = vpop.f32.mrb[127].mxu0  ;;  %5744 = vmatmul.mubr.msk.f32.gmra.mrb[232].mxu0 %vm264_vm2, %v4570_v13  ;;  %v5505_v41 = vpop.f32.mrb[127].mxu1  ;;  %5821 = vmatmul.mubr.msk.f32.gmra.mrb[232].mxu1 %vm264_vm2, %v4622_v38 }
 0x1e4   : > { %5746 = vmatprep.mubr.msk.f32.mxu0 %vm6054_vm1, %v6053_v1  ;;  %5823 = vmatprep.mubr.msk.f32.mxu1 %vm6054_vm1, %v6053_v1  ;;  %v4628_v53 = vld [vmem:[%s6115_s23 + $0x7b8] sm:$0xff] }
 0x1e5   : > { %v7268_v46 = vadd.f32 %v2002_v2, %v1753_v21  ;;  %v4576_v21 = vld [vmem:[%s6115_s23 + $0x6f0] sm:$0xff] }
 0x1e6   : > { %v1686_v29 = vpop.f32.mrb[128].mxu0  ;;  %v2007_v9 = vpop.f32.mrb[128].mxu1 }
 0x1e7   : > { %v1754_v47 = vadd.f32 %v1686_v29, %v6996_v16  ;;  %v5431_v62 = vpop.f32.mrb[129].mxu0  ;;  %5747 = vmatmul.mubr.msk.f32.gmra.mrb[234].mxu0 %vm264_vm2, %v4571_v25  ;;  %v5508_v52 = vpop.f32.mrb[129].mxu1  ;;  %5824 = vmatmul.mubr.msk.f32.gmra.mrb[234].mxu1 %vm264_vm2, %v4623_v12 }
 0x1e8   : > { %5749 = vmatprep.mubr.msk.f32.mxu0 %vm6054_vm1, %v6053_v1  ;;  %5826 = vmatprep.mubr.msk.f32.mxu1 %vm6054_vm1, %v6053_v1  ;;  %v4629_v62 = vld [vmem:[%s6115_s23 + $0x7c0] sm:$0xff] }
 0x1e9   : > { %v7279_v57 = vadd.f32 %v2007_v9, %v1754_v47  ;;  %v4577_v47 = vld [vmem:[%s6115_s23 + $0x6f8] sm:$0xff] }
 0x1ea   : > { %v1691_v40 = vpop.f32.mrb[130].mxu0  ;;  %v2012_v16 = vpop.f32.mrb[130].mxu1 }
 0x1eb   : > { %v1755_v43 = vadd.f32 %v1691_v40, %v7007_v23  ;;  %v5434_v8 = vpop.f32.mrb[131].mxu0  ;;  %5750 = vmatmul.mubr.msk.f32.gmra.mrb[236].mxu0 %vm264_vm2, %v4572_v35  ;;  %v5511_v0 = vpop.f32.mrb[131].mxu1  ;;  %5827 = vmatmul.mubr.msk.f32.gmra.mrb[236].mxu1 %vm264_vm2, %v4624_v20 }
 0x1ec   : > { %5752 = vmatprep.mubr.msk.f32.mxu0 %vm6054_vm1, %v6053_v1  ;;  %5829 = vmatprep.mubr.msk.f32.mxu1 %vm6054_vm1, %v6053_v1  ;;  %v4630_v8 = vld [vmem:[%s6115_s23 + $0x7c8] sm:$0xff] }
 0x1ed   : > { %v7290_v7 = vadd.f32 %v2012_v16, %v1755_v43  ;;  %v4578_v43 = vld [vmem:[%s6115_s23 + $0x700] sm:$0xff] }
 0x1ee   : > { %v1696_v50 = vpop.f32.mrb[132].mxu0  ;;  %v2017_v23 = vpop.f32.mrb[132].mxu1 }
 0x1ef   : > { %v1756_v55 = vadd.f32 %v1696_v50, %v7018_v30  ;;  %v5437_v18 = vpop.f32.mrb[133].mxu0  ;;  %5753 = vmatmul.mubr.msk.f32.gmra.mrb[238].mxu0 %vm264_vm2, %v4573_v48  ;;  %v5514_v14 = vpop.f32.mrb[133].mxu1  ;;  %5830 = vmatmul.mubr.msk.f32.gmra.mrb[238].mxu1 %vm264_vm2, %v4625_v28 }
 0x1f0   : > { %5755 = vmatprep.mubr.msk.f32.mxu0 %vm6054_vm1, %v6053_v1  ;;  %5832 = vmatprep.mubr.msk.f32.mxu1 %vm6054_vm1, %v6053_v1  ;;  %v4710_v18 = vld [vmem:[%s6115_s23 + $0x898] sm:$0xff] }
 0x1f1   : > { %v7301_v19 = vadd.f32 %v2017_v23, %v1756_v55  ;;  %v4658_v55 = vld [vmem:[%s6115_s23 + $0x7d0] sm:$0xff] }
 0x1f2   : > { %v1701_v63 = vpop.f32.mrb[134].mxu0  ;;  %v2022_v30 = vpop.f32.mrb[134].mxu1 }
 0x1f3   : > { %v1757_v6 = vadd.f32 %v1701_v63, %v7029_v37  ;;  %v5440_v27 = vpop.f32.mrb[135].mxu0  ;;  %5756 = vmatmul.mubr.msk.f32.gmra.mrb[240].mxu0 %vm264_vm2, %v4574_v60  ;;  %v5517_v58 = vpop.f32.mrb[135].mxu1  ;;  %5833 = vmatmul.mubr.msk.f32.gmra.mrb[240].mxu1 %vm264_vm2, %v4626_v36 }
 0x1f4   : > { %5758 = vmatprep.mubr.msk.f32.mxu0 %vm6054_vm1, %v6053_v1  ;;  %5835 = vmatprep.mubr.msk.f32.mxu1 %vm6054_vm1, %v6053_v1  ;;  %v4711_v27 = vld [vmem:[%s6115_s23 + $0x8a0] sm:$0xff] }
 0x1f5   : > { %v7312_v31 = vadd.f32 %v2022_v30, %v1757_v6  ;;  %v4659_v6 = vld [vmem:[%s6115_s23 + $0x7d8] sm:$0xff] }
 0x1f6   : > { %v1706_v13 = vpop.f32.mrb[136].mxu0  ;;  %v2027_v37 = vpop.f32.mrb[136].mxu1 }
 0x1f7   : > { %v1758_v38 = vadd.f32 %v1706_v13, %v7040_v44  ;;  %v5443_v17 = vpop.f32.mrb[137].mxu0  ;;  %5759 = vmatmul.mubr.msk.f32.gmra.mrb[242].mxu0 %vm264_vm2, %v4575_v10  ;;  %v5520_v2 = vpop.f32.mrb[137].mxu1  ;;  %5836 = vmatmul.mubr.msk.f32.gmra.mrb[242].mxu1 %vm264_vm2, %v4627_v45 }
 0x1f8   : > { %5761 = vmatprep.mubr.msk.f32.mxu0 %vm6054_vm1, %v6053_v1  ;;  %5838 = vmatprep.mubr.msk.f32.mxu1 %vm6054_vm1, %v6053_v1  ;;  %v4712_v17 = vld [vmem:[%s6115_s23 + $0x8a8] sm:$0xff] }
 0x1f9   : > { %v7323_v41 = vadd.f32 %v2027_v37, %v1758_v38  ;;  %v4660_v38 = vld [vmem:[%s6115_s23 + $0x7e0] sm:$0xff] }
 0x1fa   : > { %v1711_v25 = vpop.f32.mrb[138].mxu0  ;;  %v2032_v44 = vpop.f32.mrb[138].mxu1 }
 0x1fb   : > { %v1759_v12 = vadd.f32 %v1711_v25, %v7051_v51  ;;  %v5446_v29 = vpop.f32.mrb[139].mxu0  ;;  %5762 = vmatmul.mubr.msk.f32.gmra.mrb[244].mxu0 %vm264_vm2, %v4576_v21  ;;  %v5523_v9 = vpop.f32.mrb[139].mxu1  ;;  %5839 = vmatmul.mubr.msk.f32.gmra.mrb[244].mxu1 %vm264_vm2, %v4628_v53 }
 0x1fc   : > { %5764 = vmatprep.mubr.msk.f32.mxu0 %vm6054_vm1, %v6053_v1  ;;  %5841 = vmatprep.mubr.msk.f32.mxu1 %vm6054_vm1, %v6053_v1  ;;  %v4713_v29 = vld [vmem:[%s6115_s23 + $0x8b0] sm:$0xff] }
 0x1fd   : > { %v7334_v52 = vadd.f32 %v2032_v44, %v1759_v12  ;;  %v4661_v12 = vld [vmem:[%s6115_s23 + $0x7e8] sm:$0xff] }
 0x1fe   : > { %v1716_v35 = vpop.f32.mrb[140].mxu0  ;;  %v2037_v51 = vpop.f32.mrb[140].mxu1 }
 0x1ff   : > { %v1760_v20 = vadd.f32 %v1716_v35, %v7062_v59  ;;  %v5449_v40 = vpop.f32.mrb[141].mxu0  ;;  %5765 = vmatmul.mubr.msk.f32.gmra.mrb[246].mxu0 %vm264_vm2, %v4577_v47  ;;  %v5526_v16 = vpop.f32.mrb[141].mxu1  ;;  %5842 = vmatmul.mubr.msk.f32.gmra.mrb[246].mxu1 %vm264_vm2, %v4629_v62 }
 0x200   : > { %5767 = vmatprep.mubr.msk.f32.mxu0 %vm6054_vm1, %v6053_v1  ;;  %5844 = vmatprep.mubr.msk.f32.mxu1 %vm6054_vm1, %v6053_v1  ;;  %v4714_v40 = vld [vmem:[%s6115_s23 + $0x8b8] sm:$0xff] }
 0x201   : > { %v7345_v0 = vadd.f32 %v2037_v51, %v1760_v20  ;;  %v4662_v20 = vld [vmem:[%s6115_s23 + $0x7f0] sm:$0xff] }
 0x202   : > { %v1721_v48 = vpop.f32.mrb[142].mxu0  ;;  %v2042_v59 = vpop.f32.mrb[142].mxu1 }
 0x203   : > { %v1761_v28 = vadd.f32 %v1721_v48, %v7073_v4  ;;  %v5452_v50 = vpop.f32.mrb[143].mxu0  ;;  %5768 = vmatmul.mubr.msk.f32.gmra.mrb[248].mxu0 %vm264_vm2, %v4578_v43  ;;  %v5529_v23 = vpop.f32.mrb[143].mxu1  ;;  %5845 = vmatmul.mubr.msk.f32.gmra.mrb[248].mxu1 %vm264_vm2, %v4630_v8 }
 0x204   : > { %5849 = vmatprep.mubr.msk.f32.mxu0 %vm6054_vm1, %v6053_v1  ;;  %5926 = vmatprep.mubr.msk.f32.mxu1 %vm6054_vm1, %v6053_v1  ;;  %v4715_v50 = vld [vmem:[%s6115_s23 + $0x8c0] sm:$0xff] }
 0x205   : > { %v7356_v14 = vadd.f32 %v2042_v59, %v1761_v28  ;;  %v4663_v28 = vld [vmem:[%s6115_s23 + $0x7f8] sm:$0xff] }
 0x206   : > { %v1726_v60 = vpop.f32.mrb[144].mxu0  ;;  %v2047_v4 = vpop.f32.mrb[144].mxu1 }
 0x207   : > { %v1762_v36 = vadd.f32 %v1726_v60, %v7088_v32  ;;  %v5455_v63 = vpop.f32.mrb[145].mxu0  ;;  %5850 = vmatmul.mubr.msk.f32.vlgmr.msra.gmra.mrb[250].mxu0 %vm264_vm2, %v4658_v55  ;;  %v5532_v30 = vpop.f32.mrb[145].mxu1  ;;  %5927 = vmatmul.mubr.msk.f32.vlgmr.msra.gmra.mrb[250].mxu1 %vm264_vm2, %v4710_v18 }
 0x208   : > { %5852 = vmatprep.mubr.msk.f32.mxu0 %vm6054_vm1, %v6053_v1  ;;  %5929 = vmatprep.mubr.msk.f32.mxu1 %vm6054_vm1, %v6053_v1  ;;  %v4716_v63 = vld [vmem:[%s6115_s23 + $0x8c8] sm:$0xff] }
 0x209   : > { %v7367_v58 = vadd.f32 %v2047_v4, %v1762_v36  ;;  %v4664_v36 = vld [vmem:[%s6115_s23 + $0x800] sm:$0xff] }
 0x20a   : > { %v1731_v10 = vpop.f32.mrb[146].mxu0  ;;  %v2052_v32 = vpop.f32.mrb[146].mxu1 }
 0x20b   : > { %v1763_v45 = vadd.f32 %v1731_v10, %v7103_v42  ;;  %v5458_v13 = vpop.f32.mrb[147].mxu0  ;;  %5853 = vmatmul.mubr.msk.f32.gmra.mrb[252].mxu0 %vm264_vm2, %v4659_v6  ;;  %v5535_v37 = vpop.f32.mrb[147].mxu1  ;;  %5930 = vmatmul.mubr.msk.f32.gmra.mrb[252].mxu1 %vm264_vm2, %v4711_v27 }
 0x20c   : > { %5855 = vmatprep.mubr.msk.f32.mxu0 %vm6054_vm1, %v6053_v1  ;;  %5932 = vmatprep.mubr.msk.f32.mxu1 %vm6054_vm1, %v6053_v1  ;;  %v4717_v13 = vld [vmem:[%s6115_s23 + $0x8d0] sm:$0xff] }
 0x20d   : > { %v7378_v2 = vadd.f32 %v2052_v32, %v1763_v45  ;;  %v4665_v45 = vld [vmem:[%s6115_s23 + $0x808] sm:$0xff] }
 0x20e   : > { %v1736_v21 = vpop.f32.mrb[148].mxu0  ;;  %v2057_v42 = vpop.f32.mrb[148].mxu1 }
 0x20f   : > { %v1764_v53 = vadd.f32 %v1736_v21, %v7114_v54  ;;  %v5461_v25 = vpop.f32.mrb[149].mxu0  ;;  %5856 = vmatmul.mubr.msk.f32.gmra.mrb[254].mxu0 %vm264_vm2, %v4660_v38  ;;  %v5538_v44 = vpop.f32.mrb[149].mxu1  ;;  %5933 = vmatmul.mubr.msk.f32.gmra.mrb[254].mxu1 %vm264_vm2, %v4712_v17 }
 0x210   : > { %5858 = vmatprep.mubr.msk.f32.mxu0 %vm6054_vm1, %v6053_v1  ;;  %5935 = vmatprep.mubr.msk.f32.mxu1 %vm6054_vm1, %v6053_v1  ;;  %v4718_v25 = vld [vmem:[%s6115_s23 + $0x8d8] sm:$0xff] }
 0x211   : > { %v7389_v9 = vadd.f32 %v2057_v42, %v1764_v53  ;;  %v4666_v53 = vld [vmem:[%s6115_s23 + $0x810] sm:$0xff] }
 0x212   : > { %v2258_v47 = vpop.f32.mrb[150].mxu0  ;;  %v2579_v54 = vpop.f32.mrb[150].mxu1 }
 0x213   : > { %v2382_v62 = vadd.f32 %v2258_v47, %v7125_v3  ;;  %v5543_v35 = vpop.f32.mrb[151].mxu0  ;;  %5859 = vmatmul.mubr.msk.f32.gmra.mrb[0].mxu0 %vm264_vm2, %v4661_v12  ;;  %v5620_v51 = vpop.f32.mrb[151].mxu1  ;;  %5936 = vmatmul.mubr.msk.f32.gmra.mrb[0].mxu1 %vm264_vm2, %v4713_v29 }
 0x214   : > { %5861 = vmatprep.mubr.msk.f32.mxu0 %vm6054_vm1, %v6053_v1  ;;  %5938 = vmatprep.mubr.msk.f32.mxu1 %vm6054_vm1, %v6053_v1  ;;  %v4719_v35 = vld [vmem:[%s6115_s23 + $0x8e0] sm:$0xff] }
 0x215   : > { %v7400_v16 = vadd.f32 %v2579_v54, %v2382_v62  ;;  %v4667_v62 = vld [vmem:[%s6115_s23 + $0x818] sm:$0xff] }
 0x216   : > { %v2263_v43 = vpop.f32.mrb[152].mxu0  ;;  %v2584_v3 = vpop.f32.mrb[152].mxu1 }
 0x217   : > { %v2383_v8 = vadd.f32 %v2263_v43, %v7136_v15  ;;  %v5546_v48 = vpop.f32.mrb[153].mxu0  ;;  %5862 = vmatmul.mubr.msk.f32.gmra.mrb[2].mxu0 %vm264_vm2, %v4662_v20  ;;  %v5623_v59 = vpop.f32.mrb[153].mxu1  ;;  %5939 = vmatmul.mubr.msk.f32.gmra.mrb[2].mxu1 %vm264_vm2, %v4714_v40 }
 0x218   : > { %5864 = vmatprep.mubr.msk.f32.mxu0 %vm6054_vm1, %v6053_v1  ;;  %5941 = vmatprep.mubr.msk.f32.mxu1 %vm6054_vm1, %v6053_v1  ;;  %v4720_v48 = vld [vmem:[%s6115_s23 + $0x8e8] sm:$0xff] }
 0x219   : > { %v7411_v23 = vadd.f32 %v2584_v3, %v2383_v8  ;;  %v4668_v8 = vld [vmem:[%s6115_s23 + $0x820] sm:$0xff] }
 0x21a   : > { %v2268_v55 = vpop.f32.mrb[154].mxu0  ;;  %v2589_v15 = vpop.f32.mrb[154].mxu1 }
 0x21b   : > { %v2384_v18 = vadd.f32 %v2268_v55, %v7147_v26  ;;  %v5549_v60 = vpop.f32.mrb[155].mxu0  ;;  %5865 = vmatmul.mubr.msk.f32.gmra.mrb[4].mxu0 %vm264_vm2, %v4663_v28  ;;  %v5626_v4 = vpop.f32.mrb[155].mxu1  ;;  %5942 = vmatmul.mubr.msk.f32.gmra.mrb[4].mxu1 %vm264_vm2, %v4715_v50 }
 0x21c   : > { %5867 = vmatprep.mubr.msk.f32.mxu0 %vm6054_vm1, %v6053_v1  ;;  %5944 = vmatprep.mubr.msk.f32.mxu1 %vm6054_vm1, %v6053_v1  ;;  %v4721_v60 = vld [vmem:[%s6115_s23 + $0x8f0] sm:$0xff] }
 0x21d   : > { %v7422_v30 = vadd.f32 %v2589_v15, %v2384_v18  ;;  %v4669_v18 = vld [vmem:[%s6115_s23 + $0x828] sm:$0xff] }
 0x21e   : > { %v2273_v6 = vpop.f32.mrb[156].mxu0  ;;  %v2594_v26 = vpop.f32.mrb[156].mxu1 }
 0x21f   : > { %v2385_v27 = vadd.f32 %v2273_v6, %v7158_v39  ;;  %v5552_v10 = vpop.f32.mrb[157].mxu0  ;;  %5868 = vmatmul.mubr.msk.f32.gmra.mrb[6].mxu0 %vm264_vm2, %v4664_v36  ;;  %v5629_v32 = vpop.f32.mrb[157].mxu1  ;;  %5945 = vmatmul.mubr.msk.f32.gmra.mrb[6].mxu1 %vm264_vm2, %v4716_v63 }
 0x220   : > { %5870 = vmatprep.mubr.msk.f32.mxu0 %vm6054_vm1, %v6053_v1  ;;  %5947 = vmatprep.mubr.msk.f32.mxu1 %vm6054_vm1, %v6053_v1  ;;  %v4722_v10 = vld [vmem:[%s6115_s23 + $0x8f8] sm:$0xff] }
 0x221   : > { %v7433_v37 = vadd.f32 %v2594_v26, %v2385_v27  ;;  %v4670_v27 = vld [vmem:[%s6115_s23 + $0x830] sm:$0xff] }
 0x222   : > { %v2278_v38 = vpop.f32.mrb[158].mxu0  ;;  %v2599_v39 = vpop.f32.mrb[158].mxu1 }
 0x223   : > { %v2386_v17 = vadd.f32 %v2278_v38, %v7169_v49  ;;  %v5555_v21 = vpop.f32.mrb[159].mxu0  ;;  %5871 = vmatmul.mubr.msk.f32.gmra.mrb[8].mxu0 %vm264_vm2, %v4665_v45  ;;  %v5632_v42 = vpop.f32.mrb[159].mxu1  ;;  %5948 = vmatmul.mubr.msk.f32.gmra.mrb[8].mxu1 %vm264_vm2, %v4717_v13 }
 0x224   : > { %5873 = vmatprep.mubr.msk.f32.mxu0 %vm6054_vm1, %v6053_v1  ;;  %5950 = vmatprep.mubr.msk.f32.mxu1 %vm6054_vm1, %v6053_v1  ;;  %v4723_v21 = vld [vmem:[%s6115_s23 + $0x900] sm:$0xff] }
 0x225   : > { %v7444_v44 = vadd.f32 %v2599_v39, %v2386_v17  ;;  %v4671_v17 = vld [vmem:[%s6115_s23 + $0x838] sm:$0xff] }
 0x226   : > { %v2283_v12 = vpop.f32.mrb[160].mxu0  ;;  %v2604_v49 = vpop.f32.mrb[160].mxu1 }
 0x227   : > { %v2387_v29 = vadd.f32 %v2283_v12, %v7180_v61  ;;  %v5558_v47 = vpop.f32.mrb[161].mxu0  ;;  %5874 = vmatmul.mubr.msk.f32.gmra.mrb[10].mxu0 %vm264_vm2, %v4666_v53  ;;  %v5635_v54 = vpop.f32.mrb[161].mxu1  ;;  %5951 = vmatmul.mubr.msk.f32.gmra.mrb[10].mxu1 %vm264_vm2, %v4718_v25 }
 0x228   : > { %5876 = vmatprep.mubr.msk.f32.mxu0 %vm6054_vm1, %v6053_v1  ;;  %5953 = vmatprep.mubr.msk.f32.mxu1 %vm6054_vm1, %v6053_v1  ;;  %v4724_v47 = vld [vmem:[%s6115_s23 + $0x908] sm:$0xff] }
 0x229   : > { %v7455_v51 = vadd.f32 %v2604_v49, %v2387_v29  ;;  %v4672_v29 = vld [vmem:[%s6115_s23 + $0x840] sm:$0xff] }
 0x22a   : > { %v2288_v20 = vpop.f32.mrb[162].mxu0  ;;  %v2609_v61 = vpop.f32.mrb[162].mxu1 }
 0x22b   : > { %v2388_v40 = vadd.f32 %v2288_v20, %v7191_v11  ;;  %v5561_v43 = vpop.f32.mrb[163].mxu0  ;;  %5877 = vmatmul.mubr.msk.f32.gmra.mrb[12].mxu0 %vm264_vm2, %v4667_v62  ;;  %v5638_v3 = vpop.f32.mrb[163].mxu1  ;;  %5954 = vmatmul.mubr.msk.f32.gmra.mrb[12].mxu1 %vm264_vm2, %v4719_v35 }
 0x22c   : > { %5879 = vmatprep.mubr.msk.f32.mxu0 %vm6054_vm1, %v6053_v1  ;;  %5956 = vmatprep.mubr.msk.f32.mxu1 %vm6054_vm1, %v6053_v1  ;;  %v4725_v43 = vld [vmem:[%s6115_s23 + $0x910] sm:$0xff] }
 0x22d   : > { %v7466_v59 = vadd.f32 %v2609_v61, %v2388_v40  ;;  %v4673_v40 = vld [vmem:[%s6115_s23 + $0x848] sm:$0xff] }
 0x22e   : > { %v2293_v28 = vpop.f32.mrb[164].mxu0  ;;  %v2614_v11 = vpop.f32.mrb[164].mxu1 }
 0x22f   : > { %v2389_v50 = vadd.f32 %v2293_v28, %v7202_v22  ;;  %v5564_v55 = vpop.f32.mrb[165].mxu0  ;;  %5880 = vmatmul.mubr.msk.f32.gmra.mrb[14].mxu0 %vm264_vm2, %v4668_v8  ;;  %v5641_v15 = vpop.f32.mrb[165].mxu1  ;;  %5957 = vmatmul.mubr.msk.f32.gmra.mrb[14].mxu1 %vm264_vm2, %v4720_v48 }
 0x230   : > { %5882 = vmatprep.mubr.msk.f32.mxu0 %vm6054_vm1, %v6053_v1  ;;  %5959 = vmatprep.mubr.msk.f32.mxu1 %vm6054_vm1, %v6053_v1  ;;  %v4726_v55 = vld [vmem:[%s6115_s23 + $0x918] sm:$0xff] }
 0x231   : > { %v7477_v4 = vadd.f32 %v2614_v11, %v2389_v50  ;;  %v4674_v50 = vld [vmem:[%s6115_s23 + $0x850] sm:$0xff] }
 0x232   : > { %v2298_v36 = vpop.f32.mrb[166].mxu0  ;;  %v2619_v22 = vpop.f32.mrb[166].mxu1 }
 0x233   : > { %v2390_v63 = vadd.f32 %v2298_v36, %v7213_v33  ;;  %v5567_v6 = vpop.f32.mrb[167].mxu0  ;;  %5883 = vmatmul.mubr.msk.f32.gmra.mrb[16].mxu0 %vm264_vm2, %v4669_v18  ;;  %v5644_v26 = vpop.f32.mrb[167].mxu1  ;;  %5960 = vmatmul.mubr.msk.f32.gmra.mrb[16].mxu1 %vm264_vm2, %v4721_v60 }
 0x234   : > { %5885 = vmatprep.mubr.msk.f32.mxu0 %vm6054_vm1, %v6053_v1  ;;  %5962 = vmatprep.mubr.msk.f32.mxu1 %vm6054_vm1, %v6053_v1  ;;  %v4727_v6 = vld [vmem:[%s6115_s23 + $0x920] sm:$0xff] }
 0x235   : > { %v7488_v32 = vadd.f32 %v2619_v22, %v2390_v63  ;;  %v4675_v63 = vld [vmem:[%s6115_s23 + $0x858] sm:$0xff] }
 0x236   : > { %v2303_v45 = vpop.f32.mrb[168].mxu0  ;;  %v2624_v33 = vpop.f32.mrb[168].mxu1 }
 0x237   : > { %v2391_v13 = vadd.f32 %v2303_v45, %v7224_v56  ;;  %v5570_v38 = vpop.f32.mrb[169].mxu0  ;;  %5886 = vmatmul.mubr.msk.f32.gmra.mrb[18].mxu0 %vm264_vm2, %v4670_v27  ;;  %v5647_v39 = vpop.f32.mrb[169].mxu1  ;;  %5963 = vmatmul.mubr.msk.f32.gmra.mrb[18].mxu1 %vm264_vm2, %v4722_v10 }
 0x238   : > { %5888 = vmatprep.mubr.msk.f32.mxu0 %vm6054_vm1, %v6053_v1  ;;  %5965 = vmatprep.mubr.msk.f32.mxu1 %vm6054_vm1, %v6053_v1  ;;  %v4728_v38 = vld [vmem:[%s6115_s23 + $0x928] sm:$0xff] }
 0x239   : > { %v7499_v42 = vadd.f32 %v2624_v33, %v2391_v13  ;;  %v4676_v13 = vld [vmem:[%s6115_s23 + $0x860] sm:$0xff] }
 0x23a   : > { %v2308_v53 = vpop.f32.mrb[170].mxu0  ;;  %v2629_v56 = vpop.f32.mrb[170].mxu1 }
 0x23b   : > { %v2392_v25 = vadd.f32 %v2308_v53, %v7235_v5  ;;  %v5573_v12 = vpop.f32.mrb[171].mxu0  ;;  %5889 = vmatmul.mubr.msk.f32.gmra.mrb[20].mxu0 %vm264_vm2, %v4671_v17  ;;  %v5650_v49 = vpop.f32.mrb[171].mxu1  ;;  %5966 = vmatmul.mubr.msk.f32.gmra.mrb[20].mxu1 %vm264_vm2, %v4723_v21 }
 0x23c   : > { %5891 = vmatprep.mubr.msk.f32.mxu0 %vm6054_vm1, %v6053_v1  ;;  %5968 = vmatprep.mubr.msk.f32.mxu1 %vm6054_vm1, %v6053_v1  ;;  %v4729_v12 = vld [vmem:[%s6115_s23 + $0x930] sm:$0xff] }
 0x23d   : > { %v7510_v54 = vadd.f32 %v2629_v56, %v2392_v25  ;;  %v4677_v25 = vld [vmem:[%s6115_s23 + $0x868] sm:$0xff] }
 0x23e   : > { %v2313_v62 = vpop.f32.mrb[172].mxu0  ;;  %v2634_v5 = vpop.f32.mrb[172].mxu1 }
 0x23f   : > { %v2393_v35 = vadd.f32 %v2313_v62, %v7246_v24  ;;  %v5576_v20 = vpop.f32.mrb[173].mxu0  ;;  %5892 = vmatmul.mubr.msk.f32.gmra.mrb[22].mxu0 %vm264_vm2, %v4672_v29  ;;  %v5653_v61 = vpop.f32.mrb[173].mxu1  ;;  %5969 = vmatmul.mubr.msk.f32.gmra.mrb[22].mxu1 %vm264_vm2, %v4724_v47 }
 0x240   : > { %5894 = vmatprep.mubr.msk.f32.mxu0 %vm6054_vm1, %v6053_v1  ;;  %5971 = vmatprep.mubr.msk.f32.mxu1 %vm6054_vm1, %v6053_v1  ;;  %v4730_v20 = vld [vmem:[%s6115_s23 + $0x938] sm:$0xff] }
 0x241   : > { %v7521_v3 = vadd.f32 %v2634_v5, %v2393_v35  ;;  %v4678_v35 = vld [vmem:[%s6115_s23 + $0x870] sm:$0xff] }
 0x242   : > { %v2318_v8 = vpop.f32.mrb[174].mxu0  ;;  %v2639_v24 = vpop.f32.mrb[174].mxu1 }
 0x243   : > { %v2394_v48 = vadd.f32 %v2318_v8, %v7257_v34  ;;  %v5579_v28 = vpop.f32.mrb[175].mxu0  ;;  %5895 = vmatmul.mubr.msk.f32.gmra.mrb[24].mxu0 %vm264_vm2, %v4673_v40  ;;  %v5656_v11 = vpop.f32.mrb[175].mxu1  ;;  %5972 = vmatmul.mubr.msk.f32.gmra.mrb[24].mxu1 %vm264_vm2, %v4725_v43 }
 0x244   : > { %5897 = vmatprep.mubr.msk.f32.mxu0 %vm6054_vm1, %v6053_v1  ;;  %5974 = vmatprep.mubr.msk.f32.mxu1 %vm6054_vm1, %v6053_v1  ;;  %v4731_v28 = vld [vmem:[%s6115_s23 + $0x940] sm:$0xff] }
 0x245   : > { %v7532_v15 = vadd.f32 %v2639_v24, %v2394_v48  ;;  %v4679_v48 = vld [vmem:[%s6115_s23 + $0x878] sm:$0xff] }
 0x246   : > { %v2323_v18 = vpop.f32.mrb[176].mxu0  ;;  %v2644_v34 = vpop.f32.mrb[176].mxu1 }
 0x247   : > { %v2395_v60 = vadd.f32 %v2323_v18, %v7268_v46  ;;  %v5582_v36 = vpop.f32.mrb[177].mxu0  ;;  %5898 = vmatmul.mubr.msk.f32.gmra.mrb[26].mxu0 %vm264_vm2, %v4674_v50  ;;  %v5659_v22 = vpop.f32.mrb[177].mxu1  ;;  %5975 = vmatmul.mubr.msk.f32.gmra.mrb[26].mxu1 %vm264_vm2, %v4726_v55 }
 0x248   : > { %5900 = vmatprep.mubr.msk.f32.mxu0 %vm6054_vm1, %v6053_v1  ;;  %5977 = vmatprep.mubr.msk.f32.mxu1 %vm6054_vm1, %v6053_v1  ;;  %v4732_v36 = vld [vmem:[%s6115_s23 + $0x948] sm:$0xff] }
 0x249   : > { %v7543_v26 = vadd.f32 %v2644_v34, %v2395_v60  ;;  %v4680_v60 = vld [vmem:[%s6115_s23 + $0x880] sm:$0xff] }
 0x24a   : > { %v2328_v27 = vpop.f32.mrb[178].mxu0  ;;  %v2649_v46 = vpop.f32.mrb[178].mxu1 }
 0x24b   : > { %v2396_v10 = vadd.f32 %v2328_v27, %v7279_v57  ;;  %v5585_v45 = vpop.f32.mrb[179].mxu0  ;;  %5901 = vmatmul.mubr.msk.f32.gmra.mrb[28].mxu0 %vm264_vm2, %v4675_v63  ;;  %v5662_v33 = vpop.f32.mrb[179].mxu1  ;;  %5978 = vmatmul.mubr.msk.f32.gmra.mrb[28].mxu1 %vm264_vm2, %v4727_v6 }
 0x24c   : > { %5903 = vmatprep.mubr.msk.f32.mxu0 %vm6054_vm1, %v6053_v1  ;;  %5980 = vmatprep.mubr.msk.f32.mxu1 %vm6054_vm1, %v6053_v1  ;;  %v4733_v45 = vld [vmem:[%s6115_s23 + $0x950] sm:$0xff] }
 0x24d   : > { %v7554_v39 = vadd.f32 %v2649_v46, %v2396_v10  ;;  %v4681_v10 = vld [vmem:[%s6115_s23 + $0x888] sm:$0xff] }
 0x24e   : > { %v2333_v17 = vpop.f32.mrb[180].mxu0  ;;  %v2654_v57 = vpop.f32.mrb[180].mxu1 }
 0x24f   : > { %v2397_v21 = vadd.f32 %v2333_v17, %v7290_v7  ;;  %v5588_v53 = vpop.f32.mrb[181].mxu0  ;;  %5904 = vmatmul.mubr.msk.f32.gmra.mrb[30].mxu0 %vm264_vm2, %v4676_v13  ;;  %v5665_v56 = vpop.f32.mrb[181].mxu1  ;;  %5981 = vmatmul.mubr.msk.f32.gmra.mrb[30].mxu1 %vm264_vm2, %v4728_v38 }
 0x250   : > { %5906 = vmatprep.mubr.msk.f32.mxu0 %vm6054_vm1, %v6053_v1  ;;  %5983 = vmatprep.mubr.msk.f32.mxu1 %vm6054_vm1, %v6053_v1  ;;  %v4734_v53 = vld [vmem:[%s6115_s23 + $0x958] sm:$0xff] }
 0x251   : > { %v7565_v49 = vadd.f32 %v2654_v57, %v2397_v21  ;;  %v4682_v21 = vld [vmem:[%s6115_s23 + $0x890] sm:$0xff] }
 0x252   : > { %v2338_v29 = vpop.f32.mrb[182].mxu0  ;;  %v2659_v7 = vpop.f32.mrb[182].mxu1 }
 0x253   : > { %v2398_v47 = vadd.f32 %v2338_v29, %v7301_v19  ;;  %v5591_v62 = vpop.f32.mrb[183].mxu0  ;;  %5907 = vmatmul.mubr.msk.f32.gmra.mrb[32].mxu0 %vm264_vm2, %v4677_v25  ;;  %v5668_v5 = vpop.f32.mrb[183].mxu1  ;;  %5984 = vmatmul.mubr.msk.f32.gmra.mrb[32].mxu1 %vm264_vm2, %v4729_v12 }
 0x254   : > { %5909 = vmatprep.mubr.msk.f32.mxu0 %vm6054_vm1, %v6053_v1  ;;  %5986 = vmatprep.mubr.msk.f32.mxu1 %vm6054_vm1, %v6053_v1 }
 0x255   : > { %v7576_v61 = vadd.f32 %v2659_v7, %v2398_v47 }
 0x256   : > { %v2343_v40 = vpop.f32.mrb[184].mxu0  ;;  %v2664_v19 = vpop.f32.mrb[184].mxu1 }
 0x257   : > { %v2399_v43 = vadd.f32 %v2343_v40, %v7312_v31  ;;  %v5594_v8 = vpop.f32.mrb[185].mxu0  ;;  %5910 = vmatmul.mubr.msk.f32.gmra.mrb[34].mxu0 %vm264_vm2, %v4678_v35  ;;  %v5671_v24 = vpop.f32.mrb[185].mxu1  ;;  %5987 = vmatmul.mubr.msk.f32.gmra.mrb[34].mxu1 %vm264_vm2, %v4730_v20 }
 0x258   : > { %5912 = vmatprep.mubr.msk.f32.mxu0 %vm6054_vm1, %v6053_v1  ;;  %5989 = vmatprep.mubr.msk.f32.mxu1 %vm6054_vm1, %v6053_v1 }
 0x259   : > { %v7587_v11 = vadd.f32 %v2664_v19, %v2399_v43 }
 0x25a   : > { %v2348_v50 = vpop.f32.mrb[186].mxu0  ;;  %v2669_v31 = vpop.f32.mrb[186].mxu1 }
 0x25b   : > { %v2400_v55 = vadd.f32 %v2348_v50, %v7323_v41  ;;  %v5597_v18 = vpop.f32.mrb[187].mxu0  ;;  %5913 = vmatmul.mubr.msk.f32.gmra.mrb[36].mxu0 %vm264_vm2, %v4679_v48  ;;  %v5674_v34 = vpop.f32.mrb[187].mxu1  ;;  %5990 = vmatmul.mubr.msk.f32.gmra.mrb[36].mxu1 %vm264_vm2, %v4731_v28 }
 0x25c   : > { %5915 = vmatprep.mubr.msk.f32.mxu0 %vm6054_vm1, %v6053_v1  ;;  %5992 = vmatprep.mubr.msk.f32.mxu1 %vm6054_vm1, %v6053_v1 }
 0x25d   : > { %v7598_v22 = vadd.f32 %v2669_v31, %v2400_v55 }
 0x25e   : > { %v2353_v63 = vpop.f32.mrb[188].mxu0  ;;  %v2674_v41 = vpop.f32.mrb[188].mxu1 }
 0x25f   : > { %v2401_v6 = vadd.f32 %v2353_v63, %v7334_v52  ;;  %v5600_v27 = vpop.f32.mrb[189].mxu0  ;;  %5916 = vmatmul.mubr.msk.f32.gmra.mrb[38].mxu0 %vm264_vm2, %v4680_v60  ;;  %v5677_v46 = vpop.f32.mrb[189].mxu1  ;;  %5993 = vmatmul.mubr.msk.f32.gmra.mrb[38].mxu1 %vm264_vm2, %v4732_v36 }
 0x260   : > { %5918 = vmatprep.mubr.msk.f32.mxu0 %vm6054_vm1, %v6053_v1  ;;  %5995 = vmatprep.mubr.msk.f32.mxu1 %vm6054_vm1, %v6053_v1 }
 0x261   : > { %v7609_v33 = vadd.f32 %v2674_v41, %v2401_v6 }
 0x262   : > { %v2358_v13 = vpop.f32.mrb[190].mxu0  ;;  %v2679_v52 = vpop.f32.mrb[190].mxu1 }
 0x263   : > { %v2402_v38 = vadd.f32 %v2358_v13, %v7345_v0  ;;  %v5603_v17 = vpop.f32.mrb[191].mxu0  ;;  %5919 = vmatmul.mubr.msk.f32.gmra.mrb[40].mxu0 %vm264_vm2, %v4681_v10  ;;  %v5680_v57 = vpop.f32.mrb[191].mxu1  ;;  %5996 = vmatmul.mubr.msk.f32.gmra.mrb[40].mxu1 %vm264_vm2, %v4733_v45 }
 0x264   : > { %5921 = vmatprep.mubr.msk.f32.mxu0 %vm6054_vm1, %v6053_v1  ;;  %5998 = vmatprep.mubr.msk.f32.mxu1 %vm6054_vm1, %v6053_v1 }
 0x265   : > { %v7620_v56 = vadd.f32 %v2679_v52, %v2402_v38 }
 0x266   : > { %v2363_v25 = vpop.f32.mrb[192].mxu0  ;;  %v2684_v12 = vpop.f32.mrb[192].mxu1 }
 0x267   : > { %v2403_v0 = vadd.f32 %v2363_v25, %v7356_v14  ;;  %v5606_v29 = vpop.f32.mrb[193].mxu0  ;;  %5922 = vmatmul.mubr.msk.f32.gmra.mrb[42].mxu0 %vm264_vm2, %v4682_v21  ;;  %v5683_v7 = vpop.f32.mrb[193].mxu1  ;;  %5999 = vmatmul.mubr.msk.f32.gmra.mrb[42].mxu1 %vm264_vm2, %v4734_v53 }
 0x269   : > { %v7625_v47 = vadd.f32 %v2684_v12, %v2403_v0 }
 0x26a   : > { %v2368_v62 = vpop.f32.mrb[194].mxu0  ;;  %v2689_v5 = vpop.f32.mrb[194].mxu1 }
 0x26b   : > { %v2404_v35 = vadd.f32 %v2368_v62, %v7367_v58  ;;  %v5609_v1 = vpop.f32.mrb[195].mxu0  ;;  %v5686_v20 = vpop.f32.mrb[195].mxu1 }
 0x26d   : > { %v7628_v40 = vadd.f32 %v2689_v5, %v2404_v35 }
 0x26e   : > { %v2373_v19 = vpop.f32.mrb[196].mxu0  ;;  %v2694_v43 = vpop.f32.mrb[196].mxu1 }
 0x26f   : > { %v2405_v14 = vadd.f32 %v2373_v19, %v7378_v2  ;;  %v5612_v8 = vpop.f32.mrb[197].mxu0  ;;  %v5689_v24 = vpop.f32.mrb[197].mxu1 }
 0x271   : > { %v7631_v48 = vadd.f32 %v2694_v43, %v2405_v14 }
 0x272   : > { %v2378_v28 = vpop.f32.mrb[198].mxu0  ;;  %v2699_v50 = vpop.f32.mrb[198].mxu1 }
 0x273   : > { %v2406_v31 = vadd.f32 %v2378_v28, %v7389_v9  ;;  %v5615_v55 = vpop.f32.mrb[199].mxu0  ;;  %v5692_v18 = vpop.f32.mrb[199].mxu1 }
 0x275   : > { %v7634_v34 = vadd.f32 %v2699_v50, %v2406_v31 }
 0x276   : > { %v2900_v58 = vpop.f32.mrb[200].mxu0  ;;  %v3221_v60 = vpop.f32.mrb[200].mxu1 }
 0x277   : > { %v3024_v36 = vadd.f32 %v2900_v58, %v7400_v16  ;;  %v5697_v63 = vpop.f32.mrb[201].mxu0  ;;  %v5774_v41 = vpop.f32.mrb[201].mxu1 }
 0x279   : > { %v7637_v6 = vadd.f32 %v3221_v60, %v3024_v36 }
 0x27a   : > { %v2905_v2 = vpop.f32.mrb[202].mxu0  ;;  %v3226_v27 = vpop.f32.mrb[202].mxu1 }
 0x27b   : > { %v3025_v46 = vadd.f32 %v2905_v2, %v7411_v23  ;;  %v5700_v10 = vpop.f32.mrb[203].mxu0  ;;  %v5777_v45 = vpop.f32.mrb[203].mxu1 }
 0x27d   : > { %v7640_v13 = vadd.f32 %v3226_v27, %v3025_v46 }
 0x27e   : > { %v2910_v9 = vpop.f32.mrb[204].mxu0  ;;  %v3231_v52 = vpop.f32.mrb[204].mxu1 }
 0x27f   : > { %v3026_v38 = vadd.f32 %v2910_v9, %v7422_v30  ;;  %v5703_v17 = vpop.f32.mrb[205].mxu0  ;;  %v5780_v57 = vpop.f32.mrb[205].mxu1 }
 0x281   : > { %v7643_v21 = vadd.f32 %v3231_v52, %v3026_v38 }
 0x282   : > { %v2915_v16 = vpop.f32.mrb[206].mxu0  ;;  %v3236_v53 = vpop.f32.mrb[206].mxu1 }
 0x283   : > { %v3027_v25 = vadd.f32 %v2915_v16, %v7433_v37  ;;  %v5706_v12 = vpop.f32.mrb[207].mxu0  ;;  %v5783_v0 = vpop.f32.mrb[207].mxu1 }
 0x285   : > { %v7646_v29 = vadd.f32 %v3236_v53, %v3027_v25 }
 0x286   : > { %v2920_v23 = vpop.f32.mrb[208].mxu0  ;;  %v3241_v7 = vpop.f32.mrb[208].mxu1 }
 0x287   : > { %v3028_v62 = vadd.f32 %v2920_v23, %v7444_v44  ;;  %v5709_v5 = vpop.f32.mrb[209].mxu0  ;;  %v5786_v35 = vpop.f32.mrb[209].mxu1 }
 0x289   : > { %v7649_v1 = vadd.f32 %v3241_v7, %v3028_v62 }
 0x28a   : > { %v2925_v30 = vpop.f32.mrb[210].mxu0  ;;  %v3246_v20 = vpop.f32.mrb[210].mxu1 }
 0x28b   : > { %v3029_v19 = vadd.f32 %v2925_v30, %v7455_v51  ;;  %v5712_v43 = vpop.f32.mrb[211].mxu0  ;;  %v5789_v14 = vpop.f32.mrb[211].mxu1 }
 0x28d   : > { %v7652_v8 = vadd.f32 %v3246_v20, %v3029_v19 }
 0x28e   : > { %v2930_v37 = vpop.f32.mrb[212].mxu0  ;;  %v3251_v24 = vpop.f32.mrb[212].mxu1 }
 0x28f   : > { %v3030_v28 = vadd.f32 %v2930_v37, %v7466_v59  ;;  %v5715_v50 = vpop.f32.mrb[213].mxu0  ;;  %v5792_v31 = vpop.f32.mrb[213].mxu1 }
 0x291   : > { %v7655_v55 = vadd.f32 %v3251_v24, %v3030_v28 }
 0x292   : > { %v2935_v44 = vpop.f32.mrb[214].mxu0  ;;  %v3256_v18 = vpop.f32.mrb[214].mxu1 }
 0x293   : > { %v3031_v58 = vadd.f32 %v2935_v44, %v7477_v4  ;;  %v5718_v60 = vpop.f32.mrb[215].mxu0  ;;  %v5795_v36 = vpop.f32.mrb[215].mxu1 }
 0x295   : > { %v7658_v63 = vadd.f32 %v3256_v18, %v3031_v58 }
 0x296   : > { %v2940_v51 = vpop.f32.mrb[216].mxu0  ;;  %v3261_v41 = vpop.f32.mrb[216].mxu1 }
 0x297   : > { %v3032_v2 = vadd.f32 %v2940_v51, %v7488_v32  ;;  %v5721_v27 = vpop.f32.mrb[217].mxu0  ;;  %v5798_v46 = vpop.f32.mrb[217].mxu1 }
 0x299   : > { %v7661_v10 = vadd.f32 %v3261_v41, %v3032_v2 }
 0x29a   : > { %v2945_v59 = vpop.f32.mrb[218].mxu0  ;;  %v3266_v45 = vpop.f32.mrb[218].mxu1 }
 0x29b   : > { %v3033_v9 = vadd.f32 %v2945_v59, %v7499_v42  ;;  %v5724_v52 = vpop.f32.mrb[219].mxu0  ;;  %v5801_v38 = vpop.f32.mrb[219].mxu1 }
 0x29d   : > { %v7664_v17 = vadd.f32 %v3266_v45, %v3033_v9 }
 0x29e   : > { %v2950_v4 = vpop.f32.mrb[220].mxu0  ;;  %v3271_v57 = vpop.f32.mrb[220].mxu1 }
 0x29f   : > { %v3034_v16 = vadd.f32 %v2950_v4, %v7510_v54  ;;  %v5727_v53 = vpop.f32.mrb[221].mxu0  ;;  %v5804_v25 = vpop.f32.mrb[221].mxu1 }
 0x2a1   : > { %v7667_v12 = vadd.f32 %v3271_v57, %v3034_v16 }
 0x2a2   : > { %v2955_v32 = vpop.f32.mrb[222].mxu0  ;;  %v3276_v0 = vpop.f32.mrb[222].mxu1 }
 0x2a3   : > { %v3035_v23 = vadd.f32 %v2955_v32, %v7521_v3  ;;  %v5730_v7 = vpop.f32.mrb[223].mxu0  ;;  %v5807_v62 = vpop.f32.mrb[223].mxu1 }
 0x2a5   : > { %v7670_v5 = vadd.f32 %v3276_v0, %v3035_v23 }
 0x2a6   : > { %v2960_v42 = vpop.f32.mrb[224].mxu0  ;;  %v3281_v35 = vpop.f32.mrb[224].mxu1 }
 0x2a7   : > { %v3036_v30 = vadd.f32 %v2960_v42, %v7532_v15  ;;  %v5733_v20 = vpop.f32.mrb[225].mxu0  ;;  %v5810_v19 = vpop.f32.mrb[225].mxu1 }
 0x2a9   : > { %v7673_v43 = vadd.f32 %v3281_v35, %v3036_v30 }
 0x2aa   : > { %v2965_v54 = vpop.f32.mrb[226].mxu0  ;;  %v3286_v14 = vpop.f32.mrb[226].mxu1 }
 0x2ab   : > { %v3037_v37 = vadd.f32 %v2965_v54, %v7543_v26  ;;  %v5736_v24 = vpop.f32.mrb[227].mxu0  ;;  %v5813_v28 = vpop.f32.mrb[227].mxu1 }
 0x2ad   : > { %v7676_v50 = vadd.f32 %v3286_v14, %v3037_v37 }
 0x2ae   : > { %v2970_v3 = vpop.f32.mrb[228].mxu0  ;;  %v3291_v31 = vpop.f32.mrb[228].mxu1 }
 0x2af   : > { %v3038_v44 = vadd.f32 %v2970_v3, %v7554_v39  ;;  %v5739_v18 = vpop.f32.mrb[229].mxu0  ;;  %v5816_v58 = vpop.f32.mrb[229].mxu1 }
 0x2b1   : > { %v7679_v60 = vadd.f32 %v3291_v31, %v3038_v44 }
 0x2b2   : > { %v2975_v15 = vpop.f32.mrb[230].mxu0  ;;  %v3296_v36 = vpop.f32.mrb[230].mxu1 }
 0x2b3   : > { %v3039_v51 = vadd.f32 %v2975_v15, %v7565_v49  ;;  %v5742_v41 = vpop.f32.mrb[231].mxu0  ;;  %v5819_v2 = vpop.f32.mrb[231].mxu1 }
 0x2b5   : > { %v7682_v27 = vadd.f32 %v3296_v36, %v3039_v51 }
 0x2b6   : > { %v2980_v26 = vpop.f32.mrb[232].mxu0  ;;  %v3301_v46 = vpop.f32.mrb[232].mxu1 }
 0x2b7   : > { %v3040_v59 = vadd.f32 %v2980_v26, %v7576_v61  ;;  %v5745_v45 = vpop.f32.mrb[233].mxu0  ;;  %v5822_v9 = vpop.f32.mrb[233].mxu1 }
 0x2b9   : > { %v7685_v52 = vadd.f32 %v3301_v46, %v3040_v59 }
 0x2ba   : > { %v2985_v39 = vpop.f32.mrb[234].mxu0  ;;  %v3306_v38 = vpop.f32.mrb[234].mxu1 }
 0x2bb   : > { %v3041_v4 = vadd.f32 %v2985_v39, %v7587_v11  ;;  %v5748_v57 = vpop.f32.mrb[235].mxu0  ;;  %v5825_v16 = vpop.f32.mrb[235].mxu1 }
 0x2bd   : > { %v7688_v53 = vadd.f32 %v3306_v38, %v3041_v4 }
 0x2be   : > { %v2990_v49 = vpop.f32.mrb[236].mxu0  ;;  %v3311_v25 = vpop.f32.mrb[236].mxu1 }
 0x2bf   : > { %v3042_v32 = vadd.f32 %v2990_v49, %v7598_v22  ;;  %v5751_v0 = vpop.f32.mrb[237].mxu0  ;;  %v5828_v23 = vpop.f32.mrb[237].mxu1 }
 0x2c1   : > { %v7691_v7 = vadd.f32 %v3311_v25, %v3042_v32 }
 0x2c2   : > { %v2995_v61 = vpop.f32.mrb[238].mxu0  ;;  %v3316_v62 = vpop.f32.mrb[238].mxu1 }
 0x2c3   : > { %v3043_v42 = vadd.f32 %v2995_v61, %v7609_v33  ;;  %v5754_v35 = vpop.f32.mrb[239].mxu0  ;;  %v5831_v30 = vpop.f32.mrb[239].mxu1 }
 0x2c5   : > { %v7694_v20 = vadd.f32 %v3316_v62, %v3043_v42 }
 0x2c6   : > { %v3000_v11 = vpop.f32.mrb[240].mxu0  ;;  %v3321_v19 = vpop.f32.mrb[240].mxu1 }
 0x2c7   : > { %v3044_v54 = vadd.f32 %v3000_v11, %v7620_v56  ;;  %v5757_v14 = vpop.f32.mrb[241].mxu0  ;;  %v5834_v37 = vpop.f32.mrb[241].mxu1 }
 0x2c9   : > { %v7697_v24 = vadd.f32 %v3321_v19, %v3044_v54 }
 0x2ca   : > { %v3005_v22 = vpop.f32.mrb[242].mxu0  ;;  %v3326_v28 = vpop.f32.mrb[242].mxu1 }
 0x2cb   : > { %v3045_v3 = vadd.f32 %v3005_v22, %v7625_v47  ;;  %v5760_v31 = vpop.f32.mrb[243].mxu0  ;;  %v5837_v44 = vpop.f32.mrb[243].mxu1 }
 0x2cd   : > { %v7700_v18 = vadd.f32 %v3326_v28, %v3045_v3 }
 0x2ce   : > { %v3010_v33 = vpop.f32.mrb[244].mxu0  ;;  %v3331_v58 = vpop.f32.mrb[244].mxu1 }
 0x2cf   : > { %v3046_v15 = vadd.f32 %v3010_v33, %v7628_v40  ;;  %v5763_v36 = vpop.f32.mrb[245].mxu0  ;;  %v5840_v51 = vpop.f32.mrb[245].mxu1 }
 0x2d1   : > { %v7703_v56 = vadd.f32 %v3331_v58, %v3046_v15 }
 0x2d2   : > { %v3015_v41 = vpop.f32.mrb[246].mxu0  ;;  %v3336_v2 = vpop.f32.mrb[246].mxu1 }
 0x2d3   : > { %v3047_v26 = vadd.f32 %v3015_v41, %v7631_v48  ;;  %v5766_v46 = vpop.f32.mrb[247].mxu0  ;;  %v5843_v59 = vpop.f32.mrb[247].mxu1  ;;  %v7716_v48 = vld [vmem:[%s7833_s2] ss:$0 sm:$0xff] }
 0x2d5   : > { %v7706_v47 = vadd.f32 %v3336_v2, %v3047_v26 }
 0x2d6   : > { %v3020_v45 = vpop.f32.mrb[248].mxu0  ;;  %v3341_v9 = vpop.f32.mrb[248].mxu1 }
 0x2d7   : > { %v3048_v39 = vadd.f32 %v3020_v45, %v7634_v34  ;;  %v5769_v38 = vpop.f32.mrb[249].mxu0  ;;  %v5846_v4 = vpop.f32.mrb[249].mxu1 }
 0x2d9   : > { %v7709_v40 = vadd.f32 %v3341_v9, %v3048_v39 }
 0x2da   : > { %v3542_v57 = vpop.f32.mrb[250].mxu0  ;;  %v3863_v16 = vpop.f32.mrb[250].mxu1 }
 0x2db   : > { %v3666_v49 = vadd.f32 %v3542_v57, %v7637_v6  ;;  %v5851_v25 = vpop.f32.mrb[251].mxu0  ;;  %v5928_v32 = vpop.f32.mrb[251].mxu1 }
 0x2dd   : > { %v3987_v0 = vadd.f32 %v3863_v16, %v3666_v49 }
 0x2de   : > { %v3547_v34 = vpop.f32.mrb[252].mxu0  ;;  %v3868_v23 = vpop.f32.mrb[252].mxu1 }
 0x2df   : > { %v4019_v6 = vadd.f32 %v7716_v48, %v3987_v0  ;;  %v3667_v61 = vadd.f32 %v3547_v34, %v7640_v13  ;;  %v5854_v62 = vpop.f32.mrb[253].mxu0  ;;  %v5931_v42 = vpop.f32.mrb[253].mxu1 }
 0x2e1   : > { %4045 = vst.msk [vmem:[%s7721_s26] sm:$0xff] %vm4044_vm3, %v4019_v6  ;;  %v3988_v35 = vadd.f32 %v3868_v23, %v3667_v61 }
 0x2e2   : > { %v3552_v30 = vpop.f32.mrb[254].mxu0  ;;  %v3873_v11 = vpop.f32.mrb[254].mxu1 }
 0x2e3   : > { %v4020_v19 = vadd.f32 %v7716_v48, %v3988_v35  ;;  %v3668_v54 = vadd.f32 %v3552_v30, %v7643_v21  ;;  %v5857_v14 = vpop.f32.mrb[255].mxu0  ;;  %v5934_v37 = vpop.f32.mrb[255].mxu1 }
 0x2e5   : > { %4046 = vst.msk [vmem:[%s7721_s26 + $0x8] sm:$0xff] %vm4044_vm3, %v4020_v19  ;;  %v3989_v22 = vadd.f32 %v3873_v11, %v3668_v54 }
 0x2e6   : > { %v3557_v28 = vpop.f32.mrb[0].mxu0  ;;  %v3878_v13 = vpop.f32.mrb[0].mxu1 }
 0x2e7   : > { %v4021_v3 = vadd.f32 %v7716_v48, %v3989_v22  ;;  %v3669_v31 = vadd.f32 %v3557_v28, %v7646_v29  ;;  %v5860_v44 = vpop.f32.mrb[1].mxu0  ;;  %v5937_v33 = vpop.f32.mrb[1].mxu1 }
 0x2e9   : > { %4047 = vst.msk [vmem:[%s7721_s26 + $0x10] sm:$0xff] %vm4044_vm3, %v4021_v3  ;;  %v3990_v58 = vadd.f32 %v3878_v13, %v3669_v31 }
 0x2ea   : > { %v3562_v15 = vpop.f32.mrb[2].mxu0  ;;  %v3883_v21 = vpop.f32.mrb[2].mxu1 }
 0x2eb   : > { %v4022_v36 = vadd.f32 %v7716_v48, %v3990_v58  ;;  %v3670_v51 = vadd.f32 %v3562_v15, %v7649_v1  ;;  %v5863_v41 = vpop.f32.mrb[3].mxu0  ;;  %v5940_v2 = vpop.f32.mrb[3].mxu1 }
 0x2ed   : > { %4048 = vst.msk [vmem:[%s7721_s26 + $0x18] sm:$0xff] %vm4044_vm3, %v4022_v36  ;;  %v3991_v26 = vadd.f32 %v3883_v21, %v3670_v51 }
 0x2ee   : > { %v3567_v46 = vpop.f32.mrb[4].mxu0  ;;  %v3888_v29 = vpop.f32.mrb[4].mxu1 }
 0x2ef   : > { %v4023_v59 = vadd.f32 %v7716_v48, %v3991_v26  ;;  %v3671_v45 = vadd.f32 %v3567_v46, %v7652_v8  ;;  %v5866_v9 = vpop.f32.mrb[5].mxu0  ;;  %v5943_v39 = vpop.f32.mrb[5].mxu1 }
 0x2f1   : > { %4049 = vst.msk [vmem:[%s7721_s26 + $0x20] sm:$0xff] %vm4044_vm3, %v4023_v59  ;;  %v3992_v38 = vadd.f32 %v3888_v29, %v3671_v45 }
 0x2f2   : > { %v3572_v4 = vpop.f32.mrb[6].mxu0  ;;  %v3893_v1 = vpop.f32.mrb[6].mxu1 }
 0x2f3   : > { %v4024_v57 = vadd.f32 %v7716_v48, %v3992_v38  ;;  %v3672_v16 = vadd.f32 %v3572_v4, %v7655_v55  ;;  %v5869_v49 = vpop.f32.mrb[7].mxu0  ;;  %v5946_v25 = vpop.f32.mrb[7].mxu1 }
 0x2f5   : > { %4050 = vst.msk [vmem:[%s7721_s26 + $0x28] sm:$0xff] %vm4044_vm3, %v4024_v57  ;;  %v3993_v32 = vadd.f32 %v3893_v1, %v3672_v16 }
 0x2f6   : > { %v3577_v0 = vpop.f32.mrb[8].mxu0  ;;  %v3898_v8 = vpop.f32.mrb[8].mxu1 }
 0x2f7   : > { %v4025_v34 = vadd.f32 %v7716_v48, %v3993_v32  ;;  %v3673_v23 = vadd.f32 %v3577_v0, %v7658_v63  ;;  %v5872_v6 = vpop.f32.mrb[9].mxu0  ;;  %v5949_v61 = vpop.f32.mrb[9].mxu1 }
 0x2f9   : > { %4051 = vst.msk [vmem:[%s7721_s26 + $0x30] sm:$0xff] %vm4044_vm3, %v4025_v34  ;;  %v3994_v62 = vadd.f32 %v3898_v8, %v3673_v23 }
 0x2fa   : > { %v3582_v42 = vpop.f32.mrb[10].mxu0  ;;  %v3903_v55 = vpop.f32.mrb[10].mxu1 }
 0x2fb   : > { %v4026_v35 = vadd.f32 %v7716_v48, %v3994_v62  ;;  %v3674_v30 = vadd.f32 %v3582_v42, %v7661_v10  ;;  %v5875_v11 = vpop.f32.mrb[11].mxu0  ;;  %v5952_v19 = vpop.f32.mrb[11].mxu1 }
 0x2fd   : > { %4052 = vst.msk [vmem:[%s7721_s26 + $0x38] sm:$0xff] %vm4044_vm3, %v4026_v35  ;;  %v3995_v54 = vadd.f32 %v3903_v55, %v3674_v30 }
 0x2fe   : > { %v3587_v14 = vpop.f32.mrb[12].mxu0  ;;  %v3908_v63 = vpop.f32.mrb[12].mxu1 }
 0x2ff   : > { %v4027_v37 = vadd.f32 %v7716_v48, %v3995_v54  ;;  %v3675_v22 = vadd.f32 %v3587_v14, %v7664_v17  ;;  %v5878_v28 = vpop.f32.mrb[13].mxu0  ;;  %v5955_v13 = vpop.f32.mrb[13].mxu1 }
 0x301   : > { %4053 = vst.msk [vmem:[%s7721_s26 + $0x40] sm:$0xff] %vm4044_vm3, %v4027_v37  ;;  %v3996_v3 = vadd.f32 %v3908_v63, %v3675_v22 }
 0x302   : > { %v3592_v31 = vpop.f32.mrb[14].mxu0  ;;  %v3913_v10 = vpop.f32.mrb[14].mxu1 }
 0x303   : > { %v4028_v44 = vadd.f32 %v7716_v48, %v3996_v3  ;;  %v3676_v33 = vadd.f32 %v3592_v31, %v7667_v12  ;;  %v5881_v58 = vpop.f32.mrb[15].mxu0  ;;  %v5958_v15 = vpop.f32.mrb[15].mxu1 }
 0x305   : > { %4054 = vst.msk [vmem:[%s7721_s26 + $0x48] sm:$0xff] %vm4044_vm3, %v4028_v44  ;;  %v3997_v21 = vadd.f32 %v3913_v10, %v3676_v33 }
 0x306   : > { %v3597_v36 = vpop.f32.mrb[16].mxu0  ;;  %v3918_v17 = vpop.f32.mrb[16].mxu1 }
 0x307   : > { %v4029_v51 = vadd.f32 %v7716_v48, %v3997_v21  ;;  %v3677_v41 = vadd.f32 %v3597_v36, %v7670_v5  ;;  %v5884_v2 = vpop.f32.mrb[17].mxu0  ;;  %v5961_v26 = vpop.f32.mrb[17].mxu1 }
 0x309   : > { %4055 = vst.msk [vmem:[%s7721_s26 + $0x50] sm:$0xff] %vm4044_vm3, %v4029_v51  ;;  %v3998_v46 = vadd.f32 %v3918_v17, %v3677_v41 }
 0x30a   : > { %v3602_v29 = vpop.f32.mrb[18].mxu0  ;;  %v3923_v12 = vpop.f32.mrb[18].mxu1 }
 0x30b   : > { %v4030_v59 = vadd.f32 %v7716_v48, %v3998_v46  ;;  %v3678_v45 = vadd.f32 %v3602_v29, %v7673_v43  ;;  %v5887_v9 = vpop.f32.mrb[19].mxu0  ;;  %v5964_v39 = vpop.f32.mrb[19].mxu1 }
 0x30d   : > { %4056 = vst.msk [vmem:[%s7721_s26 + $0x58] sm:$0xff] %vm4044_vm3, %v4030_v59  ;;  %v3999_v38 = vadd.f32 %v3923_v12, %v3678_v45 }
 0x30e   : > { %v3607_v4 = vpop.f32.mrb[20].mxu0  ;;  %v3928_v5 = vpop.f32.mrb[20].mxu1 }
 0x30f   : > { %v4031_v1 = vadd.f32 %v7716_v48, %v3999_v38  ;;  %v3679_v57 = vadd.f32 %v3607_v4, %v7676_v50  ;;  %v5890_v16 = vpop.f32.mrb[21].mxu0  ;;  %v5967_v49 = vpop.f32.mrb[21].mxu1 }
 0x311   : > { %4057 = vst.msk [vmem:[%s7721_s26 + $0x60] sm:$0xff] %vm4044_vm3, %v4031_v1  ;;  %v4000_v25 = vadd.f32 %v3928_v5, %v3679_v57 }
 0x312   : > { %v3612_v32 = vpop.f32.mrb[22].mxu0  ;;  %v3933_v43 = vpop.f32.mrb[22].mxu1 }
 0x313   : > { %v4032_v0 = vadd.f32 %v7716_v48, %v4000_v25  ;;  %v3680_v8 = vadd.f32 %v3612_v32, %v7679_v60  ;;  %v5893_v34 = vpop.f32.mrb[23].mxu0  ;;  %v5970_v23 = vpop.f32.mrb[23].mxu1 }
 0x315   : > { %4058 = vst.msk [vmem:[%s7721_s26 + $0x68] sm:$0xff] %vm4044_vm3, %v4032_v0  ;;  %v4001_v6 = vadd.f32 %v3933_v43, %v3680_v8 }
 0x316   : > { %v3617_v61 = vpop.f32.mrb[24].mxu0  ;;  %v3938_v50 = vpop.f32.mrb[24].mxu1 }
 0x317   : > { %v4033_v62 = vadd.f32 %v7716_v48, %v4001_v6  ;;  %v3681_v42 = vadd.f32 %v3617_v61, %v7682_v27  ;;  %v5896_v55 = vpop.f32.mrb[25].mxu0  ;;  %v5973_v35 = vpop.f32.mrb[25].mxu1 }
 0x319   : > { %4059 = vst.msk [vmem:[%s7721_s26 + $0x70] sm:$0xff] %vm4044_vm3, %v4033_v62  ;;  %v4002_v30 = vadd.f32 %v3938_v50, %v3681_v42 }
 0x31a   : > { %v3622_v11 = vpop.f32.mrb[26].mxu0  ;;  %v3943_v60 = vpop.f32.mrb[26].mxu1 }
 0x31b   : > { %v4034_v19 = vadd.f32 %v7716_v48, %v4002_v30  ;;  %v3682_v54 = vadd.f32 %v3622_v11, %v7685_v52  ;;  %v5899_v14 = vpop.f32.mrb[27].mxu0  ;;  %v5976_v63 = vpop.f32.mrb[27].mxu1 }
 0x31d   : > { %4060 = vst.msk [vmem:[%s7721_s26 + $0x78] sm:$0xff] %vm4044_vm3, %v4034_v19  ;;  %v4003_v37 = vadd.f32 %v3943_v60, %v3682_v54 }
 0x31e   : > { %v3627_v22 = vpop.f32.mrb[28].mxu0  ;;  %v3948_v27 = vpop.f32.mrb[28].mxu1 }
 0x31f   : > { %v4035_v28 = vadd.f32 %v7716_v48, %v4003_v37  ;;  %v3683_v13 = vadd.f32 %v3627_v22, %v7688_v53  ;;  %v5902_v3 = vpop.f32.mrb[29].mxu0  ;;  %v5979_v31 = vpop.f32.mrb[29].mxu1 }
 0x321   : > { %4061 = vst.msk [vmem:[%s7721_s26 + $0x80] sm:$0xff] %vm4044_vm3, %v4035_v28  ;;  %v4004_v10 = vadd.f32 %v3948_v27, %v3683_v13 }
 0x322   : > { %v3632_v44 = vpop.f32.mrb[30].mxu0  ;;  %v3953_v52 = vpop.f32.mrb[30].mxu1 }
 0x323   : > { %v4036_v33 = vadd.f32 %v7716_v48, %v4004_v10  ;;  %v3684_v58 = vadd.f32 %v3632_v44, %v7691_v7  ;;  %v5905_v15 = vpop.f32.mrb[31].mxu0  ;;  %v5982_v21 = vpop.f32.mrb[31].mxu1 }
 0x325   : > { %4062 = vst.msk [vmem:[%s7721_s26 + $0x88] sm:$0xff] %vm4044_vm3, %v4036_v33  ;;  %v4005_v36 = vadd.f32 %v3953_v52, %v3684_v58 }
 0x326   : > { %v3637_v17 = vpop.f32.mrb[32].mxu0  ;;  %v3958_v53 = vpop.f32.mrb[32].mxu1 }
 0x327   : > { %v4037_v51 = vadd.f32 %v7716_v48, %v4005_v36  ;;  %v3685_v41 = vadd.f32 %v3637_v17, %v7694_v20  ;;  %v5908_v2 = vpop.f32.mrb[33].mxu0  ;;  %v5985_v26 = vpop.f32.mrb[33].mxu1 }
 0x329   : > { %4063 = vst.msk [vmem:[%s7721_s26 + $0x90] sm:$0xff] %vm4044_vm3, %v4037_v51  ;;  %v4006_v46 = vadd.f32 %v3958_v53, %v3685_v41 }
 0x32a   : > { %v3642_v29 = vpop.f32.mrb[34].mxu0  ;;  %v3963_v7 = vpop.f32.mrb[34].mxu1 }
 0x32b   : > { %v4038_v12 = vadd.f32 %v7716_v48, %v4006_v46  ;;  %v3686_v59 = vadd.f32 %v3642_v29, %v7697_v24  ;;  %v5911_v45 = vpop.f32.mrb[35].mxu0  ;;  %v5988_v9 = vpop.f32.mrb[35].mxu1 }
 0x32d   : > { %4064 = vst.msk [vmem:[%s7721_s26 + $0x98] sm:$0xff] %vm4044_vm3, %v4038_v12  ;;  %v4007_v39 = vadd.f32 %v3963_v7, %v3686_v59 }
 0x32e   : > { %v3647_v38 = vpop.f32.mrb[36].mxu0  ;;  %v3968_v20 = vpop.f32.mrb[36].mxu1 }
 0x32f   : > { %v4039_v4 = vadd.f32 %v7716_v48, %v4007_v39  ;;  %v3687_v5 = vadd.f32 %v3647_v38, %v7700_v18  ;;  %v5914_v1 = vpop.f32.mrb[37].mxu0  ;;  %v5991_v57 = vpop.f32.mrb[37].mxu1 }
 0x331   : > { %4065 = vst.msk [vmem:[%s7721_s26 + $0xa0] sm:$0xff] %vm4044_vm3, %v4039_v4  ;;  %v4008_v16 = vadd.f32 %v3968_v20, %v3687_v5 }
 0x332   : > { %v3652_v49 = vpop.f32.mrb[38].mxu0  ;;  %v3973_v24 = vpop.f32.mrb[38].mxu1 }
 0x333   : > { %v4040_v25 = vadd.f32 %v7716_v48, %v4008_v16  ;;  %v3688_v32 = vadd.f32 %v3652_v49, %v7703_v56  ;;  %v5917_v43 = vpop.f32.mrb[39].mxu0  ;;  %v5994_v0 = vpop.f32.mrb[39].mxu1 }
 0x335   : > { %4066 = vst.msk [vmem:[%s7721_s26 + $0xa8] sm:$0xff] %vm4044_vm3, %v4040_v25  ;;  %v4009_v8 = vadd.f32 %v3973_v24, %v3688_v32 }
 0x336   : > { %v3657_v34 = vpop.f32.mrb[40].mxu0  ;;  %v3978_v18 = vpop.f32.mrb[40].mxu1 }
 0x337   : > { %v4041_v23 = vadd.f32 %v7716_v48, %v4009_v8  ;;  %v3689_v6 = vadd.f32 %v3657_v34, %v7706_v47  ;;  %v5920_v61 = vpop.f32.mrb[41].mxu0  ;;  %v5997_v50 = vpop.f32.mrb[41].mxu1 }
 0x339   : > { %4067 = vst.msk [vmem:[%s7721_s26 + $0xb0] sm:$0xff] %vm4044_vm3, %v4041_v23  ;;  %v4010_v62 = vadd.f32 %v3978_v18, %v3689_v6 }
 0x33a   : > { %v3662_v42 = vpop.f32.mrb[42].mxu0  ;;  %v3983_v56 = vpop.f32.mrb[42].mxu1 }
 0x33b   : > { %v4042_v55 = vadd.f32 %v7716_v48, %v4010_v62  ;;  %v3690_v35 = vadd.f32 %v3662_v42, %v7709_v40  ;;  %v5923_v30 = vpop.f32.mrb[43].mxu0  ;;  %v6000_v11 = vpop.f32.mrb[43].mxu1 }
 0x33d   : > { %4068 = vst.msk [vmem:[%s7721_s26 + $0xb8] sm:$0xff] %vm4044_vm3, %v4042_v55  ;;  %v4011_v60 = vadd.f32 %v3983_v56, %v3690_v35 }
 0x33f   : > { %v4043_v19 = vadd.f32 %v7716_v48, %v4011_v60 }
 0x341   : > { %4069 = vst.msk [vmem:[%s7721_s26 + $0xc0] sm:$0xff] %vm4044_vm3, %v4043_v19 }
 0x342 PF: > { %s13_s14 = sadd.s32 1, %s6051_s14   ;;  %s7835_s12 = smov %s6047_s13 }
 0x343   : > { %p10_p5 = scmp.ge.s32.totalorder %s13_s14, 4   ;;  %s7836_s13 = smov %s7838_s15 }
 0x345   :  { %12 = sbr.rel (!%p10_p5) target bundleno = 2 (0x2), region = 84 }

</bundles_post_ra>
